<compile_context>
chip_gen: v6e
topology: v6e:2x2x1
jax: 0.10.0
libtpu: 0.0.40
codegen_flags: <defaults>
</compile_context>

<pallas_src>
import functools

import jax
import jax.numpy as jnp
from jax.experimental import pallas as pl
from jax.experimental.pallas import tpu as pltpu


_LANES = 128  # vreg lane width


def _dw_xcorr_kernel(x_ref, z_ref, o_ref, *, Hz, Wz):
    # x_ref: (Hx, Wx, L)    search features, one 128-wide lane tile of fused (B*C)
    # z_ref: (Hz*Wz, L)     template taps (pre-flattened), per-lane kernel weights
    # o_ref: (Ho, Wo, L)    "valid" cross-correlation output
    Ho, Wo, L = o_ref.shape

    # Template loaded once as a dense 2D block; stays vreg-resident.
    z = z_ref[...].astype(jnp.float32)

    acc = jnp.zeros((Ho, Wo, L), jnp.float32)
    # v (the sublane-axis shift along Wx) is hoisted to the outer loop so only
    # Wz shifted slices of x are materialized (instead of Hz*Wz).  The inner u
    # loop slices the leading (untiled) axis, which costs nothing.
    for v in range(Wz):
        x_v = x_ref[:, v:v + Wo, :].astype(jnp.float32)          # (Hx, Wo, L)
        for u in range(Hz):
            acc = acc + x_v[u:u + Ho] * z[u * Wz + v][None, None, :]

    o_ref[...] = acc.astype(o_ref.dtype)


def rpn_depthwise_xcorr(z_f_nchw, x_f_nchw):
    """Depthwise 'valid' cross-correlation: out[b,c] = corr(x_f[b,c], z_f[b,c])."""
    B, C, Hz, Wz = z_f_nchw.shape
    _, _, Hx, Wx = x_f_nchw.shape
    Ho, Wo = Hx - Hz + 1, Wx - Wz + 1

    # Fold (B, C) onto the lane axis so the innermost dim is a multiple of 128
    # (full lane occupancy, unmasked vst); zero-pad the fake lanes.
    # TODO(synk): in production keep the backbone output channel-last so these
    #             relayout transposes do not round-trip HBM around the kernel.
    BC = B * C
    Ltot = ((BC + _LANES - 1) // _LANES) * _LANES

    x = jnp.transpose(x_f_nchw, (2, 3, 0, 1)).reshape(Hx, Wx, BC)
    z = jnp.transpose(z_f_nchw, (2, 3, 0, 1)).reshape(Hz, Wz, BC)
    if Ltot != BC:
        x = jnp.pad(x, ((0, 0), (0, 0), (0, Ltot - BC)))
        z = jnp.pad(z, ((0, 0), (0, 0), (0, Ltot - BC)))
    z = z.reshape(Hz * Wz, Ltot)

    kernel = functools.partial(_dw_xcorr_kernel, Hz=Hz, Wz=Wz)
    out = pl.pallas_call(
        kernel,
        out_shape=jax.ShapeDtypeStruct((Ho, Wo, Ltot), x_f_nchw.dtype),
        grid=(Ltot // _LANES,),
        in_specs=[
            pl.BlockSpec((Hx, Wx, _LANES), lambda l: (0, 0, l)),
            pl.BlockSpec((Hz * Wz, _LANES), lambda l: (0, l)),
        ],
        out_specs=pl.BlockSpec((Ho, Wo, _LANES), lambda l: (0, 0, l)),
        compiler_params=pltpu.CompilerParams(
            dimension_semantics=("parallel",)),
    )(x, z)

    # Un-fold lanes -> (B, C) and return NCHW to match the PyTorch convention.
    out = out[:, :, :BC].reshape(Ho, Wo, B, C)
    return jnp.transpose(out, (2, 3, 0, 1))


def _ref_depthwise_xcorr(z_f, x_f):
    """Pure-JAX NCHW reference (same semantics), for correctness checking."""
    B, C, Hz, Wz = z_f.shape
    _, _, Hx, Wx = x_f.shape
    Ho, Wo = Hx - Hz + 1, Wx - Wz + 1
    zf = z_f.astype(jnp.float32)
    xf = x_f.astype(jnp.float32)
    out = jnp.zeros((B, C, Ho, Wo), jnp.float32)
    for u in range(Hz):
        for v in range(Wz):
            out = out + xf[:, :, u:u + Ho, v:v + Wo] * zf[:, :, u:u + 1, v:v + 1]
    return out.astype(x_f.dtype)


if __name__ == "__main__":
    key = jax.random.PRNGKey(0)
    kz, kx = jax.random.split(key)

    # Small, SiamRPN-like shapes (NCHW): template 8x8, search 16x16, C=32, B=2.
    z_f = jax.random.normal(kz, (2, 32, 8, 8), dtype=jnp.float32)
    x_f = jax.random.normal(kx, (2, 32, 16, 16), dtype=jnp.float32)

    out = jax.block_until_ready(rpn_depthwise_xcorr(z_f, x_f))
    ref = _ref_depthwise_xcorr(z_f, x_f)

    assert out.shape == (2, 32, 9, 9), out.shape
    assert jnp.allclose(out, ref, atol=1e-4, rtol=1e-4), float(
        jnp.max(jnp.abs(out - ref)))

    print("KERNEL_OK")
</pallas_src>

<mosaic_0001>
module attributes {stable_mosaic.version = 11 : i64} {
  func.func @_dw_xcorr_kernel(%arg0: i32, %arg1: memref<16x16x128xf32, #tpu.memory_space<vmem>>, %arg2: memref<64x128xf32, #tpu.memory_space<vmem>>, %arg3: memref<9x9x128xf32, #tpu.memory_space<vmem>>) attributes {dimension_semantics = [#tpu.dimension_semantics<parallel>], iteration_bounds = array<i64: 1>, scalar_prefetch = 0 : i64, scratch_operands = 0 : i64, tpu.core_type = #tpu.core_type<tc>, window_params = [{transform_indices = @transform_0, window_bounds = array<i64: 16, 16, 128>}, {transform_indices = @transform_1, window_bounds = array<i64: 64, 128>}, {transform_indices = @transform_2, window_bounds = array<i64: 9, 9, 128>}]} {
    %c0 = arith.constant 0 : index
    %c0_0 = arith.constant 0 : index
    %0 = vector.load %arg2[%c0, %c0_0] : memref<64x128xf32, #tpu.memory_space<vmem>>, vector<64x128xf32>
    %cst = arith.constant 0.000000e+00 : f32
    %1 = vector.broadcast %cst : f32 to vector<9x9x128xf32>
    %c0_1 = arith.constant 0 : index
    %c0_2 = arith.constant 0 : index
    %c0_3 = arith.constant 0 : index
    %2 = vector.load %arg1[%c0_1, %c0_2, %c0_3] : memref<16x16x128xf32, #tpu.memory_space<vmem>>, vector<16x9x128xf32>
    %3 = vector.extract_strided_slice %2 {offsets = [0, 0, 0], sizes = [9, 9, 128], strides = [1, 1, 1]} : vector<16x9x128xf32> to vector<9x9x128xf32>
    %4 = vector.extract_strided_slice %0 {offsets = [0, 0], sizes = [1, 128], strides = [1, 1]} : vector<64x128xf32> to vector<1x128xf32>
    %5 = vector.shape_cast %4 : vector<1x128xf32> to vector<128xf32>
    %6 = vector.shape_cast %5 : vector<128xf32> to vector<1x1x128xf32>
    %7 = vector.broadcast %6 : vector<1x1x128xf32> to vector<9x9x128xf32>
    %8 = arith.mulf %3, %7 : vector<9x9x128xf32>
    %9 = arith.addf %1, %8 : vector<9x9x128xf32>
    %10 = vector.extract_strided_slice %2 {offsets = [1, 0, 0], sizes = [9, 9, 128], strides = [1, 1, 1]} : vector<16x9x128xf32> to vector<9x9x128xf32>
    %11 = vector.extract_strided_slice %0 {offsets = [8, 0], sizes = [1, 128], strides = [1, 1]} : vector<64x128xf32> to vector<1x128xf32>
    %12 = vector.shape_cast %11 : vector<1x128xf32> to vector<128xf32>
    %13 = vector.shape_cast %12 : vector<128xf32> to vector<1x1x128xf32>
    %14 = vector.broadcast %13 : vector<1x1x128xf32> to vector<9x9x128xf32>
    %15 = arith.mulf %10, %14 : vector<9x9x128xf32>
    %16 = arith.addf %9, %15 : vector<9x9x128xf32>
    %17 = vector.extract_strided_slice %2 {offsets = [2, 0, 0], sizes = [9, 9, 128], strides = [1, 1, 1]} : vector<16x9x128xf32> to vector<9x9x128xf32>
    %18 = vector.extract_strided_slice %0 {offsets = [16, 0], sizes = [1, 128], strides = [1, 1]} : vector<64x128xf32> to vector<1x128xf32>
    %19 = vector.shape_cast %18 : vector<1x128xf32> to vector<128xf32>
    %20 = vector.shape_cast %19 : vector<128xf32> to vector<1x1x128xf32>
    %21 = vector.broadcast %20 : vector<1x1x128xf32> to vector<9x9x128xf32>
    %22 = arith.mulf %17, %21 : vector<9x9x128xf32>
    %23 = arith.addf %16, %22 : vector<9x9x128xf32>
    %24 = vector.extract_strided_slice %2 {offsets = [3, 0, 0], sizes = [9, 9, 128], strides = [1, 1, 1]} : vector<16x9x128xf32> to vector<9x9x128xf32>
    %25 = vector.extract_strided_slice %0 {offsets = [24, 0], sizes = [1, 128], strides = [1, 1]} : vector<64x128xf32> to vector<1x128xf32>
    %26 = vector.shape_cast %25 : vector<1x128xf32> to vector<128xf32>
    %27 = vector.shape_cast %26 : vector<128xf32> to vector<1x1x128xf32>
    %28 = vector.broadcast %27 : vector<1x1x128xf32> to vector<9x9x128xf32>
    %29 = arith.mulf %24, %28 : vector<9x9x128xf32>
    %30 = arith.addf %23, %29 : vector<9x9x128xf32>
    %31 = vector.extract_strided_slice %2 {offsets = [4, 0, 0], sizes = [9, 9, 128], strides = [1, 1, 1]} : vector<16x9x128xf32> to vector<9x9x128xf32>
    %32 = vector.extract_strided_slice %0 {offsets = [32, 0], sizes = [1, 128], strides = [1, 1]} : vector<64x128xf32> to vector<1x128xf32>
    %33 = vector.shape_cast %32 : vector<1x128xf32> to vector<128xf32>
    %34 = vector.shape_cast %33 : vector<128xf32> to vector<1x1x128xf32>
    %35 = vector.broadcast %34 : vector<1x1x128xf32> to vector<9x9x128xf32>
    %36 = arith.mulf %31, %35 : vector<9x9x128xf32>
    %37 = arith.addf %30, %36 : vector<9x9x128xf32>
    %38 = vector.extract_strided_slice %2 {offsets = [5, 0, 0], sizes = [9, 9, 128], strides = [1, 1, 1]} : vector<16x9x128xf32> to vector<9x9x128xf32>
    %39 = vector.extract_strided_slice %0 {offsets = [40, 0], sizes = [1, 128], strides = [1, 1]} : vector<64x128xf32> to vector<1x128xf32>
    %40 = vector.shape_cast %39 : vector<1x128xf32> to vector<128xf32>
    %41 = vector.shape_cast %40 : vector<128xf32> to vector<1x1x128xf32>
    %42 = vector.broadcast %41 : vector<1x1x128xf32> to vector<9x9x128xf32>
    %43 = arith.mulf %38, %42 : vector<9x9x128xf32>
    %44 = arith.addf %37, %43 : vector<9x9x128xf32>
    %45 = vector.extract_strided_slice %2 {offsets = [6, 0, 0], sizes = [9, 9, 128], strides = [1, 1, 1]} : vector<16x9x128xf32> to vector<9x9x128xf32>
    %46 = vector.extract_strided_slice %0 {offsets = [48, 0], sizes = [1, 128], strides = [1, 1]} : vector<64x128xf32> to vector<1x128xf32>
    %47 = vector.shape_cast %46 : vector<1x128xf32> to vector<128xf32>
    %48 = vector.shape_cast %47 : vector<128xf32> to vector<1x1x128xf32>
    %49 = vector.broadcast %48 : vector<1x1x128xf32> to vector<9x9x128xf32>
    %50 = arith.mulf %45, %49 : vector<9x9x128xf32>
    %51 = arith.addf %44, %50 : vector<9x9x128xf32>
    %52 = vector.extract_strided_slice %2 {offsets = [7, 0, 0], sizes = [9, 9, 128], strides = [1, 1, 1]} : vector<16x9x128xf32> to vector<9x9x128xf32>
    %53 = vector.extract_strided_slice %0 {offsets = [56, 0], sizes = [1, 128], strides = [1, 1]} : vector<64x128xf32> to vector<1x128xf32>
    %54 = vector.shape_cast %53 : vector<1x128xf32> to vector<128xf32>
    %55 = vector.shape_cast %54 : vector<128xf32> to vector<1x1x128xf32>
    %56 = vector.broadcast %55 : vector<1x1x128xf32> to vector<9x9x128xf32>
    %57 = arith.mulf %52, %56 : vector<9x9x128xf32>
    %58 = arith.addf %51, %57 : vector<9x9x128xf32>
    %c0_4 = arith.constant 0 : index
    %c1 = arith.constant 1 : index
    %c0_5 = arith.constant 0 : index
    %59 = vector.load %arg1[%c0_4, %c1, %c0_5] : memref<16x16x128xf32, #tpu.memory_space<vmem>>, vector<16x9x128xf32>
    %60 = vector.extract_strided_slice %59 {offsets = [0, 0, 0], sizes = [9, 9, 128], strides = [1, 1, 1]} : vector<16x9x128xf32> to vector<9x9x128xf32>
    %61 = vector.extract_strided_slice %0 {offsets = [1, 0], sizes = [1, 128], strides = [1, 1]} : vector<64x128xf32> to vector<1x128xf32>
    %62 = vector.shape_cast %61 : vector<1x128xf32> to vector<128xf32>
    %63 = vector.shape_cast %62 : vector<128xf32> to vector<1x1x128xf32>
    %64 = vector.broadcast %63 : vector<1x1x128xf32> to vector<9x9x128xf32>
    %65 = arith.mulf %60, %64 : vector<9x9x128xf32>
    %66 = arith.addf %58, %65 : vector<9x9x128xf32>
    %67 = vector.extract_strided_slice %59 {offsets = [1, 0, 0], sizes = [9, 9, 128], strides = [1, 1, 1]} : vector<16x9x128xf32> to vector<9x9x128xf32>
    %68 = vector.extract_strided_slice %0 {offsets = [9, 0], sizes = [1, 128], strides = [1, 1]} : vector<64x128xf32> to vector<1x128xf32>
    %69 = vector.shape_cast %68 : vector<1x128xf32> to vector<128xf32>
    %70 = vector.shape_cast %69 : vector<128xf32> to vector<1x1x128xf32>
    %71 = vector.broadcast %70 : vector<1x1x128xf32> to vector<9x9x128xf32>
    %72 = arith.mulf %67, %71 : vector<9x9x128xf32>
    %73 = arith.addf %66, %72 : vector<9x9x128xf32>
    %74 = vector.extract_strided_slice %59 {offsets = [2, 0, 0], sizes = [9, 9, 128], strides = [1, 1, 1]} : vector<16x9x128xf32> to vector<9x9x128xf32>
    %75 = vector.extract_strided_slice %0 {offsets = [17, 0], sizes = [1, 128], strides = [1, 1]} : vector<64x128xf32> to vector<1x128xf32>
    %76 = vector.shape_cast %75 : vector<1x128xf32> to vector<128xf32>
    %77 = vector.shape_cast %76 : vector<128xf32> to vector<1x1x128xf32>
    %78 = vector.broadcast %77 : vector<1x1x128xf32> to vector<9x9x128xf32>
    %79 = arith.mulf %74, %78 : vector<9x9x128xf32>
    %80 = arith.addf %73, %79 : vector<9x9x128xf32>
    %81 = vector.extract_strided_slice %59 {offsets = [3, 0, 0], sizes = [9, 9, 128], strides = [1, 1, 1]} : vector<16x9x128xf32> to vector<9x9x128xf32>
    %82 = vector.extract_strided_slice %0 {offsets = [25, 0], sizes = [1, 128], strides = [1, 1]} : vector<64x128xf32> to vector<1x128xf32>
    %83 = vector.shape_cast %82 : vector<1x128xf32> to vector<128xf32>
    %84 = vector.shape_cast %83 : vector<128xf32> to vector<1x1x128xf32>
    %85 = vector.broadcast %84 : vector<1x1x128xf32> to vector<9x9x128xf32>
    %86 = arith.mulf %81, %85 : vector<9x9x128xf32>
    %87 = arith.addf %80, %86 : vector<9x9x128xf32>
    %88 = vector.extract_strided_slice %59 {offsets = [4, 0, 0], sizes = [9, 9, 128], strides = [1, 1, 1]} : vector<16x9x128xf32> to vector<9x9x128xf32>
    %89 = vector.extract_strided_slice %0 {offsets = [33, 0], sizes = [1, 128], strides = [1, 1]} : vector<64x128xf32> to vector<1x128xf32>
    %90 = vector.shape_cast %89 : vector<1x128xf32> to vector<128xf32>
    %91 = vector.shape_cast %90 : vector<128xf32> to vector<1x1x128xf32>
    %92 = vector.broadcast %91 : vector<1x1x128xf32> to vector<9x9x128xf32>
    %93 = arith.mulf %88, %92 : vector<9x9x128xf32>
    %94 = arith.addf %87, %93 : vector<9x9x128xf32>
    %95 = vector.extract_strided_slice %59 {offsets = [5, 0, 0], sizes = [9, 9, 128], strides = [1, 1, 1]} : vector<16x9x128xf32> to vector<9x9x128xf32>
    %96 = vector.extract_strided_slice %0 {offsets = [41, 0], sizes = [1, 128], strides = [1, 1]} : vector<64x128xf32> to vector<1x128xf32>
    %97 = vector.shape_cast %96 : vector<1x128xf32> to vector<128xf32>
    %98 = vector.shape_cast %97 : vector<128xf32> to vector<1x1x128xf32>
    %99 = vector.broadcast %98 : vector<1x1x128xf32> to vector<9x9x128xf32>
    %100 = arith.mulf %95, %99 : vector<9x9x128xf32>
    %101 = arith.addf %94, %100 : vector<9x9x128xf32>
    %102 = vector.extract_strided_slice %59 {offsets = [6, 0, 0], sizes = [9, 9, 128], strides = [1, 1, 1]} : vector<16x9x128xf32> to vector<9x9x128xf32>
    %103 = vector.extract_strided_slice %0 {offsets = [49, 0], sizes = [1, 128], strides = [1, 1]} : vector<64x128xf32> to vector<1x128xf32>
    %104 = vector.shape_cast %103 : vector<1x128xf32> to vector<128xf32>
    %105 = vector.shape_cast %104 : vector<128xf32> to vector<1x1x128xf32>
    %106 = vector.broadcast %105 : vector<1x1x128xf32> to vector<9x9x128xf32>
    %107 = arith.mulf %102, %106 : vector<9x9x128xf32>
    %108 = arith.addf %101, %107 : vector<9x9x128xf32>
    %109 = vector.extract_strided_slice %59 {offsets = [7, 0, 0], sizes = [9, 9, 128], strides = [1, 1, 1]} : vector<16x9x128xf32> to vector<9x9x128xf32>
    %110 = vector.extract_strided_slice %0 {offsets = [57, 0], sizes = [1, 128], strides = [1, 1]} : vector<64x128xf32> to vector<1x128xf32>
    %111 = vector.shape_cast %110 : vector<1x128xf32> to vector<128xf32>
    %112 = vector.shape_cast %111 : vector<128xf32> to vector<1x1x128xf32>
    %113 = vector.broadcast %112 : vector<1x1x128xf32> to vector<9x9x128xf32>
    %114 = arith.mulf %109, %113 : vector<9x9x128xf32>
    %115 = arith.addf %108, %114 : vector<9x9x128xf32>
    %c0_6 = arith.constant 0 : index
    %c2 = arith.constant 2 : index
    %c0_7 = arith.constant 0 : index
    %116 = vector.load %arg1[%c0_6, %c2, %c0_7] : memref<16x16x128xf32, #tpu.memory_space<vmem>>, vector<16x9x128xf32>
    %117 = vector.extract_strided_slice %116 {offsets = [0, 0, 0], sizes = [9, 9, 128], strides = [1, 1, 1]} : vector<16x9x128xf32> to vector<9x9x128xf32>
    %118 = vector.extract_strided_slice %0 {offsets = [2, 0], sizes = [1, 128], strides = [1, 1]} : vector<64x128xf32> to vector<1x128xf32>
    %119 = vector.shape_cast %118 : vector<1x128xf32> to vector<128xf32>
    %120 = vector.shape_cast %119 : vector<128xf32> to vector<1x1x128xf32>
    %121 = vector.broadcast %120 : vector<1x1x128xf32> to vector<9x9x128xf32>
    %122 = arith.mulf %117, %121 : vector<9x9x128xf32>
    %123 = arith.addf %115, %122 : vector<9x9x128xf32>
    %124 = vector.extract_strided_slice %116 {offsets = [1, 0, 0], sizes = [9, 9, 128], strides = [1, 1, 1]} : vector<16x9x128xf32> to vector<9x9x128xf32>
    %125 = vector.extract_strided_slice %0 {offsets = [10, 0], sizes = [1, 128], strides = [1, 1]} : vector<64x128xf32> to vector<1x128xf32>
    %126 = vector.shape_cast %125 : vector<1x128xf32> to vector<128xf32>
    %127 = vector.shape_cast %126 : vector<128xf32> to vector<1x1x128xf32>
    %128 = vector.broadcast %127 : vector<1x1x128xf32> to vector<9x9x128xf32>
    %129 = arith.mulf %124, %128 : vector<9x9x128xf32>
    %130 = arith.addf %123, %129 : vector<9x9x128xf32>
    %131 = vector.extract_strided_slice %116 {offsets = [2, 0, 0], sizes = [9, 9, 128], strides = [1, 1, 1]} : vector<16x9x128xf32> to vector<9x9x128xf32>
    %132 = vector.extract_strided_slice %0 {offsets = [18, 0], sizes = [1, 128], strides = [1, 1]} : vector<64x128xf32> to vector<1x128xf32>
    %133 = vector.shape_cast %132 : vector<1x128xf32> to vector<128xf32>
    %134 = vector.shape_cast %133 : vector<128xf32> to vector<1x1x128xf32>
    %135 = vector.broadcast %134 : vector<1x1x128xf32> to vector<9x9x128xf32>
    %136 = arith.mulf %131, %135 : vector<9x9x128xf32>
    %137 = arith.addf %130, %136 : vector<9x9x128xf32>
    %138 = vector.extract_strided_slice %116 {offsets = [3, 0, 0], sizes = [9, 9, 128], strides = [1, 1, 1]} : vector<16x9x128xf32> to vector<9x9x128xf32>
    %139 = vector.extract_strided_slice %0 {offsets = [26, 0], sizes = [1, 128], strides = [1, 1]} : vector<64x128xf32> to vector<1x128xf32>
    %140 = vector.shape_cast %139 : vector<1x128xf32> to vector<128xf32>
    %141 = vector.shape_cast %140 : vector<128xf32> to vector<1x1x128xf32>
    %142 = vector.broadcast %141 : vector<1x1x128xf32> to vector<9x9x128xf32>
    %143 = arith.mulf %138, %142 : vector<9x9x128xf32>
    %144 = arith.addf %137, %143 : vector<9x9x128xf32>
    %145 = vector.extract_strided_slice %116 {offsets = [4, 0, 0], sizes = [9, 9, 128], strides = [1, 1, 1]} : vector<16x9x128xf32> to vector<9x9x128xf32>
    %146 = vector.extract_strided_slice %0 {offsets = [34, 0], sizes = [1, 128], strides = [1, 1]} : vector<64x128xf32> to vector<1x128xf32>
    %147 = vector.shape_cast %146 : vector<1x128xf32> to vector<128xf32>
    %148 = vector.shape_cast %147 : vector<128xf32> to vector<1x1x128xf32>
    %149 = vector.broadcast %148 : vector<1x1x128xf32> to vector<9x9x128xf32>
    %150 = arith.mulf %145, %149 : vector<9x9x128xf32>
    %151 = arith.addf %144, %150 : vector<9x9x128xf32>
    %152 = vector.extract_strided_slice %116 {offsets = [5, 0, 0], sizes = [9, 9, 128], strides = [1, 1, 1]} : vector<16x9x128xf32> to vector<9x9x128xf32>
    %153 = vector.extract_strided_slice %0 {offsets = [42, 0], sizes = [1, 128], strides = [1, 1]} : vector<64x128xf32> to vector<1x128xf32>
    %154 = vector.shape_cast %153 : vector<1x128xf32> to vector<128xf32>
    %155 = vector.shape_cast %154 : vector<128xf32> to vector<1x1x128xf32>
    %156 = vector.broadcast %155 : vector<1x1x128xf32> to vector<9x9x128xf32>
    %157 = arith.mulf %152, %156 : vector<9x9x128xf32>
    %158 = arith.addf %151, %157 : vector<9x9x128xf32>
    %159 = vector.extract_strided_slice %116 {offsets = [6, 0, 0], sizes = [9, 9, 128], strides = [1, 1, 1]} : vector<16x9x128xf32> to vector<9x9x128xf32>
    %160 = vector.extract_strided_slice %0 {offsets = [50, 0], sizes = [1, 128], strides = [1, 1]} : vector<64x128xf32> to vector<1x128xf32>
    %161 = vector.shape_cast %160 : vector<1x128xf32> to vector<128xf32>
    %162 = vector.shape_cast %161 : vector<128xf32> to vector<1x1x128xf32>
    %163 = vector.broadcast %162 : vector<1x1x128xf32> to vector<9x9x128xf32>
    %164 = arith.mulf %159, %163 : vector<9x9x128xf32>
    %165 = arith.addf %158, %164 : vector<9x9x128xf32>
    %166 = vector.extract_strided_slice %116 {offsets = [7, 0, 0], sizes = [9, 9, 128], strides = [1, 1, 1]} : vector<16x9x128xf32> to vector<9x9x128xf32>
    %167 = vector.extract_strided_slice %0 {offsets = [58, 0], sizes = [1, 128], strides = [1, 1]} : vector<64x128xf32> to vector<1x128xf32>
    %168 = vector.shape_cast %167 : vector<1x128xf32> to vector<128xf32>
    %169 = vector.shape_cast %168 : vector<128xf32> to vector<1x1x128xf32>
    %170 = vector.broadcast %169 : vector<1x1x128xf32> to vector<9x9x128xf32>
    %171 = arith.mulf %166, %170 : vector<9x9x128xf32>
    %172 = arith.addf %165, %171 : vector<9x9x128xf32>
    %c0_8 = arith.constant 0 : index
    %c3 = arith.constant 3 : index
    %c0_9 = arith.constant 0 : index
    %173 = vector.load %arg1[%c0_8, %c3, %c0_9] : memref<16x16x128xf32, #tpu.memory_space<vmem>>, vector<16x9x128xf32>
    %174 = vector.extract_strided_slice %173 {offsets = [0, 0, 0], sizes = [9, 9, 128], strides = [1, 1, 1]} : vector<16x9x128xf32> to vector<9x9x128xf32>
    %175 = vector.extract_strided_slice %0 {offsets = [3, 0], sizes = [1, 128], strides = [1, 1]} : vector<64x128xf32> to vector<1x128xf32>
    %176 = vector.shape_cast %175 : vector<1x128xf32> to vector<128xf32>
    %177 = vector.shape_cast %176 : vector<128xf32> to vector<1x1x128xf32>
    %178 = vector.broadcast %177 : vector<1x1x128xf32> to vector<9x9x128xf32>
    %179 = arith.mulf %174, %178 : vector<9x9x128xf32>
    %180 = arith.addf %172, %179 : vector<9x9x128xf32>
    %181 = vector.extract_strided_slice %173 {offsets = [1, 0, 0], sizes = [9, 9, 128], strides = [1, 1, 1]} : vector<16x9x128xf32> to vector<9x9x128xf32>
    %182 = vector.extract_strided_slice %0 {offsets = [11, 0], sizes = [1, 128], strides = [1, 1]} : vector<64x128xf32> to vector<1x128xf32>
    %183 = vector.shape_cast %182 : vector<1x128xf32> to vector<128xf32>
    %184 = vector.shape_cast %183 : vector<128xf32> to vector<1x1x128xf32>
    %185 = vector.broadcast %184 : vector<1x1x128xf32> to vector<9x9x128xf32>
    %186 = arith.mulf %181, %185 : vector<9x9x128xf32>
    %187 = arith.addf %180, %186 : vector<9x9x128xf32>
    %188 = vector.extract_strided_slice %173 {offsets = [2, 0, 0], sizes = [9, 9, 128], strides = [1, 1, 1]} : vector<16x9x128xf32> to vector<9x9x128xf32>
    %189 = vector.extract_strided_slice %0 {offsets = [19, 0], sizes = [1, 128], strides = [1, 1]} : vector<64x128xf32> to vector<1x128xf32>
    %190 = vector.shape_cast %189 : vector<1x128xf32> to vector<128xf32>
    %191 = vector.shape_cast %190 : vector<128xf32> to vector<1x1x128xf32>
    %192 = vector.broadcast %191 : vector<1x1x128xf32> to vector<9x9x128xf32>
    %193 = arith.mulf %188, %192 : vector<9x9x128xf32>
    %194 = arith.addf %187, %193 : vector<9x9x128xf32>
    %195 = vector.extract_strided_slice %173 {offsets = [3, 0, 0], sizes = [9, 9, 128], strides = [1, 1, 1]} : vector<16x9x128xf32> to vector<9x9x128xf32>
    %196 = vector.extract_strided_slice %0 {offsets = [27, 0], sizes = [1, 128], strides = [1, 1]} : vector<64x128xf32> to vector<1x128xf32>
    %197 = vector.shape_cast %196 : vector<1x128xf32> to vector<128xf32>
    %198 = vector.shape_cast %197 : vector<128xf32> to vector<1x1x128xf32>
    %199 = vector.broadcast %198 : vector<1x1x128xf32> to vector<9x9x128xf32>
    %200 = arith.mulf %195, %199 : vector<9x9x128xf32>
    %201 = arith.addf %194, %200 : vector<9x9x128xf32>
    %202 = vector.extract_strided_slice %173 {offsets = [4, 0, 0], sizes = [9, 9, 128], strides = [1, 1, 1]} : vector<16x9x128xf32> to vector<9x9x128xf32>
    %203 = vector.extract_strided_slice %0 {offsets = [35, 0], sizes = [1, 128], strides = [1, 1]} : vector<64x128xf32> to vector<1x128xf32>
    %204 = vector.shape_cast %203 : vector<1x128xf32> to vector<128xf32>
    %205 = vector.shape_cast %204 : vector<128xf32> to vector<1x1x128xf32>
    %206 = vector.broadcast %205 : vector<1x1x128xf32> to vector<9x9x128xf32>
    %207 = arith.mulf %202, %206 : vector<9x9x128xf32>
    %208 = arith.addf %201, %207 : vector<9x9x128xf32>
    %209 = vector.extract_strided_slice %173 {offsets = [5, 0, 0], sizes = [9, 9, 128], strides = [1, 1, 1]} : vector<16x9x128xf32> to vector<9x9x128xf32>
    %210 = vector.extract_strided_slice %0 {offsets = [43, 0], sizes = [1, 128], strides = [1, 1]} : vector<64x128xf32> to vector<1x128xf32>
    %211 = vector.shape_cast %210 : vector<1x128xf32> to vector<128xf32>
    %212 = vector.shape_cast %211 : vector<128xf32> to vector<1x1x128xf32>
    %213 = vector.broadcast %212 : vector<1x1x128xf32> to vector<9x9x128xf32>
    %214 = arith.mulf %209, %213 : vector<9x9x128xf32>
    %215 = arith.addf %208, %214 : vector<9x9x128xf32>
    %216 = vector.extract_strided_slice %173 {offsets = [6, 0, 0], sizes = [9, 9, 128], strides = [1, 1, 1]} : vector<16x9x128xf32> to vector<9x9x128xf32>
    %217 = vector.extract_strided_slice %0 {offsets = [51, 0], sizes = [1, 128], strides = [1, 1]} : vector<64x128xf32> to vector<1x128xf32>
    %218 = vector.shape_cast %217 : vector<1x128xf32> to vector<128xf32>
    %219 = vector.shape_cast %218 : vector<128xf32> to vector<1x1x128xf32>
    %220 = vector.broadcast %219 : vector<1x1x128xf32> to vector<9x9x128xf32>
    %221 = arith.mulf %216, %220 : vector<9x9x128xf32>
    %222 = arith.addf %215, %221 : vector<9x9x128xf32>
    %223 = vector.extract_strided_slice %173 {offsets = [7, 0, 0], sizes = [9, 9, 128], strides = [1, 1, 1]} : vector<16x9x128xf32> to vector<9x9x128xf32>
    %224 = vector.extract_strided_slice %0 {offsets = [59, 0], sizes = [1, 128], strides = [1, 1]} : vector<64x128xf32> to vector<1x128xf32>
    %225 = vector.shape_cast %224 : vector<1x128xf32> to vector<128xf32>
    %226 = vector.shape_cast %225 : vector<128xf32> to vector<1x1x128xf32>
    %227 = vector.broadcast %226 : vector<1x1x128xf32> to vector<9x9x128xf32>
    %228 = arith.mulf %223, %227 : vector<9x9x128xf32>
    %229 = arith.addf %222, %228 : vector<9x9x128xf32>
    %c0_10 = arith.constant 0 : index
    %c4 = arith.constant 4 : index
    %c0_11 = arith.constant 0 : index
    %230 = vector.load %arg1[%c0_10, %c4, %c0_11] : memref<16x16x128xf32, #tpu.memory_space<vmem>>, vector<16x9x128xf32>
    %231 = vector.extract_strided_slice %230 {offsets = [0, 0, 0], sizes = [9, 9, 128], strides = [1, 1, 1]} : vector<16x9x128xf32> to vector<9x9x128xf32>
    %232 = vector.extract_strided_slice %0 {offsets = [4, 0], sizes = [1, 128], strides = [1, 1]} : vector<64x128xf32> to vector<1x128xf32>
    %233 = vector.shape_cast %232 : vector<1x128xf32> to vector<128xf32>
    %234 = vector.shape_cast %233 : vector<128xf32> to vector<1x1x128xf32>
    %235 = vector.broadcast %234 : vector<1x1x128xf32> to vector<9x9x128xf32>
    %236 = arith.mulf %231, %235 : vector<9x9x128xf32>
    %237 = arith.addf %229, %236 : vector<9x9x128xf32>
    %238 = vector.extract_strided_slice %230 {offsets = [1, 0, 0], sizes = [9, 9, 128], strides = [1, 1, 1]} : vector<16x9x128xf32> to vector<9x9x128xf32>
    %239 = vector.extract_strided_slice %0 {offsets = [12, 0], sizes = [1, 128], strides = [1, 1]} : vector<64x128xf32> to vector<1x128xf32>
    %240 = vector.shape_cast %239 : vector<1x128xf32> to vector<128xf32>
    %241 = vector.shape_cast %240 : vector<128xf32> to vector<1x1x128xf32>
    %242 = vector.broadcast %241 : vector<1x1x128xf32> to vector<9x9x128xf32>
    %243 = arith.mulf %238, %242 : vector<9x9x128xf32>
    %244 = arith.addf %237, %243 : vector<9x9x128xf32>
    %245 = vector.extract_strided_slice %230 {offsets = [2, 0, 0], sizes = [9, 9, 128], strides = [1, 1, 1]} : vector<16x9x128xf32> to vector<9x9x128xf32>
    %246 = vector.extract_strided_slice %0 {offsets = [20, 0], sizes = [1, 128], strides = [1, 1]} : vector<64x128xf32> to vector<1x128xf32>
    %247 = vector.shape_cast %246 : vector<1x128xf32> to vector<128xf32>
    %248 = vector.shape_cast %247 : vector<128xf32> to vector<1x1x128xf32>
    %249 = vector.broadcast %248 : vector<1x1x128xf32> to vector<9x9x128xf32>
    %250 = arith.mulf %245, %249 : vector<9x9x128xf32>
    %251 = arith.addf %244, %250 : vector<9x9x128xf32>
    %252 = vector.extract_strided_slice %230 {offsets = [3, 0, 0], sizes = [9, 9, 128], strides = [1, 1, 1]} : vector<16x9x128xf32> to vector<9x9x128xf32>
    %253 = vector.extract_strided_slice %0 {offsets = [28, 0], sizes = [1, 128], strides = [1, 1]} : vector<64x128xf32> to vector<1x128xf32>
    %254 = vector.shape_cast %253 : vector<1x128xf32> to vector<128xf32>
    %255 = vector.shape_cast %254 : vector<128xf32> to vector<1x1x128xf32>
    %256 = vector.broadcast %255 : vector<1x1x128xf32> to vector<9x9x128xf32>
    %257 = arith.mulf %252, %256 : vector<9x9x128xf32>
    %258 = arith.addf %251, %257 : vector<9x9x128xf32>
    %259 = vector.extract_strided_slice %230 {offsets = [4, 0, 0], sizes = [9, 9, 128], strides = [1, 1, 1]} : vector<16x9x128xf32> to vector<9x9x128xf32>
    %260 = vector.extract_strided_slice %0 {offsets = [36, 0], sizes = [1, 128], strides = [1, 1]} : vector<64x128xf32> to vector<1x128xf32>
    %261 = vector.shape_cast %260 : vector<1x128xf32> to vector<128xf32>
    %262 = vector.shape_cast %261 : vector<128xf32> to vector<1x1x128xf32>
    %263 = vector.broadcast %262 : vector<1x1x128xf32> to vector<9x9x128xf32>
    %264 = arith.mulf %259, %263 : vector<9x9x128xf32>
    %265 = arith.addf %258, %264 : vector<9x9x128xf32>
    %266 = vector.extract_strided_slice %230 {offsets = [5, 0, 0], sizes = [9, 9, 128], strides = [1, 1, 1]} : vector<16x9x128xf32> to vector<9x9x128xf32>
    %267 = vector.extract_strided_slice %0 {offsets = [44, 0], sizes = [1, 128], strides = [1, 1]} : vector<64x128xf32> to vector<1x128xf32>
    %268 = vector.shape_cast %267 : vector<1x128xf32> to vector<128xf32>
    %269 = vector.shape_cast %268 : vector<128xf32> to vector<1x1x128xf32>
    %270 = vector.broadcast %269 : vector<1x1x128xf32> to vector<9x9x128xf32>
    %271 = arith.mulf %266, %270 : vector<9x9x128xf32>
    %272 = arith.addf %265, %271 : vector<9x9x128xf32>
    %273 = vector.extract_strided_slice %230 {offsets = [6, 0, 0], sizes = [9, 9, 128], strides = [1, 1, 1]} : vector<16x9x128xf32> to vector<9x9x128xf32>
    %274 = vector.extract_strided_slice %0 {offsets = [52, 0], sizes = [1, 128], strides = [1, 1]} : vector<64x128xf32> to vector<1x128xf32>
    %275 = vector.shape_cast %274 : vector<1x128xf32> to vector<128xf32>
    %276 = vector.shape_cast %275 : vector<128xf32> to vector<1x1x128xf32>
    %277 = vector.broadcast %276 : vector<1x1x128xf32> to vector<9x9x128xf32>
    %278 = arith.mulf %273, %277 : vector<9x9x128xf32>
    %279 = arith.addf %272, %278 : vector<9x9x128xf32>
    %280 = vector.extract_strided_slice %230 {offsets = [7, 0, 0], sizes = [9, 9, 128], strides = [1, 1, 1]} : vector<16x9x128xf32> to vector<9x9x128xf32>
    %281 = vector.extract_strided_slice %0 {offsets = [60, 0], sizes = [1, 128], strides = [1, 1]} : vector<64x128xf32> to vector<1x128xf32>
    %282 = vector.shape_cast %281 : vector<1x128xf32> to vector<128xf32>
    %283 = vector.shape_cast %282 : vector<128xf32> to vector<1x1x128xf32>
    %284 = vector.broadcast %283 : vector<1x1x128xf32> to vector<9x9x128xf32>
    %285 = arith.mulf %280, %284 : vector<9x9x128xf32>
    %286 = arith.addf %279, %285 : vector<9x9x128xf32>
    %c0_12 = arith.constant 0 : index
    %c5 = arith.constant 5 : index
    %c0_13 = arith.constant 0 : index
    %287 = vector.load %arg1[%c0_12, %c5, %c0_13] : memref<16x16x128xf32, #tpu.memory_space<vmem>>, vector<16x9x128xf32>
    %288 = vector.extract_strided_slice %287 {offsets = [0, 0, 0], sizes = [9, 9, 128], strides = [1, 1, 1]} : vector<16x9x128xf32> to vector<9x9x128xf32>
    %289 = vector.extract_strided_slice %0 {offsets = [5, 0], sizes = [1, 128], strides = [1, 1]} : vector<64x128xf32> to vector<1x128xf32>
    %290 = vector.shape_cast %289 : vector<1x128xf32> to vector<128xf32>
    %291 = vector.shape_cast %290 : vector<128xf32> to vector<1x1x128xf32>
    %292 = vector.broadcast %291 : vector<1x1x128xf32> to vector<9x9x128xf32>
    %293 = arith.mulf %288, %292 : vector<9x9x128xf32>
    %294 = arith.addf %286, %293 : vector<9x9x128xf32>
    %295 = vector.extract_strided_slice %287 {offsets = [1, 0, 0], sizes = [9, 9, 128], strides = [1, 1, 1]} : vector<16x9x128xf32> to vector<9x9x128xf32>
    %296 = vector.extract_strided_slice %0 {offsets = [13, 0], sizes = [1, 128], strides = [1, 1]} : vector<64x128xf32> to vector<1x128xf32>
    %297 = vector.shape_cast %296 : vector<1x128xf32> to vector<128xf32>
    %298 = vector.shape_cast %297 : vector<128xf32> to vector<1x1x128xf32>
    %299 = vector.broadcast %298 : vector<1x1x128xf32> to vector<9x9x128xf32>
    %300 = arith.mulf %295, %299 : vector<9x9x128xf32>
    %301 = arith.addf %294, %300 : vector<9x9x128xf32>
    %302 = vector.extract_strided_slice %287 {offsets = [2, 0, 0], sizes = [9, 9, 128], strides = [1, 1, 1]} : vector<16x9x128xf32> to vector<9x9x128xf32>
    %303 = vector.extract_strided_slice %0 {offsets = [21, 0], sizes = [1, 128], strides = [1, 1]} : vector<64x128xf32> to vector<1x128xf32>
    %304 = vector.shape_cast %303 : vector<1x128xf32> to vector<128xf32>
    %305 = vector.shape_cast %304 : vector<128xf32> to vector<1x1x128xf32>
    %306 = vector.broadcast %305 : vector<1x1x128xf32> to vector<9x9x128xf32>
    %307 = arith.mulf %302, %306 : vector<9x9x128xf32>
    %308 = arith.addf %301, %307 : vector<9x9x128xf32>
    %309 = vector.extract_strided_slice %287 {offsets = [3, 0, 0], sizes = [9, 9, 128], strides = [1, 1, 1]} : vector<16x9x128xf32> to vector<9x9x128xf32>
    %310 = vector.extract_strided_slice %0 {offsets = [29, 0], sizes = [1, 128], strides = [1, 1]} : vector<64x128xf32> to vector<1x128xf32>
    %311 = vector.shape_cast %310 : vector<1x128xf32> to vector<128xf32>
    %312 = vector.shape_cast %311 : vector<128xf32> to vector<1x1x128xf32>
    %313 = vector.broadcast %312 : vector<1x1x128xf32> to vector<9x9x128xf32>
    %314 = arith.mulf %309, %313 : vector<9x9x128xf32>
    %315 = arith.addf %308, %314 : vector<9x9x128xf32>
    %316 = vector.extract_strided_slice %287 {offsets = [4, 0, 0], sizes = [9, 9, 128], strides = [1, 1, 1]} : vector<16x9x128xf32> to vector<9x9x128xf32>
    %317 = vector.extract_strided_slice %0 {offsets = [37, 0], sizes = [1, 128], strides = [1, 1]} : vector<64x128xf32> to vector<1x128xf32>
    %318 = vector.shape_cast %317 : vector<1x128xf32> to vector<128xf32>
    %319 = vector.shape_cast %318 : vector<128xf32> to vector<1x1x128xf32>
    %320 = vector.broadcast %319 : vector<1x1x128xf32> to vector<9x9x128xf32>
    %321 = arith.mulf %316, %320 : vector<9x9x128xf32>
    %322 = arith.addf %315, %321 : vector<9x9x128xf32>
    %323 = vector.extract_strided_slice %287 {offsets = [5, 0, 0], sizes = [9, 9, 128], strides = [1, 1, 1]} : vector<16x9x128xf32> to vector<9x9x128xf32>
    %324 = vector.extract_strided_slice %0 {offsets = [45, 0], sizes = [1, 128], strides = [1, 1]} : vector<64x128xf32> to vector<1x128xf32>
    %325 = vector.shape_cast %324 : vector<1x128xf32> to vector<128xf32>
    %326 = vector.shape_cast %325 : vector<128xf32> to vector<1x1x128xf32>
    %327 = vector.broadcast %326 : vector<1x1x128xf32> to vector<9x9x128xf32>
    %328 = arith.mulf %323, %327 : vector<9x9x128xf32>
    %329 = arith.addf %322, %328 : vector<9x9x128xf32>
    %330 = vector.extract_strided_slice %287 {offsets = [6, 0, 0], sizes = [9, 9, 128], strides = [1, 1, 1]} : vector<16x9x128xf32> to vector<9x9x128xf32>
    %331 = vector.extract_strided_slice %0 {offsets = [53, 0], sizes = [1, 128], strides = [1, 1]} : vector<64x128xf32> to vector<1x128xf32>
    %332 = vector.shape_cast %331 : vector<1x128xf32> to vector<128xf32>
    %333 = vector.shape_cast %332 : vector<128xf32> to vector<1x1x128xf32>
    %334 = vector.broadcast %333 : vector<1x1x128xf32> to vector<9x9x128xf32>
    %335 = arith.mulf %330, %334 : vector<9x9x128xf32>
    %336 = arith.addf %329, %335 : vector<9x9x128xf32>
    %337 = vector.extract_strided_slice %287 {offsets = [7, 0, 0], sizes = [9, 9, 128], strides = [1, 1, 1]} : vector<16x9x128xf32> to vector<9x9x128xf32>
    %338 = vector.extract_strided_slice %0 {offsets = [61, 0], sizes = [1, 128], strides = [1, 1]} : vector<64x128xf32> to vector<1x128xf32>
    %339 = vector.shape_cast %338 : vector<1x128xf32> to vector<128xf32>
    %340 = vector.shape_cast %339 : vector<128xf32> to vector<1x1x128xf32>
    %341 = vector.broadcast %340 : vector<1x1x128xf32> to vector<9x9x128xf32>
    %342 = arith.mulf %337, %341 : vector<9x9x128xf32>
    %343 = arith.addf %336, %342 : vector<9x9x128xf32>
    %c0_14 = arith.constant 0 : index
    %c6 = arith.constant 6 : index
    %c0_15 = arith.constant 0 : index
    %344 = vector.load %arg1[%c0_14, %c6, %c0_15] : memref<16x16x128xf32, #tpu.memory_space<vmem>>, vector<16x9x128xf32>
    %345 = vector.extract_strided_slice %344 {offsets = [0, 0, 0], sizes = [9, 9, 128], strides = [1, 1, 1]} : vector<16x9x128xf32> to vector<9x9x128xf32>
    %346 = vector.extract_strided_slice %0 {offsets = [6, 0], sizes = [1, 128], strides = [1, 1]} : vector<64x128xf32> to vector<1x128xf32>
    %347 = vector.shape_cast %346 : vector<1x128xf32> to vector<128xf32>
    %348 = vector.shape_cast %347 : vector<128xf32> to vector<1x1x128xf32>
    %349 = vector.broadcast %348 : vector<1x1x128xf32> to vector<9x9x128xf32>
    %350 = arith.mulf %345, %349 : vector<9x9x128xf32>
    %351 = arith.addf %343, %350 : vector<9x9x128xf32>
    %352 = vector.extract_strided_slice %344 {offsets = [1, 0, 0], sizes = [9, 9, 128], strides = [1, 1, 1]} : vector<16x9x128xf32> to vector<9x9x128xf32>
    %353 = vector.extract_strided_slice %0 {offsets = [14, 0], sizes = [1, 128], strides = [1, 1]} : vector<64x128xf32> to vector<1x128xf32>
    %354 = vector.shape_cast %353 : vector<1x128xf32> to vector<128xf32>
    %355 = vector.shape_cast %354 : vector<128xf32> to vector<1x1x128xf32>
    %356 = vector.broadcast %355 : vector<1x1x128xf32> to vector<9x9x128xf32>
    %357 = arith.mulf %352, %356 : vector<9x9x128xf32>
    %358 = arith.addf %351, %357 : vector<9x9x128xf32>
    %359 = vector.extract_strided_slice %344 {offsets = [2, 0, 0], sizes = [9, 9, 128], strides = [1, 1, 1]} : vector<16x9x128xf32> to vector<9x9x128xf32>
    %360 = vector.extract_strided_slice %0 {offsets = [22, 0], sizes = [1, 128], strides = [1, 1]} : vector<64x128xf32> to vector<1x128xf32>
    %361 = vector.shape_cast %360 : vector<1x128xf32> to vector<128xf32>
    %362 = vector.shape_cast %361 : vector<128xf32> to vector<1x1x128xf32>
    %363 = vector.broadcast %362 : vector<1x1x128xf32> to vector<9x9x128xf32>
    %364 = arith.mulf %359, %363 : vector<9x9x128xf32>
    %365 = arith.addf %358, %364 : vector<9x9x128xf32>
    %366 = vector.extract_strided_slice %344 {offsets = [3, 0, 0], sizes = [9, 9, 128], strides = [1, 1, 1]} : vector<16x9x128xf32> to vector<9x9x128xf32>
    %367 = vector.extract_strided_slice %0 {offsets = [30, 0], sizes = [1, 128], strides = [1, 1]} : vector<64x128xf32> to vector<1x128xf32>
    %368 = vector.shape_cast %367 : vector<1x128xf32> to vector<128xf32>
    %369 = vector.shape_cast %368 : vector<128xf32> to vector<1x1x128xf32>
    %370 = vector.broadcast %369 : vector<1x1x128xf32> to vector<9x9x128xf32>
    %371 = arith.mulf %366, %370 : vector<9x9x128xf32>
    %372 = arith.addf %365, %371 : vector<9x9x128xf32>
    %373 = vector.extract_strided_slice %344 {offsets = [4, 0, 0], sizes = [9, 9, 128], strides = [1, 1, 1]} : vector<16x9x128xf32> to vector<9x9x128xf32>
    %374 = vector.extract_strided_slice %0 {offsets = [38, 0], sizes = [1, 128], strides = [1, 1]} : vector<64x128xf32> to vector<1x128xf32>
    %375 = vector.shape_cast %374 : vector<1x128xf32> to vector<128xf32>
    %376 = vector.shape_cast %375 : vector<128xf32> to vector<1x1x128xf32>
    %377 = vector.broadcast %376 : vector<1x1x128xf32> to vector<9x9x128xf32>
    %378 = arith.mulf %373, %377 : vector<9x9x128xf32>
    %379 = arith.addf %372, %378 : vector<9x9x128xf32>
    %380 = vector.extract_strided_slice %344 {offsets = [5, 0, 0], sizes = [9, 9, 128], strides = [1, 1, 1]} : vector<16x9x128xf32> to vector<9x9x128xf32>
    %381 = vector.extract_strided_slice %0 {offsets = [46, 0], sizes = [1, 128], strides = [1, 1]} : vector<64x128xf32> to vector<1x128xf32>
    %382 = vector.shape_cast %381 : vector<1x128xf32> to vector<128xf32>
    %383 = vector.shape_cast %382 : vector<128xf32> to vector<1x1x128xf32>
    %384 = vector.broadcast %383 : vector<1x1x128xf32> to vector<9x9x128xf32>
    %385 = arith.mulf %380, %384 : vector<9x9x128xf32>
    %386 = arith.addf %379, %385 : vector<9x9x128xf32>
    %387 = vector.extract_strided_slice %344 {offsets = [6, 0, 0], sizes = [9, 9, 128], strides = [1, 1, 1]} : vector<16x9x128xf32> to vector<9x9x128xf32>
    %388 = vector.extract_strided_slice %0 {offsets = [54, 0], sizes = [1, 128], strides = [1, 1]} : vector<64x128xf32> to vector<1x128xf32>
    %389 = vector.shape_cast %388 : vector<1x128xf32> to vector<128xf32>
    %390 = vector.shape_cast %389 : vector<128xf32> to vector<1x1x128xf32>
    %391 = vector.broadcast %390 : vector<1x1x128xf32> to vector<9x9x128xf32>
    %392 = arith.mulf %387, %391 : vector<9x9x128xf32>
    %393 = arith.addf %386, %392 : vector<9x9x128xf32>
    %394 = vector.extract_strided_slice %344 {offsets = [7, 0, 0], sizes = [9, 9, 128], strides = [1, 1, 1]} : vector<16x9x128xf32> to vector<9x9x128xf32>
    %395 = vector.extract_strided_slice %0 {offsets = [62, 0], sizes = [1, 128], strides = [1, 1]} : vector<64x128xf32> to vector<1x128xf32>
    %396 = vector.shape_cast %395 : vector<1x128xf32> to vector<128xf32>
    %397 = vector.shape_cast %396 : vector<128xf32> to vector<1x1x128xf32>
    %398 = vector.broadcast %397 : vector<1x1x128xf32> to vector<9x9x128xf32>
    %399 = arith.mulf %394, %398 : vector<9x9x128xf32>
    %400 = arith.addf %393, %399 : vector<9x9x128xf32>
    %c0_16 = arith.constant 0 : index
    %c7 = arith.constant 7 : index
    %c0_17 = arith.constant 0 : index
    %401 = vector.load %arg1[%c0_16, %c7, %c0_17] : memref<16x16x128xf32, #tpu.memory_space<vmem>>, vector<16x9x128xf32>
    %402 = vector.extract_strided_slice %401 {offsets = [0, 0, 0], sizes = [9, 9, 128], strides = [1, 1, 1]} : vector<16x9x128xf32> to vector<9x9x128xf32>
    %403 = vector.extract_strided_slice %0 {offsets = [7, 0], sizes = [1, 128], strides = [1, 1]} : vector<64x128xf32> to vector<1x128xf32>
    %404 = vector.shape_cast %403 : vector<1x128xf32> to vector<128xf32>
    %405 = vector.shape_cast %404 : vector<128xf32> to vector<1x1x128xf32>
    %406 = vector.broadcast %405 : vector<1x1x128xf32> to vector<9x9x128xf32>
    %407 = arith.mulf %402, %406 : vector<9x9x128xf32>
    %408 = arith.addf %400, %407 : vector<9x9x128xf32>
    %409 = vector.extract_strided_slice %401 {offsets = [1, 0, 0], sizes = [9, 9, 128], strides = [1, 1, 1]} : vector<16x9x128xf32> to vector<9x9x128xf32>
    %410 = vector.extract_strided_slice %0 {offsets = [15, 0], sizes = [1, 128], strides = [1, 1]} : vector<64x128xf32> to vector<1x128xf32>
    %411 = vector.shape_cast %410 : vector<1x128xf32> to vector<128xf32>
    %412 = vector.shape_cast %411 : vector<128xf32> to vector<1x1x128xf32>
    %413 = vector.broadcast %412 : vector<1x1x128xf32> to vector<9x9x128xf32>
    %414 = arith.mulf %409, %413 : vector<9x9x128xf32>
    %415 = arith.addf %408, %414 : vector<9x9x128xf32>
    %416 = vector.extract_strided_slice %401 {offsets = [2, 0, 0], sizes = [9, 9, 128], strides = [1, 1, 1]} : vector<16x9x128xf32> to vector<9x9x128xf32>
    %417 = vector.extract_strided_slice %0 {offsets = [23, 0], sizes = [1, 128], strides = [1, 1]} : vector<64x128xf32> to vector<1x128xf32>
    %418 = vector.shape_cast %417 : vector<1x128xf32> to vector<128xf32>
    %419 = vector.shape_cast %418 : vector<128xf32> to vector<1x1x128xf32>
    %420 = vector.broadcast %419 : vector<1x1x128xf32> to vector<9x9x128xf32>
    %421 = arith.mulf %416, %420 : vector<9x9x128xf32>
    %422 = arith.addf %415, %421 : vector<9x9x128xf32>
    %423 = vector.extract_strided_slice %401 {offsets = [3, 0, 0], sizes = [9, 9, 128], strides = [1, 1, 1]} : vector<16x9x128xf32> to vector<9x9x128xf32>
    %424 = vector.extract_strided_slice %0 {offsets = [31, 0], sizes = [1, 128], strides = [1, 1]} : vector<64x128xf32> to vector<1x128xf32>
    %425 = vector.shape_cast %424 : vector<1x128xf32> to vector<128xf32>
    %426 = vector.shape_cast %425 : vector<128xf32> to vector<1x1x128xf32>
    %427 = vector.broadcast %426 : vector<1x1x128xf32> to vector<9x9x128xf32>
    %428 = arith.mulf %423, %427 : vector<9x9x128xf32>
    %429 = arith.addf %422, %428 : vector<9x9x128xf32>
    %430 = vector.extract_strided_slice %401 {offsets = [4, 0, 0], sizes = [9, 9, 128], strides = [1, 1, 1]} : vector<16x9x128xf32> to vector<9x9x128xf32>
    %431 = vector.extract_strided_slice %0 {offsets = [39, 0], sizes = [1, 128], strides = [1, 1]} : vector<64x128xf32> to vector<1x128xf32>
    %432 = vector.shape_cast %431 : vector<1x128xf32> to vector<128xf32>
    %433 = vector.shape_cast %432 : vector<128xf32> to vector<1x1x128xf32>
    %434 = vector.broadcast %433 : vector<1x1x128xf32> to vector<9x9x128xf32>
    %435 = arith.mulf %430, %434 : vector<9x9x128xf32>
    %436 = arith.addf %429, %435 : vector<9x9x128xf32>
    %437 = vector.extract_strided_slice %401 {offsets = [5, 0, 0], sizes = [9, 9, 128], strides = [1, 1, 1]} : vector<16x9x128xf32> to vector<9x9x128xf32>
    %438 = vector.extract_strided_slice %0 {offsets = [47, 0], sizes = [1, 128], strides = [1, 1]} : vector<64x128xf32> to vector<1x128xf32>
    %439 = vector.shape_cast %438 : vector<1x128xf32> to vector<128xf32>
    %440 = vector.shape_cast %439 : vector<128xf32> to vector<1x1x128xf32>
    %441 = vector.broadcast %440 : vector<1x1x128xf32> to vector<9x9x128xf32>
    %442 = arith.mulf %437, %441 : vector<9x9x128xf32>
    %443 = arith.addf %436, %442 : vector<9x9x128xf32>
    %444 = vector.extract_strided_slice %401 {offsets = [6, 0, 0], sizes = [9, 9, 128], strides = [1, 1, 1]} : vector<16x9x128xf32> to vector<9x9x128xf32>
    %445 = vector.extract_strided_slice %0 {offsets = [55, 0], sizes = [1, 128], strides = [1, 1]} : vector<64x128xf32> to vector<1x128xf32>
    %446 = vector.shape_cast %445 : vector<1x128xf32> to vector<128xf32>
    %447 = vector.shape_cast %446 : vector<128xf32> to vector<1x1x128xf32>
    %448 = vector.broadcast %447 : vector<1x1x128xf32> to vector<9x9x128xf32>
    %449 = arith.mulf %444, %448 : vector<9x9x128xf32>
    %450 = arith.addf %443, %449 : vector<9x9x128xf32>
    %451 = vector.extract_strided_slice %401 {offsets = [7, 0, 0], sizes = [9, 9, 128], strides = [1, 1, 1]} : vector<16x9x128xf32> to vector<9x9x128xf32>
    %452 = vector.extract_strided_slice %0 {offsets = [63, 0], sizes = [1, 128], strides = [1, 1]} : vector<64x128xf32> to vector<1x128xf32>
    %453 = vector.shape_cast %452 : vector<1x128xf32> to vector<128xf32>
    %454 = vector.shape_cast %453 : vector<128xf32> to vector<1x1x128xf32>
    %455 = vector.broadcast %454 : vector<1x1x128xf32> to vector<9x9x128xf32>
    %456 = arith.mulf %451, %455 : vector<9x9x128xf32>
    %457 = arith.addf %450, %456 : vector<9x9x128xf32>
    %c0_18 = arith.constant 0 : index
    %c0_19 = arith.constant 0 : index
    %c0_20 = arith.constant 0 : index
    %458 = vector.load %arg3[%c0_18, %c0_19, %c0_20] : memref<9x9x128xf32, #tpu.memory_space<vmem>>, vector<9x9x128xf32>
    tpu.vector_store %arg3[%c0_18, %c0_19, %c0_20], %457 {strides = array<i32>} : memref<9x9x128xf32, #tpu.memory_space<vmem>>, vector<9x9x128xf32>,
    return
  }
  func.func @transform_0(%arg0: i32) -> (i32, i32, i32) {
    %c0_i32 = arith.constant 0 : i32
    %c0_i32_0 = arith.constant 0 : i32
    %c0_i32_1 = arith.constant 0 : i32
    return %c0_i32, %c0_i32_0, %arg0 : i32, i32, i32
  }
  func.func @transform_1(%arg0: i32) -> (i32, i32) {
    %c0_i32 = arith.constant 0 : i32
    %c0_i32_0 = arith.constant 0 : i32
    return %c0_i32, %arg0 : i32, i32
  }
  func.func @transform_2(%arg0: i32) -> (i32, i32, i32) {
    %c0_i32 = arith.constant 0 : i32
    %c0_i32_0 = arith.constant 0 : i32
    %c0_i32_1 = arith.constant 0 : i32
    return %c0_i32, %c0_i32_0, %arg0 : i32, i32, i32
  }
}

</mosaic_0001>

<bundles_post_ra>
// kernel: tpu_custom_call.1
= control target key start
LH: loop header
LB: loop body
LE: loop exit
PB: predicated region body
PF: predicated region fallthrough
CT: control target
= control target key end

     0   :  { %7 = vsyncpa [#allocation3], 0  ;;  %s5980_s0 = inlined_call_operand.hbm [shape: f32[16,16,128], index: 0, kind: input, shape index: {}]   ;;  %s5981_s1 = inlined_call_operand.hbm [shape: f32[64,128], index: 1, kind: input, shape index: {}]   ;;  %s5982_s2 = inlined_call_operand.hbm [shape: f32[9,9,128], index: 2, kind: output, shape index: {}]  }
   0x1   :  { %8 = vsyncpa [#allocation6], 0 }
   0x2   :  { %9 = vsyncpa [#allocation4], 0  ;;  %s2995_s9 = smov [#allocation2]  }
   0x3   :  { %s15_s10 = sshll.u32 %s2995_s9, 4  ;;  %s16_s10 = int_to_ptr.vmem [resolvable:$true] %s15_s10 }
   0x4   :  { %s2937_s11 = scalar_lea.vmem %s16_s10, 4096  ;;  %p2942_p1 = scmp.lt.s32.totalorder %s16_s10, %s16_s10 }
   0x5   :  { %p2938_p0 = scmp.ne.s32.totalorder %s16_s10, %s2937_s11  ;;  %p2943_p2 = scmp.lt.s32.totalorder %s2937_s11, %s2937_s11 }
   0x7   :  { %p2944_p3 = por %p2943_p2, %p2942_p1 }
   0x9   :  { %p2945_p4 = pnand %p2944_p3, %p2938_p0 }
   0xb   :  { %2948 = shalt.err (!%p2945_p4)
}
   0xc   :  { %s2996_s12 = smov 128   ;;  %s2997_s13 = smov 8  }
   0xd   :  { %21 = dma.hbm_to_vmem [thread:$0]  %s5980_s0, 4096, %s16_s10, [#allocation3], %s2996_s12, %s2996_s12, %s2997_s13  }
   0xe   :  { %s2998_s16 = smov [#allocation5]  }
   0xf   :  { %s27_s17 = sshll.u32 %s2998_s16, 4  ;;  %s28_s17 = int_to_ptr.vmem [resolvable:$true] %s27_s17 }
  0x10   :  { %s2957_s18 = scalar_lea.vmem %s28_s17, 1024  ;;  %p2962_p6 = scmp.lt.s32.totalorder %s28_s17, %s28_s17 }
  0x11   :  { %p2958_p5 = scmp.ne.s32.totalorder %s28_s17, %s2957_s18  ;;  %p2963_p7 = scmp.lt.s32.totalorder %s2957_s18, %s2957_s18 }
  0x13   :  { %p2964_p8 = por %p2963_p7, %p2962_p6 }
  0x15   :  { %p2965_p9 = pnand %p2964_p8, %p2958_p5 }
  0x17   :  { %2968 = shalt.err (!%p2965_p9)
}
  0x18   :  { %33 = dma.hbm_to_vmem [thread:$0]  %s5981_s1, 1024, %s28_s17, [#allocation6], %s2996_s12, %s2996_s12, %s2997_s13  }
  0x19   :  { %2989 = dma.done.wait [#allocation3], 4096  }
  0x1a   :  { %2990 = vsyncadd [#allocation3], 4294963200 }
  0x1b   :  { %2991 = dma.done.wait [#allocation6], 1024  }
  0x1c   :  { %2992 = vsyncadd [#allocation6], 4294966272  ;;  %v80_v0 = vlaneseq  ;;  %v40_v3 = vld [vmem:[#allocation5] sm:$0xff]  ;;  %v41_v4 = vld [vmem:[#allocation5 + $0x8] sm:$0xff]  ;;  %s2999_s0 = smov [#allocation7]  }
  0x1d   :  { %v42_v6 = vld [vmem:[#allocation5 + $0x10] sm:$0xff]  ;;  %v3033_v7 = vld [vmem:[#allocation5 + $0x18] sm:$0xff]  ;;  %v3035_v8 = vld [vmem:[#allocation5 + $0x20] sm:$0xff]  ;;  %s2887_s1 = sshll.u32 %s2999_s0, 4  ;;  %s2888_s1 = int_to_ptr.vmem [resolvable:$true] %s2887_s1 }
  0x1e   :  { %v3027_v1 = vshrl.u32 %v80_v0, 7  ;;  %6346 = vst [vmem:[#allocation13_spill] sm:$0xff] %v3033_v7  ;;  %6347 = vst [vmem:[#allocation14_spill] sm:$0xff] %v3035_v8  ;;  %v3037_v9 = vld [vmem:[#allocation5 + $0x28] sm:$0xff]  ;;  %v3039_v11 = vld [vmem:[#allocation5 + $0x30] sm:$0xff]  ;;  %s2969_s21 = scalar_lea.vmem %s2888_s1, 2304  ;;  %p2974_p11 = scmp.lt.s32.totalorder %s2888_s1, %s2888_s1 }
  0x1f   :  { %6348 = vst [vmem:[#allocation15_spill] sm:$0xff] %v3037_v9  ;;  %6349 = vst [vmem:[#allocation16_spill] sm:$0xff] %v3039_v11  ;;  %v3041_v12 = vld [vmem:[#allocation5 + $0x38] sm:$0xff]  ;;  %v48_v13 = vld [vmem:[#allocation2] sm:$0xff]  ;;  %p2970_p10 = scmp.ne.s32.totalorder %s2888_s1, %s2969_s21  ;;  %p2975_p12 = scmp.lt.s32.totalorder %s2969_s21, %s2969_s21 }
  0x20   :  { %6344 = vst [vmem:[#allocation11_spill] sm:$0xff] %v3027_v1  ;;  %v82_v2 = vsub.s32 0, %v3027_v1  ;;  %v3031_v5 = vsub.s32 1, %v3027_v1  ;;  %6350 = vst [vmem:[#allocation17_spill] sm:$0xff] %v3041_v12  ;;  %v49_v15 = vld [vmem:[#allocation2 + $0x8] sm:$0x1] }
  0x21   :  { %v50_v16 = vld [vmem:[#allocation2 + $0x10] sm:$0xff]  ;;  %v51_v17 = vld [vmem:[#allocation2 + $0x18] sm:$0x1]  ;;  %v3050_v20 = vld [vmem:[#allocation2 + $0x20] sm:$0xff]  ;;  %p2976_p13 = por %p2975_p12, %p2974_p11 }
  0x22   :  { %6345 = vst [vmem:[#allocation12_spill] sm:$0xff] %v3031_v5  ;;  %v83_v10 = vrot.slane %v40_v3, %v82_v2  ;;  %v3043_v14 = vrot.slane %v41_v4, %v82_v2  ;;  %v3045_v18 = vrot.slane %v42_v6, %v82_v2  ;;  %v3048_v19 = vrot.slane %v40_v3, %v3031_v5  ;;  %v3052_v21 = vld [vmem:[#allocation2 + $0x28] sm:$0x1]  ;;  %v3054_v22 = vld [vmem:[#allocation2 + $0x30] sm:$0xff]  ;;  %v3068_v27 = vld [vmem:[#allocation2 + $0x38] sm:$0x1] }
  0x23   :  { %v3057_v23 = vrot.slane %v3033_v7, %v82_v2  ;;  %v3060_v24 = vrot.slane %v3035_v8, %v82_v2  ;;  %v3063_v25 = vrot.slane %v3037_v9, %v82_v2  ;;  %v3066_v26 = vrot.slane %v41_v4, %v3031_v5  ;;  %v3070_v28 = vld [vmem:[#allocation2 + $0x40] sm:$0xff]  ;;  %v3072_v29 = vld [vmem:[#allocation2 + $0x48] sm:$0x1]  ;;  %v3083_v34 = vld [vmem:[#allocation2 + $0x50] sm:$0xff]  ;;  %p2977_p0 = pnand %p2976_p13, %p2970_p10 }
  0x24   :  { %6351 = vst [vmem:[#allocation18_spill] sm:$0xff] %v3048_v19  ;;  %v84_v30 = vmul.f32 %v83_v10, %v48_v13  ;;  %v3075_v31 = vrot.slane %v3039_v11, %v82_v2  ;;  %v3078_v32 = vrot.slane %v3041_v12, %v82_v2  ;;  %v3081_v33 = vrot.slane %v42_v6, %v3031_v5  ;;  %v3085_v35 = vld [vmem:[#allocation2 + $0x58] sm:$0x1]  ;;  %v3087_v36 = vld [vmem:[#allocation2 + $0x60] sm:$0xff]  ;;  %v3090_v41 = vld [vmem:[#allocation2 + $0x68] sm:$0x1] }
  0x25   :  { %6352 = vst [vmem:[#allocation19_spill] sm:$0xff] %v3057_v23  ;;  %6353 = vst [vmem:[#allocation20_spill] sm:$0xff] %v3060_v24  ;;  %v85_v37 = vmul.f32 %v83_v10, %v49_v15  ;;  %v86_v38 = vmul.f32 %v83_v10, %v50_v16  ;;  %v87_v39 = vmul.f32 %v83_v10, %v51_v17  ;;  %v3092_v42 = vld [vmem:[#allocation2 + $0x70] sm:$0xff]  ;;  %v3094_v43 = vld [vmem:[#allocation2 + $0x78] sm:$0x1] }
  0x26   :  { %6354 = vst [vmem:[#allocation21_spill] sm:$0xff] %v3063_v25  ;;  %6355 = vst [vmem:[#allocation22_spill] sm:$0xff] %v3066_v26  ;;  %v124_v40 = vmul.f32 %v3043_v14, %v50_v16  ;;  %v88_v44 = vmul.f32 %v83_v10, %v3050_v20  ;;  %v89_v45 = vmul.f32 %v83_v10, %v3052_v21  ;;  %v3100_v48 = vld [vmem:[#allocation2 + $0x80] sm:$0xff]  ;;  %v3102_v49 = vld [vmem:[#allocation2 + $0x88] sm:$0x1] }
  0x27   :  { %6356 = vst [vmem:[#allocation23_spill] sm:$0xff] %v3075_v31  ;;  %6357 = vst [vmem:[#allocation24_spill] sm:$0xff] %v3078_v32  ;;  %v90_v46 = vmul.f32 %v83_v10, %v3054_v22  ;;  %v125_v47 = vmul.f32 %v3043_v14, %v51_v17  ;;  %v91_v50 = vmul.f32 %v83_v10, %v3068_v27  ;;  %v3119_v62 = vld [vmem:[#allocation2 + $0x90] sm:$0xff]  ;;  %v3121_v63 = vld [vmem:[#allocation2 + $0x98] sm:$0x1] }
  0x28   :  { %6358 = vst [vmem:[#allocation25_spill] sm:$0xff] %v3081_v33  ;;  %6359 = vst [vmem:[#allocation26_spill] sm:$0xff] %v3085_v35  ;;  %v92_v51 = vmul.f32 %v83_v10, %v3070_v28  ;;  %v93_v52 = vmul.f32 %v83_v10, %v3072_v29  ;;  %v126_v53 = vmul.f32 %v3043_v14, %v3050_v20 }
  0x29   :  { %6360 = vst [vmem:[#allocation27_spill] sm:$0xff] %v3087_v36  ;;  %6361 = vst [vmem:[#allocation28_spill] sm:$0xff] %v3090_v41  ;;  %v94_v54 = vmul.f32 %v83_v10, %v3083_v34  ;;  %v95_v55 = vmul.f32 %v83_v10, %v3085_v35  ;;  %v96_v56 = vmul.f32 %v83_v10, %v3087_v36 }
  0x2a   :  { %6362 = vst [vmem:[#allocation29_spill] sm:$0xff] %v3092_v42  ;;  %6363 = vst [vmem:[#allocation30_spill] sm:$0xff] %v3094_v43  ;;  %v127_v57 = vmul.f32 %v3043_v14, %v3052_v21  ;;  %v97_v58 = vmul.f32 %v83_v10, %v3090_v41  ;;  %v98_v59 = vmul.f32 %v83_v10, %v3092_v42 }
  0x2b   :  { %6364 = vst [vmem:[#allocation31_spill] sm:$0xff] %v3100_v48  ;;  %6365 = vst [vmem:[#allocation32_spill] sm:$0xff] %v3102_v49  ;;  %v99_v60 = vmul.f32 %v83_v10, %v3094_v43  ;;  %v128_v61 = vmul.f32 %v3043_v14, %v3054_v22  ;;  %v100_v0 = vmul.f32 %v83_v10, %v3100_v48 }
  0x2c   :  { %6366 = vst [vmem:[#allocation33_spill] sm:$0xff] %v3119_v62  ;;  %6367 = vst [vmem:[#allocation34_spill] sm:$0xff] %v3121_v63  ;;  %v101_v2 = vmul.f32 %v83_v10, %v3102_v49  ;;  %v129_v3 = vmul.f32 %v3043_v14, %v3068_v27  ;;  %v130_v4 = vmul.f32 %v3043_v14, %v3070_v28 }
  0x2d   :  { %v131_v6 = vmul.f32 %v3043_v14, %v3072_v29  ;;  %v132_v13 = vmul.f32 %v3043_v14, %v3083_v34  ;;  %v133_v15 = vmul.f32 %v3043_v14, %v3085_v35  ;;  %v134_v16 = vmul.f32 %v3043_v14, %v3087_v36 }
  0x2e   :  { %v135_v10 = vmul.f32 %v3043_v14, %v3090_v41  ;;  %v136_v17 = vmul.f32 %v3043_v14, %v3092_v42  ;;  %v137_v1 = vmul.f32 %v3043_v14, %v3094_v43  ;;  %v138_v12 = vmul.f32 %v3043_v14, %v3100_v48 }
  0x2f   :  { %v139_v11 = vmul.f32 %v3043_v14, %v3102_v49  ;;  %v140_v9 = vmul.f32 %v3043_v14, %v3119_v62  ;;  %v141_v8 = vmul.f32 %v3043_v14, %v3121_v63  ;;  %v142_v7 = vadd.f32 %v124_v40, %v84_v30 }
  0x30   :  { %v143_v5 = vadd.f32 %v125_v47, %v85_v37  ;;  %v144_v33 = vadd.f32 %v126_v53, %v86_v38  ;;  %v145_v26 = vadd.f32 %v127_v57, %v87_v39  ;;  %v146_v19 = vadd.f32 %v128_v61, %v88_v44  ;;  %v3157_v38 = vld [vmem:[#allocation2 + $0xa0] sm:$0xff]  ;;  %v3159_v39 = vld [vmem:[#allocation2 + $0xa8] sm:$0x1]  ;;  %v6372_v44 = vld [vmem:[#allocation28_spill] sm:$0xff] }
  0x31   :  { %v147_v32 = vadd.f32 %v129_v3, %v89_v45  ;;  %v148_v31 = vadd.f32 %v130_v4, %v90_v46  ;;  %v149_v25 = vadd.f32 %v131_v6, %v91_v50  ;;  %v150_v24 = vadd.f32 %v132_v13, %v92_v51  ;;  %6368 = vst [vmem:[#allocation35_spill] sm:$0xff] %v3157_v38  ;;  %v6373_v46 = vld [vmem:[#allocation29_spill] sm:$0xff]  ;;  %v6374_v50 = vld [vmem:[#allocation30_spill] sm:$0xff] }
  0x32   :  { %v151_v23 = vadd.f32 %v133_v15, %v93_v52  ;;  %v152_v48 = vadd.f32 %v134_v16, %v94_v54  ;;  %v153_v43 = vadd.f32 %v135_v10, %v95_v55  ;;  %v154_v42 = vadd.f32 %v136_v17, %v96_v56  ;;  %6369 = vst [vmem:[#allocation36_spill] sm:$0xff] %v3159_v39  ;;  %v6375_v52 = vld [vmem:[#allocation31_spill] sm:$0xff]  ;;  %v6376_v54 = vld [vmem:[#allocation32_spill] sm:$0xff] }
  0x33   :  { %v155_v49 = vadd.f32 %v137_v1, %v97_v58  ;;  %v156_v41 = vadd.f32 %v138_v12, %v98_v59  ;;  %v157_v36 = vadd.f32 %v139_v11, %v99_v60  ;;  %v158_v62 = vadd.f32 %v140_v9, %v100_v0  ;;  %v6370_v12 = vld [vmem:[#allocation26_spill] sm:$0xff]  ;;  %v6377_v56 = vld [vmem:[#allocation33_spill] sm:$0xff] }
  0x34   :  { %v159_v35 = vadd.f32 %v141_v8, %v101_v2  ;;  %v164_v14 = vmul.f32 %v3045_v18, %v3050_v20  ;;  %v165_v30 = vmul.f32 %v3045_v18, %v3052_v21  ;;  %v166_v37 = vmul.f32 %v3045_v18, %v3054_v22  ;;  %v6371_v21 = vld [vmem:[#allocation27_spill] sm:$0xff] }
  0x35   :  { %v167_v1 = vmul.f32 %v3045_v18, %v3068_v27  ;;  %v168_v9 = vmul.f32 %v3045_v18, %v3070_v28  ;;  %v169_v8 = vmul.f32 %v3045_v18, %v3072_v29  ;;  %v170_v11 = vmul.f32 %v3045_v18, %v3083_v34 }
  0x36   :  { %v171_v20 = vmul.f32 %v3045_v18, %v6370_v12  ;;  %v172_v40 = vmul.f32 %v3045_v18, %v6371_v21  ;;  %v173_v45 = vmul.f32 %v3045_v18, %v6372_v44  ;;  %v174_v47 = vmul.f32 %v3045_v18, %v6373_v46 }
  0x37   :  { %v175_v51 = vmul.f32 %v3045_v18, %v6374_v50  ;;  %v176_v53 = vmul.f32 %v3045_v18, %v6375_v52  ;;  %v177_v55 = vmul.f32 %v3045_v18, %v6376_v54  ;;  %v178_v57 = vmul.f32 %v3045_v18, %v6377_v56 }
  0x38   :  { %v179_v58 = vmul.f32 %v3045_v18, %v3121_v63  ;;  %v180_v59 = vmul.f32 %v3045_v18, %v3157_v38  ;;  %v181_v60 = vmul.f32 %v3045_v18, %v3159_v39  ;;  %v182_v61 = vadd.f32 %v164_v14, %v142_v7  ;;  %v6378_v18 = vld [vmem:[#allocation19_spill] sm:$0xff]  ;;  %v6386_v14 = vld [vmem:[#allocation34_spill] sm:$0xff] }
  0x39   :  { %v183_v0 = vadd.f32 %v165_v30, %v143_v5  ;;  %v184_v2 = vadd.f32 %v166_v37, %v144_v33  ;;  %v185_v3 = vadd.f32 %v167_v1, %v145_v26  ;;  %v186_v4 = vadd.f32 %v168_v9, %v146_v19  ;;  %v6387_v37 = vld [vmem:[#allocation35_spill] sm:$0xff] }
  0x3a   :  { %v187_v6 = vadd.f32 %v169_v8, %v147_v32  ;;  %v188_v13 = vadd.f32 %v170_v11, %v148_v31  ;;  %v189_v15 = vadd.f32 %v171_v20, %v149_v25  ;;  %v190_v16 = vadd.f32 %v172_v40, %v150_v24  ;;  %v3197_v25 = vld [vmem:[#allocation2 + $0xb0] sm:$0xff]  ;;  %v6381_v32 = vld [vmem:[#allocation29_spill] sm:$0xff] }
  0x3b   :  { %v191_v10 = vadd.f32 %v173_v45, %v151_v23  ;;  %v192_v17 = vadd.f32 %v174_v47, %v152_v48  ;;  %v193_v56 = vadd.f32 %v175_v51, %v153_v43  ;;  %v194_v54 = vadd.f32 %v176_v53, %v154_v42  ;;  %6379 = vst [vmem:[#allocation26_spill] sm:$0xff] %v3197_v25  ;;  %v3199_v23 = vld [vmem:[#allocation2 + $0xb8] sm:$0x1] }
  0x3c   :  { %v195_v63 = vadd.f32 %v177_v55, %v155_v49  ;;  %v196_v52 = vadd.f32 %v178_v57, %v156_v41  ;;  %v197_v50 = vadd.f32 %v179_v58, %v157_v36  ;;  %v198_v38 = vadd.f32 %v180_v59, %v158_v62  ;;  %6380 = vst [vmem:[#allocation27_spill] sm:$0xff] %v3199_v23  ;;  %v6383_v41 = vld [vmem:[#allocation31_spill] sm:$0xff]  ;;  %v6384_v43 = vld [vmem:[#allocation32_spill] sm:$0xff]  ;;  %v6385_v49 = vld [vmem:[#allocation33_spill] sm:$0xff] }
  0x3d   :  { %v199_v46 = vadd.f32 %v181_v60, %v159_v35  ;;  %v204_v7 = vmul.f32 %v6378_v18, %v3054_v22  ;;  %v205_v5 = vmul.f32 %v6378_v18, %v3068_v27  ;;  %v206_v19 = vmul.f32 %v6378_v18, %v3070_v28  ;;  %v6382_v35 = vld [vmem:[#allocation30_spill] sm:$0xff] }
  0x3e   :  { %v207_v24 = vmul.f32 %v6378_v18, %v3072_v29  ;;  %v208_v26 = vmul.f32 %v6378_v18, %v3083_v34  ;;  %v209_v31 = vmul.f32 %v6378_v18, %v6370_v12  ;;  %v210_v22 = vmul.f32 %v6378_v18, %v6371_v21 }
  0x3f   :  { %v211_v27 = vmul.f32 %v6378_v18, %v6372_v44  ;;  %v212_v33 = vmul.f32 %v6378_v18, %v6381_v32  ;;  %v213_v36 = vmul.f32 %v6378_v18, %v6382_v35  ;;  %v214_v42 = vmul.f32 %v6378_v18, %v6383_v41 }
  0x40   :  { %v215_v48 = vmul.f32 %v6378_v18, %v6384_v43  ;;  %v216_v62 = vmul.f32 %v6378_v18, %v6385_v49  ;;  %v217_v30 = vmul.f32 %v6378_v18, %v6386_v14  ;;  %v218_v1 = vmul.f32 %v6378_v18, %v6387_v37 }
  0x41   :  { %v219_v9 = vmul.f32 %v6378_v18, %v3159_v39  ;;  %v220_v8 = vmul.f32 %v6378_v18, %v3197_v25  ;;  %v221_v11 = vmul.f32 %v6378_v18, %v3199_v23  ;;  %v222_v20 = vadd.f32 %v204_v7, %v182_v61  ;;  %v6388_v18 = vld [vmem:[#allocation20_spill] sm:$0xff] }
  0x42   :  { %v223_v40 = vadd.f32 %v205_v5, %v183_v0  ;;  %v224_v45 = vadd.f32 %v206_v19, %v184_v2  ;;  %v225_v47 = vadd.f32 %v207_v24, %v185_v3  ;;  %v226_v51 = vadd.f32 %v208_v26, %v186_v4  ;;  %v3237_v3 = vld [vmem:[#allocation2 + $0xc0] sm:$0xff]  ;;  %v3239_v4 = vld [vmem:[#allocation2 + $0xc8] sm:$0x1]  ;;  %v6396_v7 = vld [vmem:[#allocation36_spill] sm:$0xff] }
  0x43   :  { %v227_v53 = vadd.f32 %v209_v31, %v187_v6  ;;  %v228_v55 = vadd.f32 %v210_v22, %v188_v13  ;;  %v229_v57 = vadd.f32 %v211_v27, %v189_v15  ;;  %v230_v58 = vadd.f32 %v212_v33, %v190_v16  ;;  %6389 = vst [vmem:[#allocation28_spill] sm:$0xff] %v3237_v3  ;;  %v6393_v6 = vld [vmem:[#allocation33_spill] sm:$0xff]  ;;  %v6394_v15 = vld [vmem:[#allocation34_spill] sm:$0xff] }
  0x44   :  { %v231_v59 = vadd.f32 %v213_v36, %v191_v10  ;;  %v232_v60 = vadd.f32 %v214_v42, %v192_v17  ;;  %v233_v37 = vadd.f32 %v215_v48, %v193_v56  ;;  %v234_v14 = vadd.f32 %v216_v62, %v194_v54  ;;  %6390 = vst [vmem:[#allocation19_spill] sm:$0xff] %v3239_v4  ;;  %v6392_v54 = vld [vmem:[#allocation32_spill] sm:$0xff]  ;;  %v6395_v10 = vld [vmem:[#allocation35_spill] sm:$0xff]  ;;  %v6397_v19 = vld [vmem:[#allocation26_spill] sm:$0xff] }
  0x45   :  { %v235_v39 = vadd.f32 %v217_v30, %v195_v63  ;;  %v236_v49 = vadd.f32 %v218_v1, %v196_v52  ;;  %v237_v43 = vadd.f32 %v219_v9, %v197_v50  ;;  %v238_v25 = vadd.f32 %v220_v8, %v198_v38  ;;  %v6391_v50 = vld [vmem:[#allocation31_spill] sm:$0xff] }
  0x46   :  { %v239_v41 = vadd.f32 %v221_v11, %v199_v46  ;;  %v244_v61 = vmul.f32 %v6388_v18, %v3070_v28  ;;  %v245_v0 = vmul.f32 %v6388_v18, %v3072_v29  ;;  %v246_v2 = vmul.f32 %v6388_v18, %v3083_v34 }
  0x47   :  { %v247_v63 = vmul.f32 %v6388_v18, %v6370_v12  ;;  %v248_v38 = vmul.f32 %v6388_v18, %v6371_v21  ;;  %v249_v46 = vmul.f32 %v6388_v18, %v6372_v44  ;;  %v250_v28 = vmul.f32 %v6388_v18, %v6381_v32 }
  0x48   :  { %v251_v29 = vmul.f32 %v6388_v18, %v6382_v35  ;;  %v252_v52 = vmul.f32 %v6388_v18, %v6391_v50  ;;  %v253_v56 = vmul.f32 %v6388_v18, %v6392_v54  ;;  %v254_v13 = vmul.f32 %v6388_v18, %v6393_v6 }
  0x49   :  { %v255_v16 = vmul.f32 %v6388_v18, %v6394_v15  ;;  %v256_v17 = vmul.f32 %v6388_v18, %v6395_v10  ;;  %v257_v5 = vmul.f32 %v6388_v18, %v6396_v7  ;;  %v258_v24 = vmul.f32 %v6388_v18, %v6397_v19 }
  0x4a   :  { %v259_v26 = vmul.f32 %v6388_v18, %v3199_v23  ;;  %v260_v31 = vmul.f32 %v6388_v18, %v3237_v3  ;;  %v261_v22 = vmul.f32 %v6388_v18, %v3239_v4  ;;  %v262_v27 = vadd.f32 %v244_v61, %v222_v20  ;;  %v6398_v18 = vld [vmem:[#allocation21_spill] sm:$0xff]  ;;  %v6406_v61 = vld [vmem:[#allocation27_spill] sm:$0xff] }
  0x4b   :  { %v263_v33 = vadd.f32 %v245_v0, %v223_v40  ;;  %v264_v36 = vadd.f32 %v246_v2, %v224_v45  ;;  %v265_v42 = vadd.f32 %v247_v63, %v225_v47  ;;  %v266_v48 = vadd.f32 %v248_v38, %v226_v51  ;;  %v3277_v47 = vld [vmem:[#allocation2 + $0xd0] sm:$0xff]  ;;  %v3279_v51 = vld [vmem:[#allocation2 + $0xd8] sm:$0x1] }
  0x4c   :  { %v267_v62 = vadd.f32 %v249_v46, %v227_v53  ;;  %v268_v30 = vadd.f32 %v250_v28, %v228_v55  ;;  %v269_v1 = vadd.f32 %v251_v29, %v229_v57  ;;  %v270_v9 = vadd.f32 %v252_v52, %v230_v58  ;;  %6399 = vst [vmem:[#allocation29_spill] sm:$0xff] %v3277_v47  ;;  %v6403_v53 = vld [vmem:[#allocation35_spill] sm:$0xff]  ;;  %v6404_v57 = vld [vmem:[#allocation36_spill] sm:$0xff] }
  0x4d   :  { %v271_v8 = vadd.f32 %v253_v56, %v231_v59  ;;  %v272_v11 = vadd.f32 %v254_v13, %v232_v60  ;;  %v273_v19 = vadd.f32 %v255_v16, %v233_v37  ;;  %v274_v7 = vadd.f32 %v256_v17, %v234_v14  ;;  %6400 = vst [vmem:[#allocation30_spill] sm:$0xff] %v3279_v51  ;;  %v6402_v14 = vld [vmem:[#allocation34_spill] sm:$0xff]  ;;  %v6407_v2 = vld [vmem:[#allocation28_spill] sm:$0xff] }
  0x4e   :  { %v275_v23 = vadd.f32 %v257_v5, %v235_v39  ;;  %v276_v10 = vadd.f32 %v258_v24, %v236_v49  ;;  %v277_v15 = vadd.f32 %v259_v26, %v237_v43  ;;  %v278_v3 = vadd.f32 %v260_v31, %v238_v25  ;;  %v6401_v43 = vld [vmem:[#allocation33_spill] sm:$0xff]  ;;  %v6405_v59 = vld [vmem:[#allocation26_spill] sm:$0xff] }
  0x4f   :  { %v279_v6 = vadd.f32 %v261_v22, %v239_v41  ;;  %v284_v20 = vmul.f32 %v6398_v18, %v3083_v34  ;;  %v285_v40 = vmul.f32 %v6398_v18, %v6370_v12  ;;  %v286_v45 = vmul.f32 %v6398_v18, %v6371_v21 }
  0x50   :  { %v287_v39 = vmul.f32 %v6398_v18, %v6372_v44  ;;  %v288_v25 = vmul.f32 %v6398_v18, %v6381_v32  ;;  %v289_v41 = vmul.f32 %v6398_v18, %v6382_v35  ;;  %v290_v34 = vmul.f32 %v6398_v18, %v6391_v50 }
  0x51   :  { %v291_v12 = vmul.f32 %v6398_v18, %v6392_v54  ;;  %v292_v49 = vmul.f32 %v6398_v18, %v6401_v43  ;;  %v293_v37 = vmul.f32 %v6398_v18, %v6402_v14  ;;  %v294_v55 = vmul.f32 %v6398_v18, %v6403_v53 }
  0x52   :  { %v295_v58 = vmul.f32 %v6398_v18, %v6404_v57  ;;  %v296_v60 = vmul.f32 %v6398_v18, %v6405_v59  ;;  %v297_v0 = vmul.f32 %v6398_v18, %v6406_v61  ;;  %v298_v63 = vmul.f32 %v6398_v18, %v6407_v2 }
  0x53   :  { %v299_v38 = vmul.f32 %v6398_v18, %v3239_v4  ;;  %v300_v46 = vmul.f32 %v6398_v18, %v3277_v47  ;;  %v301_v28 = vmul.f32 %v6398_v18, %v3279_v51  ;;  %v302_v29 = vadd.f32 %v284_v20, %v262_v27  ;;  %v6408_v18 = vld [vmem:[#allocation23_spill] sm:$0xff] }
  0x54   :  { %v303_v52 = vadd.f32 %v285_v40, %v263_v33  ;;  %v304_v56 = vadd.f32 %v286_v45, %v264_v36  ;;  %v305_v13 = vadd.f32 %v287_v39, %v265_v42  ;;  %v306_v16 = vadd.f32 %v288_v25, %v266_v48  ;;  %v76_v42 = vld [vmem:[#allocation2 + $0xe0] sm:$0xff]  ;;  %v77_v48 = vld [vmem:[#allocation2 + $0xe8] sm:$0x1]  ;;  %v6414_v20 = vld [vmem:[#allocation19_spill] sm:$0xff] }
  0x55   :  { %v307_v17 = vadd.f32 %v289_v41, %v267_v62  ;;  %v308_v5 = vadd.f32 %v290_v34, %v268_v30  ;;  %v309_v24 = vadd.f32 %v291_v12, %v269_v1  ;;  %v310_v26 = vadd.f32 %v292_v49, %v270_v9  ;;  %v6411_v62 = vld [vmem:[#allocation26_spill] sm:$0xff]  ;;  %v6412_v1 = vld [vmem:[#allocation27_spill] sm:$0xff]  ;;  %v6415_v45 = vld [vmem:[#allocation29_spill] sm:$0xff] }
  0x56   :  { %v311_v31 = vadd.f32 %v293_v37, %v271_v8  ;;  %v312_v22 = vadd.f32 %v294_v55, %v272_v11  ;;  %v313_v2 = vadd.f32 %v295_v58, %v273_v19  ;;  %v314_v61 = vadd.f32 %v296_v60, %v274_v7  ;;  %v6413_v8 = vld [vmem:[#allocation28_spill] sm:$0xff] }
  0x57   :  { %v315_v4 = vadd.f32 %v297_v0, %v275_v23  ;;  %v316_v59 = vadd.f32 %v298_v63, %v276_v10  ;;  %v317_v57 = vadd.f32 %v299_v38, %v277_v15  ;;  %v318_v47 = vadd.f32 %v300_v46, %v278_v3  ;;  %v6410_v10 = vld [vmem:[#allocation36_spill] sm:$0xff] }
  0x58   :  { %v319_v53 = vadd.f32 %v301_v28, %v279_v6  ;;  %v324_v27 = vmul.f32 %v6408_v18, %v6371_v21  ;;  %v325_v33 = vmul.f32 %v6408_v18, %v6372_v44  ;;  %v326_v36 = vmul.f32 %v6408_v18, %v6381_v32  ;;  %v6409_v6 = vld [vmem:[#allocation35_spill] sm:$0xff] }
  0x59   :  { %v327_v19 = vmul.f32 %v6408_v18, %v6382_v35  ;;  %v328_v23 = vmul.f32 %v6408_v18, %v6391_v50  ;;  %v329_v3 = vmul.f32 %v6408_v18, %v6392_v54  ;;  %v330_v21 = vmul.f32 %v6408_v18, %v6401_v43 }
  0x5a   :  { %v331_v44 = vmul.f32 %v6408_v18, %v6402_v14  ;;  %v332_v15 = vmul.f32 %v6408_v18, %v6409_v6  ;;  %v333_v7 = vmul.f32 %v6408_v18, %v6410_v10  ;;  %v334_v30 = vmul.f32 %v6408_v18, %v6411_v62 }
  0x5b   :  { %v335_v9 = vmul.f32 %v6408_v18, %v6412_v1  ;;  %v336_v11 = vmul.f32 %v6408_v18, %v6413_v8  ;;  %v337_v40 = vmul.f32 %v6408_v18, %v6414_v20  ;;  %v338_v39 = vmul.f32 %v6408_v18, %v6415_v45 }
  0x5c   :  { %v339_v25 = vmul.f32 %v6408_v18, %v3279_v51  ;;  %v340_v41 = vmul.f32 %v6408_v18, %v76_v42  ;;  %v341_v34 = vmul.f32 %v6408_v18, %v77_v48  ;;  %v342_v12 = vadd.f32 %v324_v27, %v302_v29  ;;  %v6416_v18 = vld [vmem:[#allocation24_spill] sm:$0xff] }
  0x5d   :  { %v343_v49 = vadd.f32 %v325_v33, %v303_v52  ;;  %v344_v37 = vadd.f32 %v326_v36, %v304_v56  ;;  %v345_v55 = vadd.f32 %v327_v19, %v305_v13  ;;  %v346_v58 = vadd.f32 %v328_v23, %v306_v16  ;;  %v78_v13 = vld [vmem:[#allocation2 + $0xf0] sm:$0xff]  ;;  %v79_v16 = vld [vmem:[#allocation2 + $0xf8] sm:$0x1] }
  0x5e   :  { %v347_v60 = vadd.f32 %v329_v3, %v307_v17  ;;  %v348_v0 = vadd.f32 %v330_v21, %v308_v5  ;;  %v349_v63 = vadd.f32 %v331_v44, %v309_v24  ;;  %v350_v38 = vadd.f32 %v332_v15, %v310_v26  ;;  %v6420_v17 = vld [vmem:[#allocation28_spill] sm:$0xff]  ;;  %v6421_v5 = vld [vmem:[#allocation19_spill] sm:$0xff]  ;;  %v6422_v24 = vld [vmem:[#allocation29_spill] sm:$0xff] }
  0x5f   :  { %v351_v46 = vadd.f32 %v333_v7, %v311_v31  ;;  %v352_v28 = vadd.f32 %v334_v30, %v312_v22  ;;  %v353_v20 = vadd.f32 %v335_v9, %v313_v2  ;;  %v354_v45 = vadd.f32 %v336_v11, %v314_v61  ;;  %v6423_v26 = vld [vmem:[#allocation30_spill] sm:$0xff]  ;;  %v3377_v7 = vld [vmem:[#allocation2 + $0x11] sm:$0xff] }
  0x60   :  { %v355_v8 = vadd.f32 %v337_v40, %v315_v4  ;;  %v356_v1 = vadd.f32 %v338_v39, %v316_v59  ;;  %v357_v51 = vadd.f32 %v339_v25, %v317_v57  ;;  %v358_v62 = vadd.f32 %v340_v41, %v318_v47  ;;  %v6418_v57 = vld [vmem:[#allocation26_spill] sm:$0xff]  ;;  %v6419_v59 = vld [vmem:[#allocation27_spill] sm:$0xff] }
  0x61   :  { %v359_v10 = vadd.f32 %v341_v34, %v319_v53  ;;  %v364_v29 = vmul.f32 %v6416_v18, %v6381_v32  ;;  %v365_v52 = vmul.f32 %v6416_v18, %v6382_v35  ;;  %v366_v56 = vmul.f32 %v6416_v18, %v6391_v50  ;;  %v6417_v53 = vld [vmem:[#allocation36_spill] sm:$0xff]  ;;  %v401_v15 = vld [vmem:[#allocation2 + $0x9] sm:$0x1]  ;;  %v3379_v39 = vld [vmem:[#allocation2 + $0x21] sm:$0xff] }
  0x62   :  { %v367_v2 = vmul.f32 %v6416_v18, %v6392_v54  ;;  %v368_v4 = vmul.f32 %v6416_v18, %v6401_v43  ;;  %v369_v47 = vmul.f32 %v6416_v18, %v6402_v14  ;;  %v370_v32 = vmul.f32 %v6416_v18, %v6409_v6  ;;  %v400_v6 = vld [vmem:[#allocation2 + $0x1] sm:$0xff] }
  0x63   :  { %v371_v35 = vmul.f32 %v6416_v18, %v6417_v53  ;;  %v372_v50 = vmul.f32 %v6416_v18, %v6418_v57  ;;  %v373_v61 = vmul.f32 %v6416_v18, %v6419_v59  ;;  %v374_v54 = vmul.f32 %v6416_v18, %v6420_v17 }
  0x64   :  { %v375_v43 = vmul.f32 %v6416_v18, %v6421_v5  ;;  %v376_v14 = vmul.f32 %v6416_v18, %v6422_v24  ;;  %v377_v31 = vmul.f32 %v6416_v18, %v6423_v26  ;;  %v378_v22 = vmul.f32 %v6416_v18, %v76_v42  ;;  %v403_v42 = vld [vmem:[#allocation2 + $0x19] sm:$0x1] }
  0x65   :  { %v379_v27 = vmul.f32 %v6416_v18, %v77_v48  ;;  %v380_v33 = vmul.f32 %v6416_v18, %v78_v13  ;;  %v381_v36 = vmul.f32 %v6416_v18, %v79_v16  ;;  %v382_v19 = vadd.f32 %v364_v29, %v342_v12  ;;  %v3381_v48 = vld [vmem:[#allocation2 + $0x29] sm:$0x1]  ;;  %v3391_v18 = vld [vmem:[#allocation2 + $0x51] sm:$0xff]  ;;  %v3393_v29 = vld [vmem:[#allocation2 + $0x59] sm:$0x1] }
  0x66   :  { %v383_v23 = vadd.f32 %v365_v52, %v343_v49  ;;  %v384_v3 = vadd.f32 %v366_v56, %v344_v37  ;;  %v385_v21 = vadd.f32 %v367_v2, %v345_v55  ;;  %v386_v44 = vadd.f32 %v368_v4, %v346_v58  ;;  %v3383_v49 = vld [vmem:[#allocation2 + $0x31] sm:$0xff]  ;;  %v3385_v37 = vld [vmem:[#allocation2 + $0x39] sm:$0x1]  ;;  %v3387_v55 = vld [vmem:[#allocation2 + $0x41] sm:$0xff]  ;;  %6424 = vst [vmem:[#allocation20_spill] sm:$0xff] %v3391_v18 }
  0x67   :  { %v387_v30 = vadd.f32 %v369_v47, %v347_v60  ;;  %v388_v9 = vadd.f32 %v370_v32, %v348_v0  ;;  %v389_v11 = vadd.f32 %v371_v35, %v349_v63  ;;  %v390_v40 = vadd.f32 %v372_v50, %v350_v38  ;;  %v3389_v38 = vld [vmem:[#allocation2 + $0x49] sm:$0x1]  ;;  %6425 = vst [vmem:[#allocation31_spill] sm:$0xff] %v3393_v29 }
  0x68   :  { %v391_v25 = vadd.f32 %v373_v61, %v351_v46  ;;  %v392_v41 = vadd.f32 %v374_v54, %v352_v28  ;;  %v393_v34 = vadd.f32 %v375_v43, %v353_v20  ;;  %v394_v12 = vadd.f32 %v376_v14, %v354_v45  ;;  %v3395_v28 = vld [vmem:[#allocation2 + $0x61] sm:$0xff]  ;;  %v3397_v20 = vld [vmem:[#allocation2 + $0x69] sm:$0x1]  ;;  %v3399_v45 = vld [vmem:[#allocation2 + $0x71] sm:$0xff] }
  0x69   :  { %v395_v58 = vadd.f32 %v377_v31, %v355_v8  ;;  %v396_v60 = vadd.f32 %v378_v22, %v356_v1  ;;  %v397_v0 = vadd.f32 %v379_v27, %v357_v51  ;;  %v398_v63 = vadd.f32 %v380_v33, %v358_v62  ;;  %6426 = vst [vmem:[#allocation32_spill] sm:$0xff] %v3395_v28  ;;  %v6429_v52 = vld [vmem:[#allocation18_spill] sm:$0xff]  ;;  %v3405_v62 = vld [vmem:[#allocation2 + $0x79] sm:$0x1] }
  0x6a   :  { %v399_v46 = vadd.f32 %v381_v36, %v359_v10  ;;  %6427 = vst [vmem:[#allocation21_spill] sm:$0xff] %v3397_v20  ;;  %6428 = vst [vmem:[#allocation33_spill] sm:$0xff] %v3399_v45  ;;  %v436_v56 = vmul.f32 %v6429_v52, %v400_v6  ;;  %v437_v8 = vmul.f32 %v6429_v52, %v401_v15  ;;  %v3407_v1 = vld [vmem:[#allocation2 + $0x81] sm:$0xff]  ;;  %v3409_v13 = vld [vmem:[#allocation2 + $0x89] sm:$0x1] }
  0x6b   :  { %v438_v51 = vmul.f32 %v6429_v52, %v3377_v7  ;;  %6430 = vst [vmem:[#allocation34_spill] sm:$0xff] %v3405_v62  ;;  %6431 = vst [vmem:[#allocation23_spill] sm:$0xff] %v3407_v1  ;;  %v439_v10 = vmul.f32 %v6429_v52, %v403_v42  ;;  %v440_v16 = vmul.f32 %v6429_v52, %v3379_v39 }
  0x6c   :  { %6432 = vst [vmem:[#allocation35_spill] sm:$0xff] %v3409_v13  ;;  %v441_v2 = vmul.f32 %v6429_v52, %v3381_v48  ;;  %v442_v4 = vmul.f32 %v6429_v52, %v3383_v49  ;;  %v443_v47 = vmul.f32 %v6429_v52, %v3385_v37  ;;  %v444_v32 = vmul.f32 %v6429_v52, %v3387_v55 }
  0x6d   :  { %v445_v53 = vmul.f32 %v6429_v52, %v3389_v38  ;;  %v446_v35 = vmul.f32 %v6429_v52, %v3391_v18  ;;  %v447_v57 = vmul.f32 %v6429_v52, %v3393_v29  ;;  %v448_v50 = vmul.f32 %v6429_v52, %v3395_v28 }
  0x6e   :  { %v449_v59 = vmul.f32 %v6429_v52, %v3397_v20  ;;  %v450_v61 = vmul.f32 %v6429_v52, %v3399_v45  ;;  %v451_v17 = vmul.f32 %v6429_v52, %v3405_v62  ;;  %v452_v54 = vmul.f32 %v6429_v52, %v3407_v1 }
  0x6f   :  { %v453_v5 = vmul.f32 %v6429_v52, %v3409_v13  ;;  %v454_v43 = vadd.f32 %v436_v56, %v382_v19  ;;  %v455_v24 = vadd.f32 %v437_v8, %v383_v23  ;;  %v456_v14 = vadd.f32 %v438_v51, %v384_v3  ;;  %v6433_v52 = vld [vmem:[#allocation22_spill] sm:$0xff] }
  0x70   :  { %v457_v26 = vadd.f32 %v439_v10, %v385_v21  ;;  %v458_v31 = vadd.f32 %v440_v16, %v386_v44  ;;  %v459_v22 = vadd.f32 %v441_v2, %v387_v30  ;;  %v460_v27 = vadd.f32 %v442_v4, %v388_v9  ;;  %v3445_v21 = vld [vmem:[#allocation2 + $0x91] sm:$0xff]  ;;  %v3447_v44 = vld [vmem:[#allocation2 + $0x99] sm:$0x1] }
  0x71   :  { %v461_v33 = vadd.f32 %v443_v47, %v389_v11  ;;  %v462_v36 = vadd.f32 %v444_v32, %v390_v40  ;;  %v463_v6 = vadd.f32 %v445_v53, %v391_v25  ;;  %v464_v15 = vadd.f32 %v446_v35, %v392_v41  ;;  %6434 = vst [vmem:[#allocation24_spill] sm:$0xff] %v3445_v21  ;;  %v6437_v41 = vld [vmem:[#allocation31_spill] sm:$0xff] }
  0x72   :  { %v465_v45 = vadd.f32 %v447_v57, %v393_v34  ;;  %v466_v20 = vadd.f32 %v448_v50, %v394_v12  ;;  %v467_v62 = vadd.f32 %v449_v59, %v395_v58  ;;  %v468_v28 = vadd.f32 %v450_v61, %v396_v60  ;;  %6435 = vst [vmem:[#allocation36_spill] sm:$0xff] %v3447_v44  ;;  %v6438_v12 = vld [vmem:[#allocation32_spill] sm:$0xff]  ;;  %v6439_v60 = vld [vmem:[#allocation21_spill] sm:$0xff]  ;;  %v6441_v56 = vld [vmem:[#allocation34_spill] sm:$0xff] }
  0x73   :  { %v469_v29 = vadd.f32 %v451_v17, %v397_v0  ;;  %v470_v1 = vadd.f32 %v452_v54, %v398_v63  ;;  %v471_v18 = vadd.f32 %v453_v5, %v399_v46  ;;  %v476_v19 = vmul.f32 %v6433_v52, %v3377_v7  ;;  %v6440_v63 = vld [vmem:[#allocation33_spill] sm:$0xff]  ;;  %v6442_v51 = vld [vmem:[#allocation23_spill] sm:$0xff] }
  0x74   :  { %v477_v23 = vmul.f32 %v6433_v52, %v403_v42  ;;  %v478_v3 = vmul.f32 %v6433_v52, %v3379_v39  ;;  %v479_v30 = vmul.f32 %v6433_v52, %v3381_v48  ;;  %v480_v9 = vmul.f32 %v6433_v52, %v3383_v49  ;;  %v6436_v42 = vld [vmem:[#allocation20_spill] sm:$0xff] }
  0x75   :  { %v481_v11 = vmul.f32 %v6433_v52, %v3385_v37  ;;  %v482_v7 = vmul.f32 %v6433_v52, %v3387_v55  ;;  %v483_v40 = vmul.f32 %v6433_v52, %v3389_v38  ;;  %v484_v25 = vmul.f32 %v6433_v52, %v6436_v42 }
  0x76   :  { %v485_v34 = vmul.f32 %v6433_v52, %v6437_v41  ;;  %v486_v58 = vmul.f32 %v6433_v52, %v6438_v12  ;;  %v487_v0 = vmul.f32 %v6433_v52, %v6439_v60  ;;  %v488_v46 = vmul.f32 %v6433_v52, %v6440_v63 }
  0x77   :  { %v489_v8 = vmul.f32 %v6433_v52, %v6441_v56  ;;  %v490_v10 = vmul.f32 %v6433_v52, %v6442_v51  ;;  %v491_v16 = vmul.f32 %v6433_v52, %v3409_v13  ;;  %v492_v2 = vmul.f32 %v6433_v52, %v3445_v21 }
  0x78   :  { %v493_v4 = vmul.f32 %v6433_v52, %v3447_v44  ;;  %v494_v47 = vadd.f32 %v476_v19, %v454_v43  ;;  %v495_v32 = vadd.f32 %v477_v23, %v455_v24  ;;  %v496_v53 = vadd.f32 %v478_v3, %v456_v14  ;;  %v6443_v52 = vld [vmem:[#allocation25_spill] sm:$0xff]  ;;  %v6451_v19 = vld [vmem:[#allocation35_spill] sm:$0xff]  ;;  %v6452_v3 = vld [vmem:[#allocation24_spill] sm:$0xff] }
  0x79   :  { %v497_v35 = vadd.f32 %v479_v30, %v457_v26  ;;  %v498_v57 = vadd.f32 %v480_v9, %v458_v31  ;;  %v499_v50 = vadd.f32 %v481_v11, %v459_v22  ;;  %v500_v59 = vadd.f32 %v482_v7, %v460_v27  ;;  %v3485_v26 = vld [vmem:[#allocation2 + $0xa1] sm:$0xff]  ;;  %v3487_v31 = vld [vmem:[#allocation2 + $0xa9] sm:$0x1] }
  0x7a   :  { %v501_v61 = vadd.f32 %v483_v40, %v461_v33  ;;  %v502_v17 = vadd.f32 %v484_v25, %v462_v36  ;;  %v503_v54 = vadd.f32 %v485_v34, %v463_v6  ;;  %v504_v5 = vadd.f32 %v486_v58, %v464_v15  ;;  %6444 = vst [vmem:[#allocation26_spill] sm:$0xff] %v3485_v26  ;;  %v6448_v22 = vld [vmem:[#allocation33_spill] sm:$0xff]  ;;  %v6449_v33 = vld [vmem:[#allocation34_spill] sm:$0xff]  ;;  %v6450_v6 = vld [vmem:[#allocation23_spill] sm:$0xff] }
  0x7b   :  { %v505_v51 = vadd.f32 %v487_v0, %v465_v45  ;;  %v506_v56 = vadd.f32 %v488_v46, %v466_v20  ;;  %v507_v13 = vadd.f32 %v489_v8, %v467_v62  ;;  %v508_v63 = vadd.f32 %v490_v10, %v468_v28  ;;  %6445 = vst [vmem:[#allocation27_spill] sm:$0xff] %v3487_v31  ;;  %v6446_v28 = vld [vmem:[#allocation32_spill] sm:$0xff]  ;;  %v6447_v62 = vld [vmem:[#allocation21_spill] sm:$0xff] }
  0x7c   :  { %v509_v60 = vadd.f32 %v491_v16, %v469_v29  ;;  %v510_v21 = vadd.f32 %v492_v2, %v470_v1  ;;  %v511_v12 = vadd.f32 %v493_v4, %v471_v18  ;;  %v516_v43 = vmul.f32 %v6443_v52, %v3379_v39 }
  0x7d   :  { %v517_v24 = vmul.f32 %v6443_v52, %v3381_v48  ;;  %v518_v14 = vmul.f32 %v6443_v52, %v3383_v49  ;;  %v519_v20 = vmul.f32 %v6443_v52, %v3385_v37  ;;  %v520_v29 = vmul.f32 %v6443_v52, %v3387_v55 }
  0x7e   :  { %v521_v18 = vmul.f32 %v6443_v52, %v3389_v38  ;;  %v522_v39 = vmul.f32 %v6443_v52, %v6436_v42  ;;  %v523_v48 = vmul.f32 %v6443_v52, %v6437_v41  ;;  %v524_v45 = vmul.f32 %v6443_v52, %v6446_v28 }
  0x7f   :  { %v525_v1 = vmul.f32 %v6443_v52, %v6447_v62  ;;  %v526_v27 = vmul.f32 %v6443_v52, %v6448_v22  ;;  %v527_v36 = vmul.f32 %v6443_v52, %v6449_v33  ;;  %v528_v15 = vmul.f32 %v6443_v52, %v6450_v6 }
  0x80   :  { %v529_v23 = vmul.f32 %v6443_v52, %v6451_v19  ;;  %v530_v30 = vmul.f32 %v6443_v52, %v6452_v3  ;;  %v531_v9 = vmul.f32 %v6443_v52, %v3447_v44  ;;  %v532_v11 = vmul.f32 %v6443_v52, %v3485_v26  ;;  %v6453_v19 = vld [vmem:[#allocation12_spill] sm:$0xff]  ;;  %v6454_v44 = vld [vmem:[#allocation13_spill] sm:$0xff] }
  0x81   :  { %v533_v7 = vmul.f32 %v6443_v52, %v3487_v31  ;;  %v534_v40 = vadd.f32 %v516_v43, %v494_v47  ;;  %v535_v25 = vadd.f32 %v517_v24, %v495_v32  ;;  %v536_v34 = vadd.f32 %v518_v14, %v496_v53  ;;  %v6455_v32 = vld [vmem:[#allocation14_spill] sm:$0xff]  ;;  %v6467_v14 = vld [vmem:[#allocation21_spill] sm:$0xff] }
  0x82   :  { %v537_v58 = vadd.f32 %v519_v20, %v497_v35  ;;  %v538_v0 = vadd.f32 %v520_v29, %v498_v57  ;;  %v539_v46 = vadd.f32 %v521_v18, %v499_v50  ;;  %v540_v8 = vadd.f32 %v522_v39, %v500_v59  ;;  %v6456_v35 = vld [vmem:[#allocation15_spill] sm:$0xff]  ;;  %v6458_v50 = vld [vmem:[#allocation16_spill] sm:$0xff]  ;;  %v6468_v29 = vld [vmem:[#allocation33_spill] sm:$0xff] }
  0x83   :  { %v541_v10 = vadd.f32 %v523_v48, %v501_v61  ;;  %v542_v16 = vadd.f32 %v524_v45, %v502_v17  ;;  %v543_v2 = vadd.f32 %v525_v1, %v503_v54  ;;  %v544_v4 = vadd.f32 %v526_v27, %v504_v5  ;;  %v3547_v17 = vld [vmem:[#allocation2 + $0xb1] sm:$0xff]  ;;  %v3549_v54 = vld [vmem:[#allocation2 + $0xb9] sm:$0x1]  ;;  %v6469_v18 = vld [vmem:[#allocation34_spill] sm:$0xff] }
  0x84   :  { %v545_v3 = vadd.f32 %v527_v36, %v505_v51  ;;  %v555_v6 = vrot.slane %v6454_v44, %v6453_v19  ;;  %v546_v33 = vadd.f32 %v528_v15, %v506_v56  ;;  %v547_v26 = vadd.f32 %v529_v23, %v507_v13  ;;  %v6460_v44 = vld [vmem:[#allocation17_spill] sm:$0xff]  ;;  %v6462_v13 = vld [vmem:[#allocation11_spill] sm:$0xff]  ;;  %6465 = vst [vmem:[#allocation22_spill] sm:$0xff] %v3547_v17  ;;  %v6472_v27 = vld [vmem:[#allocation24_spill] sm:$0xff] }
  0x85   :  { %v548_v22 = vadd.f32 %v530_v30, %v508_v63  ;;  %v549_v62 = vadd.f32 %v531_v9, %v509_v60  ;;  %v550_v52 = vadd.f32 %v532_v11, %v510_v21  ;;  %v551_v47 = vadd.f32 %v533_v7, %v511_v12  ;;  %6466 = vst [vmem:[#allocation20_spill] sm:$0xff] %v3549_v54  ;;  %v6470_v39 = vld [vmem:[#allocation23_spill] sm:$0xff]  ;;  %v6473_v15 = vld [vmem:[#allocation36_spill] sm:$0xff]  ;;  %v6474_v23 = vld [vmem:[#allocation26_spill] sm:$0xff] }
  0x86   :  { %v3523_v53 = vrot.slane %v6455_v32, %v6453_v19  ;;  %v3527_v57 = vrot.slane %v6456_v35, %v6453_v19  ;;  %v3531_v51 = vrot.slane %v6458_v50, %v6453_v19  ;;  %v3535_v56 = vrot.slane %v6460_v44, %v6453_v19  ;;  %v6471_v45 = vld [vmem:[#allocation35_spill] sm:$0xff] }
  0x87   :  { %v3538_v60 = vsub.s32 2, %v6462_v13  ;;  %v3541_v21 = vsub.s32 3, %v6462_v13  ;;  %v556_v12 = vmul.f32 %v555_v6, %v3383_v49  ;;  %v557_v63 = vmul.f32 %v555_v6, %v3385_v37 }
  0x88   :  { %6457 = vst [vmem:[#allocation28_spill] sm:$0xff] %v3527_v57  ;;  %6459 = vst [vmem:[#allocation19_spill] sm:$0xff] %v3531_v51  ;;  %v558_v59 = vmul.f32 %v555_v6, %v3387_v55  ;;  %v559_v61 = vmul.f32 %v555_v6, %v3389_v38  ;;  %v560_v5 = vmul.f32 %v555_v6, %v6436_v42 }
  0x89   :  { %6461 = vst [vmem:[#allocation29_spill] sm:$0xff] %v3535_v56  ;;  %6463 = vst [vmem:[#allocation30_spill] sm:$0xff] %v3538_v60  ;;  %v561_v43 = vmul.f32 %v555_v6, %v6437_v41  ;;  %v562_v24 = vmul.f32 %v555_v6, %v6446_v28  ;;  %v563_v20 = vmul.f32 %v555_v6, %v6467_v14 }
  0x8a   :  { %6464 = vst [vmem:[#allocation18_spill] sm:$0xff] %v3541_v21  ;;  %v564_v49 = vmul.f32 %v555_v6, %v6468_v29  ;;  %v565_v37 = vmul.f32 %v555_v6, %v6469_v18  ;;  %v566_v48 = vmul.f32 %v555_v6, %v6470_v39  ;;  %v567_v1 = vmul.f32 %v555_v6, %v6471_v45 }
  0x8b   :  { %v568_v36 = vmul.f32 %v555_v6, %v6472_v27  ;;  %v569_v19 = vmul.f32 %v555_v6, %v6473_v15  ;;  %v570_v30 = vmul.f32 %v555_v6, %v6474_v23  ;;  %v571_v9 = vmul.f32 %v555_v6, %v3487_v31 }
  0x8c   :  { %v572_v11 = vmul.f32 %v555_v6, %v3547_v17  ;;  %v573_v7 = vmul.f32 %v555_v6, %v3549_v54  ;;  %v574_v32 = vadd.f32 %v556_v12, %v534_v40  ;;  %v575_v35 = vadd.f32 %v557_v63, %v535_v25  ;;  %v6483_v12 = vld [vmem:[#allocation27_spill] sm:$0xff] }
  0x8d   :  { %v576_v50 = vadd.f32 %v558_v59, %v536_v34  ;;  %v577_v44 = vadd.f32 %v559_v61, %v537_v58  ;;  %v578_v13 = vadd.f32 %v560_v5, %v538_v0  ;;  %v579_v21 = vadd.f32 %v561_v43, %v539_v46  ;;  %v3573_v58 = vld [vmem:[#allocation2 + $0xc1] sm:$0xff]  ;;  %v6479_v46 = vld [vmem:[#allocation35_spill] sm:$0xff] }
  0x8e   :  { %v580_v60 = vadd.f32 %v562_v24, %v540_v8  ;;  %v581_v56 = vadd.f32 %v563_v20, %v541_v10  ;;  %v582_v51 = vadd.f32 %v564_v49, %v542_v16  ;;  %v583_v57 = vadd.f32 %v565_v37, %v543_v2  ;;  %6475 = vst [vmem:[#allocation31_spill] sm:$0xff] %v3573_v58  ;;  %v6480_v10 = vld [vmem:[#allocation24_spill] sm:$0xff]  ;;  %v6484_v59 = vld [vmem:[#allocation22_spill] sm:$0xff] }
  0x8f   :  { %v584_v27 = vadd.f32 %v566_v48, %v544_v4  ;;  %v585_v15 = vadd.f32 %v567_v1, %v545_v3  ;;  %v586_v45 = vadd.f32 %v568_v36, %v546_v33  ;;  %v587_v23 = vadd.f32 %v569_v19, %v547_v26  ;;  %v3575_v33 = vld [vmem:[#allocation2 + $0xc9] sm:$0x1]  ;;  %v6478_v3 = vld [vmem:[#allocation23_spill] sm:$0xff]  ;;  %v6481_v2 = vld [vmem:[#allocation36_spill] sm:$0xff] }
  0x90   :  { %v588_v39 = vadd.f32 %v570_v30, %v548_v22  ;;  %v589_v31 = vadd.f32 %v571_v9, %v549_v62  ;;  %v590_v18 = vadd.f32 %v572_v11, %v550_v52  ;;  %v591_v17 = vadd.f32 %v573_v7, %v551_v47  ;;  %6476 = vst [vmem:[#allocation25_spill] sm:$0xff] %v3575_v33  ;;  %v6482_v52 = vld [vmem:[#allocation26_spill] sm:$0xff] }
  0x91   :  { %v596_v6 = vmul.f32 %v3523_v53, %v3387_v55  ;;  %v597_v40 = vmul.f32 %v3523_v53, %v3389_v38  ;;  %v598_v25 = vmul.f32 %v3523_v53, %v6436_v42  ;;  %v599_v34 = vmul.f32 %v3523_v53, %v6437_v41  ;;  %v6477_v38 = vld [vmem:[#allocation34_spill] sm:$0xff] }
  0x92   :  { %v600_v26 = vmul.f32 %v3523_v53, %v6446_v28  ;;  %v601_v62 = vmul.f32 %v3523_v53, %v6467_v14  ;;  %v602_v55 = vmul.f32 %v3523_v53, %v6468_v29  ;;  %v603_v22 = vmul.f32 %v3523_v53, %v6477_v38 }
  0x93   :  { %v604_v0 = vmul.f32 %v3523_v53, %v6478_v3  ;;  %v605_v8 = vmul.f32 %v3523_v53, %v6479_v46  ;;  %v606_v16 = vmul.f32 %v3523_v53, %v6480_v10  ;;  %v607_v4 = vmul.f32 %v3523_v53, %v6481_v2 }
  0x94   :  { %v608_v47 = vmul.f32 %v3523_v53, %v6482_v52  ;;  %v609_v63 = vmul.f32 %v3523_v53, %v6483_v12  ;;  %v610_v61 = vmul.f32 %v3523_v53, %v6484_v59  ;;  %v611_v5 = vmul.f32 %v3523_v53, %v3549_v54 }
  0x95   :  { %v612_v43 = vmul.f32 %v3523_v53, %v3573_v58  ;;  %v613_v24 = vmul.f32 %v3523_v53, %v3575_v33  ;;  %v614_v20 = vadd.f32 %v596_v6, %v574_v32  ;;  %v615_v49 = vadd.f32 %v597_v40, %v575_v35  ;;  %v6485_v53 = vld [vmem:[#allocation28_spill] sm:$0xff] }
  0x96   :  { %v616_v37 = vadd.f32 %v598_v25, %v576_v50  ;;  %v617_v48 = vadd.f32 %v599_v34, %v577_v44  ;;  %v618_v1 = vadd.f32 %v600_v26, %v578_v13  ;;  %v619_v36 = vadd.f32 %v601_v62, %v579_v21  ;;  %v6488_v21 = vld [vmem:[#allocation24_spill] sm:$0xff]  ;;  %v6492_v50 = vld [vmem:[#allocation22_spill] sm:$0xff]  ;;  %v6494_v25 = vld [vmem:[#allocation31_spill] sm:$0xff] }
  0x97   :  { %v620_v19 = vadd.f32 %v602_v55, %v580_v60  ;;  %v621_v30 = vadd.f32 %v603_v22, %v581_v56  ;;  %v622_v9 = vadd.f32 %v604_v0, %v582_v51  ;;  %v623_v11 = vadd.f32 %v605_v8, %v583_v57  ;;  %v3613_v51 = vld [vmem:[#allocation2 + $0xd1] sm:$0xff]  ;;  %v3615_v56 = vld [vmem:[#allocation2 + $0xd9] sm:$0x1] }
  0x98   :  { %v624_v7 = vadd.f32 %v606_v16, %v584_v27  ;;  %v625_v59 = vadd.f32 %v607_v4, %v585_v15  ;;  %v626_v12 = vadd.f32 %v608_v47, %v586_v45  ;;  %v627_v54 = vadd.f32 %v609_v63, %v587_v23  ;;  %6486 = vst [vmem:[#allocation32_spill] sm:$0xff] %v3613_v51  ;;  %v6490_v45 = vld [vmem:[#allocation26_spill] sm:$0xff]  ;;  %v6491_v15 = vld [vmem:[#allocation27_spill] sm:$0xff]  ;;  %v6493_v6 = vld [vmem:[#allocation20_spill] sm:$0xff] }
  0x99   :  { %v628_v52 = vadd.f32 %v610_v61, %v588_v39  ;;  %v629_v2 = vadd.f32 %v611_v5, %v589_v31  ;;  %v630_v58 = vadd.f32 %v612_v43, %v590_v18  ;;  %v631_v10 = vadd.f32 %v613_v24, %v591_v17  ;;  %6487 = vst [vmem:[#allocation12_spill] sm:$0xff] %v3615_v56  ;;  %v6489_v18 = vld [vmem:[#allocation36_spill] sm:$0xff] }
  0x9a   :  { %v636_v32 = vmul.f32 %v6485_v53, %v6436_v42  ;;  %v637_v35 = vmul.f32 %v6485_v53, %v6437_v41  ;;  %v638_v13 = vmul.f32 %v6485_v53, %v6446_v28  ;;  %v639_v57 = vmul.f32 %v6485_v53, %v6467_v14 }
  0x9b   :  { %v640_v31 = vmul.f32 %v6485_v53, %v6468_v29  ;;  %v641_v60 = vmul.f32 %v6485_v53, %v6477_v38  ;;  %v642_v42 = vmul.f32 %v6485_v53, %v6478_v3  ;;  %v643_v41 = vmul.f32 %v6485_v53, %v6479_v46 }
  0x9c   :  { %v644_v17 = vmul.f32 %v6485_v53, %v6488_v21  ;;  %v645_v39 = vmul.f32 %v6485_v53, %v6489_v18  ;;  %v646_v27 = vmul.f32 %v6485_v53, %v6490_v45  ;;  %v647_v23 = vmul.f32 %v6485_v53, %v6491_v15 }
  0x9d   :  { %v648_v44 = vmul.f32 %v6485_v53, %v6492_v50  ;;  %v649_v40 = vmul.f32 %v6485_v53, %v6493_v6  ;;  %v650_v34 = vmul.f32 %v6485_v53, %v6494_v25  ;;  %v651_v26 = vmul.f32 %v6485_v53, %v3575_v33 }
  0x9e   :  { %v652_v62 = vmul.f32 %v6485_v53, %v3613_v51  ;;  %v653_v55 = vmul.f32 %v6485_v53, %v3615_v56  ;;  %v654_v22 = vadd.f32 %v636_v32, %v614_v20  ;;  %v655_v0 = vadd.f32 %v637_v35, %v615_v49  ;;  %v6495_v53 = vld [vmem:[#allocation19_spill] sm:$0xff]  ;;  %v6501_v32 = vld [vmem:[#allocation25_spill] sm:$0xff] }
  0x9f   :  { %v656_v8 = vadd.f32 %v638_v13, %v616_v37  ;;  %v657_v16 = vadd.f32 %v639_v57, %v617_v48  ;;  %v658_v4 = vadd.f32 %v640_v31, %v618_v1  ;;  %v659_v47 = vadd.f32 %v641_v60, %v619_v36  ;;  %v428_v1 = vld [vmem:[#allocation2 + $0xe1] sm:$0xff]  ;;  %v6502_v13 = vld [vmem:[#allocation32_spill] sm:$0xff] }
  0xa0   :  { %v660_v63 = vadd.f32 %v642_v42, %v620_v19  ;;  %v661_v61 = vadd.f32 %v643_v41, %v621_v30  ;;  %v662_v5 = vadd.f32 %v644_v17, %v622_v9  ;;  %v663_v43 = vadd.f32 %v645_v39, %v623_v11  ;;  %v6498_v36 = vld [vmem:[#allocation22_spill] sm:$0xff]  ;;  %v6499_v30 = vld [vmem:[#allocation20_spill] sm:$0xff]  ;;  %v6500_v11 = vld [vmem:[#allocation31_spill] sm:$0xff] }
  0xa1   :  { %v664_v24 = vadd.f32 %v646_v27, %v624_v7  ;;  %v665_v25 = vadd.f32 %v647_v23, %v625_v59  ;;  %v666_v6 = vadd.f32 %v648_v44, %v626_v12  ;;  %v667_v33 = vadd.f32 %v649_v40, %v627_v54  ;;  %v429_v59 = vld [vmem:[#allocation2 + $0xe9] sm:$0x1] }
  0xa2   :  { %v668_v50 = vadd.f32 %v650_v34, %v628_v52  ;;  %v669_v15 = vadd.f32 %v651_v26, %v629_v2  ;;  %v670_v51 = vadd.f32 %v652_v62, %v630_v58  ;;  %v671_v45 = vadd.f32 %v653_v55, %v631_v10  ;;  %v6496_v10 = vld [vmem:[#allocation26_spill] sm:$0xff]  ;;  %v6497_v52 = vld [vmem:[#allocation27_spill] sm:$0xff] }
  0xa3   :  { %v676_v20 = vmul.f32 %v6495_v53, %v6446_v28  ;;  %v677_v49 = vmul.f32 %v6495_v53, %v6467_v14  ;;  %v678_v37 = vmul.f32 %v6495_v53, %v6468_v29  ;;  %v679_v48 = vmul.f32 %v6495_v53, %v6477_v38 }
  0xa4   :  { %v680_v54 = vmul.f32 %v6495_v53, %v6478_v3  ;;  %v681_v58 = vmul.f32 %v6495_v53, %v6479_v46  ;;  %v682_v28 = vmul.f32 %v6495_v53, %v6488_v21  ;;  %v683_v14 = vmul.f32 %v6495_v53, %v6489_v18 }
  0xa5   :  { %v684_v2 = vmul.f32 %v6495_v53, %v6496_v10  ;;  %v685_v12 = vmul.f32 %v6495_v53, %v6497_v52  ;;  %v686_v19 = vmul.f32 %v6495_v53, %v6498_v36  ;;  %v687_v9 = vmul.f32 %v6495_v53, %v6499_v30 }
  0xa6   :  { %v688_v7 = vmul.f32 %v6495_v53, %v6500_v11  ;;  %v689_v35 = vmul.f32 %v6495_v53, %v6501_v32  ;;  %v690_v57 = vmul.f32 %v6495_v53, %v6502_v13  ;;  %v691_v31 = vmul.f32 %v6495_v53, %v3615_v56 }
  0xa7   :  { %v692_v60 = vmul.f32 %v6495_v53, %v428_v1  ;;  %v693_v42 = vmul.f32 %v6495_v53, %v429_v59  ;;  %v694_v41 = vadd.f32 %v676_v20, %v654_v22  ;;  %v695_v17 = vadd.f32 %v677_v49, %v655_v0  ;;  %v6503_v53 = vld [vmem:[#allocation29_spill] sm:$0xff] }
  0xa8   :  { %v696_v39 = vadd.f32 %v678_v37, %v656_v8  ;;  %v697_v27 = vadd.f32 %v679_v48, %v657_v16  ;;  %v698_v23 = vadd.f32 %v680_v54, %v658_v4  ;;  %v699_v44 = vadd.f32 %v681_v58, %v659_v47  ;;  %v430_v4 = vld [vmem:[#allocation2 + $0xf1] sm:$0xff] }
  0xa9   :  { %v700_v40 = vadd.f32 %v682_v28, %v660_v63  ;;  %v701_v34 = vadd.f32 %v683_v14, %v661_v61  ;;  %v702_v26 = vadd.f32 %v684_v2, %v662_v5  ;;  %v703_v62 = vadd.f32 %v685_v12, %v663_v43  ;;  %v6508_v63 = vld [vmem:[#allocation25_spill] sm:$0xff]  ;;  %v6509_v61 = vld [vmem:[#allocation32_spill] sm:$0xff] }
  0xaa   :  { %v704_v55 = vadd.f32 %v686_v19, %v664_v24  ;;  %v705_v32 = vadd.f32 %v687_v9, %v665_v25  ;;  %v706_v13 = vadd.f32 %v688_v7, %v666_v6  ;;  %v707_v11 = vadd.f32 %v689_v35, %v667_v33  ;;  %v431_v25 = vld [vmem:[#allocation2 + $0xf9] sm:$0x1]  ;;  %v6507_v6 = vld [vmem:[#allocation31_spill] sm:$0xff]  ;;  %v752_v19 = vld [vmem:[#allocation2 + $0x2] sm:$0xff] }
  0xab   :  { %v708_v30 = vadd.f32 %v690_v57, %v668_v50  ;;  %v709_v56 = vadd.f32 %v691_v31, %v669_v15  ;;  %v710_v36 = vadd.f32 %v692_v60, %v670_v51  ;;  %v711_v52 = vadd.f32 %v693_v42, %v671_v45  ;;  %v6504_v45 = vld [vmem:[#allocation27_spill] sm:$0xff]  ;;  %v6505_v15 = vld [vmem:[#allocation22_spill] sm:$0xff]  ;;  %v6506_v50 = vld [vmem:[#allocation20_spill] sm:$0xff] }
  0xac   :  { %v716_v22 = vmul.f32 %v6503_v53, %v6468_v29  ;;  %v717_v0 = vmul.f32 %v6503_v53, %v6477_v38  ;;  %v718_v8 = vmul.f32 %v6503_v53, %v6478_v3  ;;  %v719_v16 = vmul.f32 %v6503_v53, %v6479_v46  ;;  %v6510_v5 = vld [vmem:[#allocation12_spill] sm:$0xff]  ;;  %v753_v57 = vld [vmem:[#allocation2 + $0xa] sm:$0x1]  ;;  %v3741_v42 = vld [vmem:[#allocation5] sm:$0xff] }
  0xad   :  { %v720_v33 = vmul.f32 %v6503_v53, %v6488_v21  ;;  %v721_v51 = vmul.f32 %v6503_v53, %v6489_v18  ;;  %v722_v29 = vmul.f32 %v6503_v53, %v6496_v10  ;;  %v723_v38 = vmul.f32 %v6503_v53, %v6504_v45  ;;  %v3737_v31 = vld [vmem:[#allocation2 + $0x12] sm:$0xff]  ;;  %v3739_v60 = vld [vmem:[#allocation2 + $0x1a] sm:$0x1]  ;;  %6511 = vst [vmem:[#allocation13_spill] sm:$0xff] %v3741_v42 }
  0xae   :  { %v724_v3 = vmul.f32 %v6503_v53, %v6505_v15  ;;  %v725_v46 = vmul.f32 %v6503_v53, %v6506_v50  ;;  %v726_v47 = vmul.f32 %v6503_v53, %v6507_v6  ;;  %v727_v21 = vmul.f32 %v6503_v53, %v6508_v63  ;;  %v3807_v45 = vld [vmem:[#allocation5 + $0x38] sm:$0xff]  ;;  %v3813_v15 = vld [vmem:[#allocation2 + $0x6a] sm:$0x1] }
  0xaf   :  { %v728_v18 = vmul.f32 %v6503_v53, %v6509_v61  ;;  %v729_v43 = vmul.f32 %v6503_v53, %v6510_v5  ;;  %v730_v24 = vmul.f32 %v6503_v53, %v428_v1  ;;  %v731_v20 = vmul.f32 %v6503_v53, %v429_v59  ;;  %6525 = vst [vmem:[#allocation19_spill] sm:$0xff] %v3807_v45  ;;  %v3817_v50 = vld [vmem:[#allocation2 + $0x7a] sm:$0x1]  ;;  %v3823_v61 = vld [vmem:[#allocation2 + $0x8a] sm:$0x1] }
  0xb0   :  { %v732_v49 = vmul.f32 %v6503_v53, %v430_v4  ;;  %v733_v37 = vmul.f32 %v6503_v53, %v431_v25  ;;  %v3711_v48 = vadd.f32 %v716_v22, %v694_v41  ;;  %v3713_v54 = vadd.f32 %v717_v0, %v695_v17  ;;  %v6512_v41 = vld [vmem:[#allocation30_spill] sm:$0xff]  ;;  %v3777_v53 = vld [vmem:[#allocation5 + $0x18] sm:$0xff]  ;;  %6527 = vst [vmem:[#allocation29_spill] sm:$0xff] %v3813_v15 }
  0xb1   :  { %v3715_v58 = vadd.f32 %v718_v8, %v696_v39  ;;  %v3717_v28 = vadd.f32 %v719_v16, %v697_v27  ;;  %v3719_v14 = vadd.f32 %v720_v33, %v698_v23  ;;  %v3721_v10 = vadd.f32 %v721_v51, %v699_v44  ;;  %v3755_v44 = vld [vmem:[#allocation2 + $0x2a] sm:$0x1]  ;;  %6515 = vst [vmem:[#allocation16_spill] sm:$0xff] %v3777_v53  ;;  %v3783_v22 = vld [vmem:[#allocation2 + $0x52] sm:$0xff]  ;;  %v3785_v0 = vld [vmem:[#allocation2 + $0x5a] sm:$0x1] }
  0xb2   :  { %v3723_v2 = vadd.f32 %v722_v29, %v700_v40  ;;  %v3725_v1 = vadd.f32 %v723_v38, %v701_v34  ;;  %v3727_v59 = vadd.f32 %v724_v3, %v702_v26  ;;  %v3729_v12 = vadd.f32 %v725_v46, %v703_v62  ;;  %v3757_v40 = vld [vmem:[#allocation2 + $0x32] sm:$0xff]  ;;  %v3759_v26 = vld [vmem:[#allocation2 + $0x3a] sm:$0x1]  ;;  %v3761_v62 = vld [vmem:[#allocation2 + $0x42] sm:$0xff]  ;;  %6517 = vst [vmem:[#allocation21_spill] sm:$0xff] %v3785_v0 }
  0xb3   :  { %v3731_v9 = vadd.f32 %v726_v47, %v704_v55  ;;  %v3733_v7 = vadd.f32 %v727_v21, %v705_v32  ;;  %v3735_v35 = vadd.f32 %v728_v18, %v706_v13  ;;  %v787_v17 = vrot.slane %v3741_v42, %v6512_v41  ;;  %v3753_v13 = vld [vmem:[#allocation2 + $0x22] sm:$0xff]  ;;  %v3763_v55 = vld [vmem:[#allocation2 + $0x4a] sm:$0x1]  ;;  %v3801_v51 = vld [vmem:[#allocation5 + $0x30] sm:$0xff]  ;;  %6529 = vst [vmem:[#allocation22_spill] sm:$0xff] %v3817_v50 }
  0xb4   :  { %v3745_v39 = vadd.f32 %v729_v43, %v707_v11  ;;  %v3747_v27 = vadd.f32 %v730_v24, %v708_v30  ;;  %v3749_v23 = vadd.f32 %v731_v20, %v709_v56  ;;  %v3751_v32 = vadd.f32 %v732_v49, %v710_v36  ;;  %v3765_v11 = vld [vmem:[#allocation5 + $0x8] sm:$0xff]  ;;  %v3771_v36 = vld [vmem:[#allocation5 + $0x10] sm:$0xff]  ;;  %v3789_v16 = vld [vmem:[#allocation5 + $0x20] sm:$0xff]  ;;  %6523 = vst [vmem:[#allocation24_spill] sm:$0xff] %v3801_v51 }
  0xb5   :  { %v751_v34 = vadd.f32 %v733_v37, %v711_v52  ;;  %6513 = vst [vmem:[#allocation14_spill] sm:$0xff] %v3765_v11  ;;  %v3769_v56 = vrot.slane %v3765_v11, %v6512_v41  ;;  %6514 = vst [vmem:[#allocation15_spill] sm:$0xff] %v3771_v36  ;;  %v3775_v30 = vrot.slane %v3771_v36, %v6512_v41  ;;  %v3787_v8 = vld [vmem:[#allocation2 + $0x62] sm:$0xff]  ;;  %v3815_v3 = vld [vmem:[#allocation2 + $0x72] sm:$0xff] }
  0xb6   :  { %v3781_v52 = vrot.slane %v3777_v53, %v6512_v41  ;;  %6518 = vst [vmem:[#allocation33_spill] sm:$0xff] %v3787_v8  ;;  %6519 = vst [vmem:[#allocation34_spill] sm:$0xff] %v3789_v16  ;;  %v3793_v4 = vrot.slane %v3789_v16, %v6512_v41  ;;  %v3795_v25 = vld [vmem:[#allocation5 + $0x28] sm:$0xff]  ;;  %v3805_v29 = vrot.slane %v3801_v51, %v6512_v41 }
  0xb7   :  { %6521 = vst [vmem:[#allocation35_spill] sm:$0xff] %v3795_v25  ;;  %v3799_v33 = vrot.slane %v3795_v25, %v6512_v41  ;;  %v3811_v38 = vrot.slane %v3807_v45, %v6512_v41  ;;  %6528 = vst [vmem:[#allocation27_spill] sm:$0xff] %v3815_v3  ;;  %v788_v46 = vmul.f32 %v787_v17, %v752_v19  ;;  %v3821_v21 = vld [vmem:[#allocation2 + $0x82] sm:$0xff] }
  0xb8   :  { %6516 = vst [vmem:[#allocation17_spill] sm:$0xff] %v3781_v52  ;;  %6520 = vst [vmem:[#allocation23_spill] sm:$0xff] %v3793_v4  ;;  %v789_v6 = vmul.f32 %v787_v17, %v753_v57  ;;  %v790_v47 = vmul.f32 %v787_v17, %v3737_v31  ;;  %v791_v63 = vmul.f32 %v787_v17, %v3739_v60 }
  0xb9   :  { %6522 = vst [vmem:[#allocation28_spill] sm:$0xff] %v3799_v33  ;;  %6524 = vst [vmem:[#allocation36_spill] sm:$0xff] %v3805_v29  ;;  %v792_v18 = vmul.f32 %v787_v17, %v3753_v13  ;;  %v793_v5 = vmul.f32 %v787_v17, %v3755_v44  ;;  %v794_v43 = vmul.f32 %v787_v17, %v3757_v40 }
  0xba   :  { %6526 = vst [vmem:[#allocation26_spill] sm:$0xff] %v3811_v38  ;;  %6530 = vst [vmem:[#allocation20_spill] sm:$0xff] %v3821_v21  ;;  %v795_v24 = vmul.f32 %v787_v17, %v3759_v26  ;;  %v796_v20 = vmul.f32 %v787_v17, %v3761_v62  ;;  %v797_v49 = vmul.f32 %v787_v17, %v3763_v55 }
  0xbb   :  { %6531 = vst [vmem:[#allocation31_spill] sm:$0xff] %v3823_v61  ;;  %v798_v37 = vmul.f32 %v787_v17, %v3783_v22  ;;  %v799_v19 = vmul.f32 %v787_v17, %v3785_v0  ;;  %v800_v57 = vmul.f32 %v787_v17, %v3787_v8  ;;  %v801_v41 = vmul.f32 %v787_v17, %v3813_v15 }
  0xbc   :  { %v802_v45 = vmul.f32 %v787_v17, %v3815_v3  ;;  %v803_v51 = vmul.f32 %v787_v17, %v3817_v50  ;;  %v804_v25 = vmul.f32 %v787_v17, %v3821_v21  ;;  %v805_v16 = vmul.f32 %v787_v17, %v3823_v61 }
  0xbd   :  { %v806_v53 = vadd.f32 %v788_v46, %v3711_v48  ;;  %v807_v36 = vadd.f32 %v789_v6, %v3713_v54  ;;  %v808_v11 = vadd.f32 %v790_v47, %v3715_v58  ;;  %v809_v42 = vadd.f32 %v791_v63, %v3717_v28 }
  0xbe   :  { %v810_v38 = vadd.f32 %v792_v18, %v3719_v14  ;;  %v811_v29 = vadd.f32 %v793_v5, %v3721_v10  ;;  %v812_v33 = vadd.f32 %v794_v43, %v3723_v2  ;;  %v813_v4 = vadd.f32 %v795_v24, %v3725_v1 }
  0xbf   :  { %v814_v52 = vadd.f32 %v796_v20, %v3727_v59  ;;  %v815_v17 = vadd.f32 %v797_v49, %v3729_v12  ;;  %v816_v48 = vadd.f32 %v798_v37, %v3731_v9  ;;  %v817_v54 = vadd.f32 %v799_v19, %v3733_v7  ;;  %v3864_v7 = vld [vmem:[#allocation2 + $0x92] sm:$0xff] }
  0xc0   :  { %v818_v58 = vadd.f32 %v800_v57, %v3735_v35  ;;  %v819_v28 = vadd.f32 %v801_v41, %v3745_v39  ;;  %v820_v14 = vadd.f32 %v802_v45, %v3747_v27  ;;  %v821_v10 = vadd.f32 %v803_v51, %v3749_v23  ;;  %6532 = vst [vmem:[#allocation25_spill] sm:$0xff] %v3864_v7  ;;  %v3866_v35 = vld [vmem:[#allocation2 + $0x9a] sm:$0x1] }
  0xc1   :  { %v822_v2 = vadd.f32 %v804_v25, %v3751_v32  ;;  %v823_v46 = vadd.f32 %v805_v16, %v751_v34  ;;  %v828_v1 = vmul.f32 %v3769_v56, %v3737_v31  ;;  %v829_v59 = vmul.f32 %v3769_v56, %v3739_v60  ;;  %6533 = vst [vmem:[#allocation32_spill] sm:$0xff] %v3866_v35 }
  0xc2   :  { %v830_v12 = vmul.f32 %v3769_v56, %v3753_v13  ;;  %v831_v9 = vmul.f32 %v3769_v56, %v3755_v44  ;;  %v832_v39 = vmul.f32 %v3769_v56, %v3757_v40  ;;  %v833_v27 = vmul.f32 %v3769_v56, %v3759_v26 }
  0xc3   :  { %v834_v31 = vmul.f32 %v3769_v56, %v3761_v62  ;;  %v835_v60 = vmul.f32 %v3769_v56, %v3763_v55  ;;  %v836_v23 = vmul.f32 %v3769_v56, %v3783_v22  ;;  %v837_v32 = vmul.f32 %v3769_v56, %v3785_v0 }
  0xc4   :  { %v838_v34 = vmul.f32 %v3769_v56, %v3787_v8  ;;  %v839_v16 = vmul.f32 %v3769_v56, %v3813_v15  ;;  %v840_v25 = vmul.f32 %v3769_v56, %v3815_v3  ;;  %v841_v51 = vmul.f32 %v3769_v56, %v3817_v50 }
  0xc5   :  { %v842_v45 = vmul.f32 %v3769_v56, %v3821_v21  ;;  %v843_v6 = vmul.f32 %v3769_v56, %v3823_v61  ;;  %v844_v47 = vmul.f32 %v3769_v56, %v3864_v7  ;;  %v845_v63 = vmul.f32 %v3769_v56, %v3866_v35 }
  0xc6   :  { %v846_v18 = vadd.f32 %v828_v1, %v806_v53  ;;  %v847_v5 = vadd.f32 %v829_v59, %v807_v36  ;;  %v848_v43 = vadd.f32 %v830_v12, %v808_v11  ;;  %v849_v24 = vadd.f32 %v831_v9, %v809_v42  ;;  %v3904_v53 = vld [vmem:[#allocation2 + $0xa2] sm:$0xff]  ;;  %v6542_v1 = vld [vmem:[#allocation31_spill] sm:$0xff] }
  0xc7   :  { %v850_v20 = vadd.f32 %v832_v39, %v810_v38  ;;  %v851_v49 = vadd.f32 %v833_v27, %v811_v29  ;;  %v852_v37 = vadd.f32 %v834_v31, %v812_v33  ;;  %v853_v19 = vadd.f32 %v835_v60, %v813_v4  ;;  %6534 = vst [vmem:[#allocation12_spill] sm:$0xff] %v3904_v53  ;;  %v6537_v38 = vld [vmem:[#allocation33_spill] sm:$0xff] }
  0xc8   :  { %v854_v57 = vadd.f32 %v836_v23, %v814_v52  ;;  %v855_v41 = vadd.f32 %v837_v32, %v815_v17  ;;  %v856_v21 = vadd.f32 %v838_v34, %v816_v48  ;;  %v857_v50 = vadd.f32 %v839_v16, %v817_v54  ;;  %v3906_v52 = vld [vmem:[#allocation2 + $0xaa] sm:$0x1]  ;;  %v6538_v48 = vld [vmem:[#allocation29_spill] sm:$0xff] }
  0xc9   :  { %v858_v3 = vadd.f32 %v840_v25, %v818_v58  ;;  %v859_v61 = vadd.f32 %v841_v51, %v819_v28  ;;  %v860_v15 = vadd.f32 %v842_v45, %v820_v14  ;;  %v861_v8 = vadd.f32 %v843_v6, %v821_v10  ;;  %6535 = vst [vmem:[#allocation30_spill] sm:$0xff] %v3906_v52  ;;  %v6539_v58 = vld [vmem:[#allocation27_spill] sm:$0xff]  ;;  %v6540_v14 = vld [vmem:[#allocation22_spill] sm:$0xff]  ;;  %v6543_v12 = vld [vmem:[#allocation25_spill] sm:$0xff] }
  0xca   :  { %v862_v7 = vadd.f32 %v844_v47, %v822_v2  ;;  %v863_v0 = vadd.f32 %v845_v63, %v823_v46  ;;  %v868_v56 = vmul.f32 %v3775_v30, %v3753_v13  ;;  %v869_v42 = vmul.f32 %v3775_v30, %v3755_v44  ;;  %v6536_v44 = vld [vmem:[#allocation21_spill] sm:$0xff]  ;;  %v6541_v2 = vld [vmem:[#allocation20_spill] sm:$0xff] }
  0xcb   :  { %v870_v11 = vmul.f32 %v3775_v30, %v3757_v40  ;;  %v871_v36 = vmul.f32 %v3775_v30, %v3759_v26  ;;  %v872_v4 = vmul.f32 %v3775_v30, %v3761_v62  ;;  %v873_v33 = vmul.f32 %v3775_v30, %v3763_v55 }
  0xcc   :  { %v874_v13 = vmul.f32 %v3775_v30, %v3783_v22  ;;  %v875_v29 = vmul.f32 %v3775_v30, %v6536_v44  ;;  %v876_v17 = vmul.f32 %v3775_v30, %v6537_v38  ;;  %v877_v54 = vmul.f32 %v3775_v30, %v6538_v48 }
  0xcd   :  { %v878_v28 = vmul.f32 %v3775_v30, %v6539_v58  ;;  %v879_v10 = vmul.f32 %v3775_v30, %v6540_v14  ;;  %v880_v46 = vmul.f32 %v3775_v30, %v6541_v2  ;;  %v881_v59 = vmul.f32 %v3775_v30, %v6542_v1 }
  0xce   :  { %v882_v9 = vmul.f32 %v3775_v30, %v6543_v12  ;;  %v883_v39 = vmul.f32 %v3775_v30, %v3866_v35  ;;  %v884_v27 = vmul.f32 %v3775_v30, %v3904_v53  ;;  %v885_v31 = vmul.f32 %v3775_v30, %v3906_v52  ;;  %v6544_v30 = vld [vmem:[#allocation17_spill] sm:$0xff] }
  0xcf   :  { %v886_v60 = vadd.f32 %v868_v56, %v846_v18  ;;  %v887_v23 = vadd.f32 %v869_v42, %v847_v5  ;;  %v888_v32 = vadd.f32 %v870_v11, %v848_v43  ;;  %v889_v34 = vadd.f32 %v871_v36, %v849_v24  ;;  %v6552_v56 = vld [vmem:[#allocation32_spill] sm:$0xff] }
  0xd0   :  { %v890_v16 = vadd.f32 %v872_v4, %v850_v20  ;;  %v891_v25 = vadd.f32 %v873_v33, %v851_v49  ;;  %v892_v51 = vadd.f32 %v874_v13, %v852_v37  ;;  %v893_v45 = vadd.f32 %v875_v29, %v853_v19  ;;  %v6549_v20 = vld [vmem:[#allocation20_spill] sm:$0xff]  ;;  %v6550_v37 = vld [vmem:[#allocation31_spill] sm:$0xff] }
  0xd1   :  { %v894_v6 = vadd.f32 %v876_v17, %v854_v57  ;;  %v895_v47 = vadd.f32 %v877_v54, %v855_v41  ;;  %v896_v63 = vadd.f32 %v878_v28, %v856_v21  ;;  %v897_v12 = vadd.f32 %v879_v10, %v857_v50  ;;  %v3944_v21 = vld [vmem:[#allocation2 + $0xb2] sm:$0xff]  ;;  %v6551_v57 = vld [vmem:[#allocation25_spill] sm:$0xff] }
  0xd2   :  { %v898_v1 = vadd.f32 %v880_v46, %v858_v3  ;;  %v899_v35 = vadd.f32 %v881_v59, %v859_v61  ;;  %v900_v2 = vadd.f32 %v882_v9, %v860_v15  ;;  %v901_v14 = vadd.f32 %v883_v39, %v861_v8  ;;  %6545 = vst [vmem:[#allocation21_spill] sm:$0xff] %v3944_v21  ;;  %v3946_v3 = vld [vmem:[#allocation2 + $0xba] sm:$0x1]  ;;  %v6547_v15 = vld [vmem:[#allocation27_spill] sm:$0xff]  ;;  %v6548_v61 = vld [vmem:[#allocation22_spill] sm:$0xff] }
  0xd3   :  { %v902_v53 = vadd.f32 %v884_v27, %v862_v7  ;;  %v903_v58 = vadd.f32 %v885_v31, %v863_v0  ;;  %v908_v18 = vmul.f32 %v6544_v30, %v3757_v40  ;;  %v909_v5 = vmul.f32 %v6544_v30, %v3759_v26  ;;  %6546 = vst [vmem:[#allocation33_spill] sm:$0xff] %v3946_v3  ;;  %v6553_v11 = vld [vmem:[#allocation12_spill] sm:$0xff] }
  0xd4   :  { %v910_v43 = vmul.f32 %v6544_v30, %v3761_v62  ;;  %v911_v24 = vmul.f32 %v6544_v30, %v3763_v55  ;;  %v912_v8 = vmul.f32 %v6544_v30, %v3783_v22  ;;  %v913_v0 = vmul.f32 %v6544_v30, %v6536_v44 }
  0xd5   :  { %v914_v40 = vmul.f32 %v6544_v30, %v6537_v38  ;;  %v915_v26 = vmul.f32 %v6544_v30, %v6538_v48  ;;  %v916_v50 = vmul.f32 %v6544_v30, %v6547_v15  ;;  %v917_v7 = vmul.f32 %v6544_v30, %v6548_v61 }
  0xd6   :  { %v918_v49 = vmul.f32 %v6544_v30, %v6549_v20  ;;  %v919_v19 = vmul.f32 %v6544_v30, %v6550_v37  ;;  %v920_v41 = vmul.f32 %v6544_v30, %v6551_v57  ;;  %v921_v42 = vmul.f32 %v6544_v30, %v6552_v56 }
  0xd7   :  { %v922_v36 = vmul.f32 %v6544_v30, %v6553_v11  ;;  %v923_v4 = vmul.f32 %v6544_v30, %v3906_v52  ;;  %v924_v33 = vmul.f32 %v6544_v30, %v3944_v21  ;;  %v925_v13 = vmul.f32 %v6544_v30, %v3946_v3  ;;  %v6554_v30 = vld [vmem:[#allocation23_spill] sm:$0xff] }
  0xd8   :  { %v926_v29 = vadd.f32 %v908_v18, %v886_v60  ;;  %v927_v17 = vadd.f32 %v909_v5, %v887_v23  ;;  %v928_v54 = vadd.f32 %v910_v43, %v888_v32  ;;  %v929_v28 = vadd.f32 %v911_v24, %v889_v34  ;;  %v6562_v18 = vld [vmem:[#allocation30_spill] sm:$0xff] }
  0xd9   :  { %v930_v10 = vadd.f32 %v912_v8, %v890_v16  ;;  %v931_v46 = vadd.f32 %v913_v0, %v891_v25  ;;  %v932_v59 = vadd.f32 %v914_v40, %v892_v51  ;;  %v933_v9 = vadd.f32 %v915_v26, %v893_v45  ;;  %v3984_v16 = vld [vmem:[#allocation2 + $0xc2] sm:$0xff]  ;;  %v6560_v45 = vld [vmem:[#allocation32_spill] sm:$0xff] }
  0xda   :  { %v934_v39 = vadd.f32 %v916_v50, %v894_v6  ;;  %v935_v27 = vadd.f32 %v917_v7, %v895_v47  ;;  %v936_v31 = vadd.f32 %v918_v49, %v896_v63  ;;  %v937_v11 = vadd.f32 %v919_v19, %v897_v12  ;;  %6555 = vst [vmem:[#allocation29_spill] sm:$0xff] %v3984_v16  ;;  %v6559_v25 = vld [vmem:[#allocation25_spill] sm:$0xff]  ;;  %v6561_v47 = vld [vmem:[#allocation12_spill] sm:$0xff] }
  0xdb   :  { %v938_v56 = vadd.f32 %v920_v41, %v898_v1  ;;  %v939_v52 = vadd.f32 %v921_v42, %v899_v35  ;;  %v940_v57 = vadd.f32 %v922_v36, %v900_v2  ;;  %v941_v37 = vadd.f32 %v923_v4, %v901_v14  ;;  %v3986_v1 = vld [vmem:[#allocation2 + $0xca] sm:$0x1]  ;;  %v6558_v2 = vld [vmem:[#allocation31_spill] sm:$0xff]  ;;  %v6563_v43 = vld [vmem:[#allocation21_spill] sm:$0xff] }
  0xdc   :  { %v942_v21 = vadd.f32 %v924_v33, %v902_v53  ;;  %v943_v20 = vadd.f32 %v925_v13, %v903_v58  ;;  %v948_v60 = vmul.f32 %v6554_v30, %v3761_v62  ;;  %v949_v23 = vmul.f32 %v6554_v30, %v3763_v55  ;;  %6556 = vst [vmem:[#allocation17_spill] sm:$0xff] %v3986_v1  ;;  %v6557_v58 = vld [vmem:[#allocation20_spill] sm:$0xff] }
  0xdd   :  { %v950_v32 = vmul.f32 %v6554_v30, %v3783_v22  ;;  %v951_v34 = vmul.f32 %v6554_v30, %v6536_v44  ;;  %v952_v35 = vmul.f32 %v6554_v30, %v6537_v38  ;;  %v953_v53 = vmul.f32 %v6554_v30, %v6538_v48 }
  0xde   :  { %v954_v62 = vmul.f32 %v6554_v30, %v6547_v15  ;;  %v955_v55 = vmul.f32 %v6554_v30, %v6548_v61  ;;  %v956_v14 = vmul.f32 %v6554_v30, %v6557_v58  ;;  %v957_v12 = vmul.f32 %v6554_v30, %v6558_v2 }
  0xdf   :  { %v958_v51 = vmul.f32 %v6554_v30, %v6559_v25  ;;  %v959_v6 = vmul.f32 %v6554_v30, %v6560_v45  ;;  %v960_v63 = vmul.f32 %v6554_v30, %v6561_v47  ;;  %v961_v5 = vmul.f32 %v6554_v30, %v6562_v18 }
  0xe0   :  { %v962_v24 = vmul.f32 %v6554_v30, %v6563_v43  ;;  %v963_v8 = vmul.f32 %v6554_v30, %v3946_v3  ;;  %v964_v0 = vmul.f32 %v6554_v30, %v3984_v16  ;;  %v965_v40 = vmul.f32 %v6554_v30, %v3986_v1  ;;  %v6564_v30 = vld [vmem:[#allocation28_spill] sm:$0xff] }
  0xe1   :  { %v966_v26 = vadd.f32 %v948_v60, %v926_v29  ;;  %v967_v50 = vadd.f32 %v949_v23, %v927_v17  ;;  %v968_v7 = vadd.f32 %v950_v32, %v928_v54  ;;  %v969_v49 = vadd.f32 %v951_v34, %v929_v28  ;;  %v6572_v60 = vld [vmem:[#allocation33_spill] sm:$0xff] }
  0xe2   :  { %v970_v19 = vadd.f32 %v952_v35, %v930_v10  ;;  %v971_v41 = vadd.f32 %v953_v53, %v931_v46  ;;  %v972_v42 = vadd.f32 %v954_v62, %v932_v59  ;;  %v973_v36 = vadd.f32 %v955_v55, %v933_v9  ;;  %v4024_v10 = vld [vmem:[#allocation2 + $0xd2] sm:$0xff]  ;;  %v6570_v9 = vld [vmem:[#allocation30_spill] sm:$0xff]  ;;  %v6573_v32 = vld [vmem:[#allocation29_spill] sm:$0xff] }
  0xe3   :  { %v974_v4 = vadd.f32 %v956_v14, %v934_v39  ;;  %v975_v33 = vadd.f32 %v957_v12, %v935_v27  ;;  %v976_v13 = vadd.f32 %v958_v51, %v936_v31  ;;  %v977_v43 = vadd.f32 %v959_v6, %v937_v11  ;;  %6565 = vst [vmem:[#allocation27_spill] sm:$0xff] %v4024_v10  ;;  %v6569_v46 = vld [vmem:[#allocation12_spill] sm:$0xff]  ;;  %v6571_v27 = vld [vmem:[#allocation21_spill] sm:$0xff] }
  0xe4   :  { %v978_v18 = vadd.f32 %v960_v63, %v938_v56  ;;  %v979_v3 = vadd.f32 %v961_v5, %v939_v52  ;;  %v980_v47 = vadd.f32 %v962_v24, %v940_v57  ;;  %v981_v45 = vadd.f32 %v963_v8, %v941_v37  ;;  %v4026_v56 = vld [vmem:[#allocation2 + $0xda] sm:$0x1] }
  0xe5   :  { %v982_v16 = vadd.f32 %v964_v0, %v942_v21  ;;  %v983_v25 = vadd.f32 %v965_v40, %v943_v20  ;;  %v988_v29 = vmul.f32 %v6564_v30, %v3783_v22  ;;  %v989_v17 = vmul.f32 %v6564_v30, %v6536_v44  ;;  %6566 = vst [vmem:[#allocation22_spill] sm:$0xff] %v4026_v56  ;;  %v6567_v20 = vld [vmem:[#allocation25_spill] sm:$0xff]  ;;  %v6568_v57 = vld [vmem:[#allocation32_spill] sm:$0xff] }
  0xe6   :  { %v990_v54 = vmul.f32 %v6564_v30, %v6537_v38  ;;  %v991_v28 = vmul.f32 %v6564_v30, %v6538_v48  ;;  %v992_v52 = vmul.f32 %v6564_v30, %v6547_v15  ;;  %v993_v21 = vmul.f32 %v6564_v30, %v6548_v61 }
  0xe7   :  { %v994_v22 = vmul.f32 %v6564_v30, %v6557_v58  ;;  %v995_v44 = vmul.f32 %v6564_v30, %v6558_v2  ;;  %v996_v37 = vmul.f32 %v6564_v30, %v6567_v20  ;;  %v997_v11 = vmul.f32 %v6564_v30, %v6568_v57 }
  0xe8   :  { %v998_v59 = vmul.f32 %v6564_v30, %v6569_v46  ;;  %v999_v39 = vmul.f32 %v6564_v30, %v6570_v9  ;;  %v1000_v31 = vmul.f32 %v6564_v30, %v6571_v27  ;;  %v1001_v23 = vmul.f32 %v6564_v30, %v6572_v60 }
  0xe9   :  { %v1002_v34 = vmul.f32 %v6564_v30, %v6573_v32  ;;  %v1003_v35 = vmul.f32 %v6564_v30, %v3986_v1  ;;  %v1004_v53 = vmul.f32 %v6564_v30, %v4024_v10  ;;  %v1005_v62 = vmul.f32 %v6564_v30, %v4026_v56  ;;  %v6574_v30 = vld [vmem:[#allocation36_spill] sm:$0xff] }
  0xea   :  { %v1006_v55 = vadd.f32 %v988_v29, %v966_v26  ;;  %v1007_v14 = vadd.f32 %v989_v17, %v967_v50  ;;  %v1008_v12 = vadd.f32 %v990_v54, %v968_v7  ;;  %v1009_v51 = vadd.f32 %v991_v28, %v969_v49  ;;  %v6580_v29 = vld [vmem:[#allocation17_spill] sm:$0xff]  ;;  %v6581_v54 = vld [vmem:[#allocation27_spill] sm:$0xff] }
  0xeb   :  { %v1010_v6 = vadd.f32 %v992_v52, %v970_v19  ;;  %v1011_v63 = vadd.f32 %v993_v21, %v971_v41  ;;  %v1012_v5 = vadd.f32 %v994_v22, %v972_v42  ;;  %v1013_v24 = vadd.f32 %v995_v44, %v973_v36  ;;  %v780_v19 = vld [vmem:[#allocation2 + $0xe2] sm:$0xff] }
  0xec   :  { %v1014_v8 = vadd.f32 %v996_v37, %v974_v4  ;;  %v1015_v0 = vadd.f32 %v997_v11, %v975_v33  ;;  %v1016_v40 = vadd.f32 %v998_v59, %v976_v13  ;;  %v1017_v32 = vadd.f32 %v999_v39, %v977_v43  ;;  %v781_v43 = vld [vmem:[#allocation2 + $0xea] sm:$0x1]  ;;  %v6577_v41 = vld [vmem:[#allocation21_spill] sm:$0xff] }
  0xed   :  { %v1018_v60 = vadd.f32 %v1000_v31, %v978_v18  ;;  %v1019_v1 = vadd.f32 %v1001_v23, %v979_v3  ;;  %v1020_v27 = vadd.f32 %v1002_v34, %v980_v47  ;;  %v1021_v9 = vadd.f32 %v1003_v35, %v981_v45  ;;  %v6576_v47 = vld [vmem:[#allocation30_spill] sm:$0xff]  ;;  %v6578_v36 = vld [vmem:[#allocation33_spill] sm:$0xff] }
  0xee   :  { %v1022_v10 = vadd.f32 %v1004_v53, %v982_v16  ;;  %v1023_v46 = vadd.f32 %v1005_v62, %v983_v25  ;;  %v1028_v26 = vmul.f32 %v6574_v30, %v6537_v38  ;;  %v1029_v50 = vmul.f32 %v6574_v30, %v6538_v48  ;;  %v6575_v25 = vld [vmem:[#allocation12_spill] sm:$0xff]  ;;  %v6579_v33 = vld [vmem:[#allocation29_spill] sm:$0xff] }
  0xef   :  { %v1030_v7 = vmul.f32 %v6574_v30, %v6547_v15  ;;  %v1031_v49 = vmul.f32 %v6574_v30, %v6548_v61  ;;  %v1032_v3 = vmul.f32 %v6574_v30, %v6557_v58  ;;  %v1033_v16 = vmul.f32 %v6574_v30, %v6558_v2 }
  0xf0   :  { %v1034_v38 = vmul.f32 %v6574_v30, %v6567_v20  ;;  %v1035_v48 = vmul.f32 %v6574_v30, %v6568_v57  ;;  %v1036_v45 = vmul.f32 %v6574_v30, %v6575_v25  ;;  %v1037_v18 = vmul.f32 %v6574_v30, %v6576_v47 }
  0xf1   :  { %v1038_v42 = vmul.f32 %v6574_v30, %v6577_v41  ;;  %v1039_v4 = vmul.f32 %v6574_v30, %v6578_v36  ;;  %v1040_v13 = vmul.f32 %v6574_v30, %v6579_v33  ;;  %v1041_v17 = vmul.f32 %v6574_v30, %v6580_v29 }
  0xf2   :  { %v1042_v28 = vmul.f32 %v6574_v30, %v6581_v54  ;;  %v1043_v52 = vmul.f32 %v6574_v30, %v4026_v56  ;;  %v1044_v21 = vmul.f32 %v6574_v30, %v780_v19  ;;  %v1045_v22 = vmul.f32 %v6574_v30, %v781_v43  ;;  %v6582_v30 = vld [vmem:[#allocation26_spill] sm:$0xff] }
  0xf3   :  { %v1046_v44 = vadd.f32 %v1028_v26, %v1006_v55  ;;  %v1047_v37 = vadd.f32 %v1029_v50, %v1007_v14  ;;  %v1048_v11 = vadd.f32 %v1030_v7, %v1008_v12  ;;  %v1049_v59 = vadd.f32 %v1031_v49, %v1009_v51 }
  0xf4   :  { %v1050_v39 = vadd.f32 %v1032_v3, %v1010_v6  ;;  %v1051_v31 = vadd.f32 %v1033_v16, %v1011_v63  ;;  %v1052_v23 = vadd.f32 %v1034_v38, %v1012_v5  ;;  %v1053_v34 = vadd.f32 %v1035_v48, %v1013_v24  ;;  %v782_v6 = vld [vmem:[#allocation2 + $0xf2] sm:$0xff]  ;;  %v6587_v5 = vld [vmem:[#allocation17_spill] sm:$0xff] }
  0xf5   :  { %v1054_v35 = vadd.f32 %v1036_v45, %v1014_v8  ;;  %v1055_v53 = vadd.f32 %v1037_v18, %v1015_v0  ;;  %v1056_v62 = vadd.f32 %v1038_v42, %v1016_v40  ;;  %v1057_v29 = vadd.f32 %v1039_v4, %v1017_v32  ;;  %v783_v32 = vld [vmem:[#allocation2 + $0xfa] sm:$0x1]  ;;  %v6588_v24 = vld [vmem:[#allocation27_spill] sm:$0xff]  ;;  %v6589_v8 = vld [vmem:[#allocation22_spill] sm:$0xff] }
  0xf6   :  { %v1058_v54 = vadd.f32 %v1040_v13, %v1018_v60  ;;  %v1059_v33 = vadd.f32 %v1041_v17, %v1019_v1  ;;  %v1060_v36 = vadd.f32 %v1042_v28, %v1020_v27  ;;  %v1061_v56 = vadd.f32 %v1043_v52, %v1021_v9  ;;  %v6584_v9 = vld [vmem:[#allocation21_spill] sm:$0xff]  ;;  %v1105_v52 = vld [vmem:[#allocation2 + $0xb] sm:$0x1] }
  0xf7   :  { %v1062_v41 = vadd.f32 %v1044_v21, %v1022_v10  ;;  %v1063_v47 = vadd.f32 %v1045_v22, %v1023_v46  ;;  %v1068_v55 = vmul.f32 %v6582_v30, %v6547_v15  ;;  %v1069_v14 = vmul.f32 %v6582_v30, %v6548_v61  ;;  %v6583_v46 = vld [vmem:[#allocation30_spill] sm:$0xff]  ;;  %v6585_v27 = vld [vmem:[#allocation33_spill] sm:$0xff]  ;;  %v4124_v21 = vld [vmem:[#allocation2 + $0x1b] sm:$0x1] }
  0xf8   :  { %v1070_v12 = vmul.f32 %v6582_v30, %v6557_v58  ;;  %v1071_v51 = vmul.f32 %v6582_v30, %v6558_v2  ;;  %v1072_v1 = vmul.f32 %v6582_v30, %v6567_v20  ;;  %v1073_v10 = vmul.f32 %v6582_v30, %v6568_v57  ;;  %v6586_v60 = vld [vmem:[#allocation29_spill] sm:$0xff]  ;;  %v6590_v22 = vld [vmem:[#allocation18_spill] sm:$0xff] }
  0xf9   :  { %v1074_v15 = vmul.f32 %v6582_v30, %v6575_v25  ;;  %v1075_v61 = vmul.f32 %v6582_v30, %v6583_v46  ;;  %v1076_v58 = vmul.f32 %v6582_v30, %v6584_v9  ;;  %v1077_v2 = vmul.f32 %v6582_v30, %v6585_v27  ;;  %v1104_v13 = vld [vmem:[#allocation2 + $0x3] sm:$0xff]  ;;  %v6607_v46 = vld [vmem:[#allocation19_spill] sm:$0xff]  ;;  %v4174_v9 = vld [vmem:[#allocation2 + $0x6b] sm:$0x1] }
  0xfa   :  { %v1078_v63 = vmul.f32 %v6582_v30, %v6586_v60  ;;  %v1079_v20 = vmul.f32 %v6582_v30, %v6587_v5  ;;  %v1080_v57 = vmul.f32 %v6582_v30, %v6588_v24  ;;  %v1081_v0 = vmul.f32 %v6582_v30, %v6589_v8  ;;  %6609 = vst [vmem:[#allocation21_spill] sm:$0xff] %v4174_v9  ;;  %v4178_v27 = vld [vmem:[#allocation2 + $0x7b] sm:$0x1]  ;;  %v4184_v24 = vld [vmem:[#allocation2 + $0x8b] sm:$0x1] }
  0xfb   :  { %v1082_v40 = vmul.f32 %v6582_v30, %v780_v19  ;;  %v1083_v26 = vmul.f32 %v6582_v30, %v781_v43  ;;  %v1084_v50 = vmul.f32 %v6582_v30, %v782_v6  ;;  %v1085_v7 = vmul.f32 %v6582_v30, %v783_v32  ;;  %v4122_v43 = vld [vmem:[#allocation2 + $0x13] sm:$0xff]  ;;  %v6593_v30 = vld [vmem:[#allocation14_spill] sm:$0xff]  ;;  %6611 = vst [vmem:[#allocation29_spill] sm:$0xff] %v4178_v27 }
  0xfc   :  { %v1086_v49 = vadd.f32 %v1068_v55, %v1046_v44  ;;  %v1087_v3 = vadd.f32 %v1069_v14, %v1047_v37  ;;  %v1088_v16 = vadd.f32 %v1070_v12, %v1048_v11  ;;  %v1089_v38 = vadd.f32 %v1071_v51, %v1049_v59  ;;  %v6591_v44 = vld [vmem:[#allocation13_spill] sm:$0xff]  ;;  %v4152_v14 = vld [vmem:[#allocation2 + $0x53] sm:$0xff]  ;;  %v6601_v51 = vld [vmem:[#allocation34_spill] sm:$0xff]  ;;  %6613 = vst [vmem:[#allocation27_spill] sm:$0xff] %v4184_v24 }
  0xfd   :  { %v1090_v48 = vadd.f32 %v1072_v1, %v1050_v39  ;;  %v1091_v25 = vadd.f32 %v1073_v10, %v1051_v31  ;;  %v1092_v45 = vadd.f32 %v1074_v15, %v1052_v23  ;;  %v1093_v18 = vadd.f32 %v1075_v61, %v1053_v34  ;;  %v4128_v23 = vld [vmem:[#allocation2 + $0x23] sm:$0xff]  ;;  %v4130_v34 = vld [vmem:[#allocation2 + $0x2b] sm:$0x1]  ;;  %6598 = vst [vmem:[#allocation28_spill] sm:$0xff] %v4152_v14  ;;  %v6603_v32 = vld [vmem:[#allocation35_spill] sm:$0xff] }
  0xfe   :  { %v1094_v42 = vadd.f32 %v1076_v58, %v1054_v35  ;;  %v1095_v4 = vadd.f32 %v1077_v2, %v1055_v53  ;;  %v1096_v17 = vadd.f32 %v1078_v63, %v1056_v62  ;;  %v1097_v28 = vadd.f32 %v1079_v20, %v1057_v29  ;;  %v4132_v35 = vld [vmem:[#allocation2 + $0x33] sm:$0xff]  ;;  %v4136_v53 = vld [vmem:[#allocation2 + $0x43] sm:$0xff]  ;;  %v4138_v62 = vld [vmem:[#allocation2 + $0x4b] sm:$0x1] }
  0xff   :  { %v1098_v19 = vadd.f32 %v1080_v57, %v1058_v54  ;;  %v1139_v37 = vrot.slane %v6591_v44, %v6590_v22  ;;  %v1099_v11 = vadd.f32 %v1081_v0, %v1059_v33  ;;  %v1100_v59 = vadd.f32 %v1082_v40, %v1060_v36  ;;  %v4134_v54 = vld [vmem:[#allocation2 + $0x3b] sm:$0x1]  ;;  %6592 = vst [vmem:[#allocation23_spill] sm:$0xff] %v4138_v62  ;;  %v4156_v12 = vld [vmem:[#allocation2 + $0x63] sm:$0xff]  ;;  %v4176_v58 = vld [vmem:[#allocation2 + $0x73] sm:$0xff] }
 0x100   :  { %v1101_v39 = vadd.f32 %v1083_v26, %v1061_v56  ;;  %v1102_v31 = vadd.f32 %v1084_v50, %v1062_v41  ;;  %v1103_v29 = vadd.f32 %v1085_v7, %v1063_v47  ;;  %v4142_v55 = vrot.slane %v6593_v30, %v6590_v22  ;;  %v6594_v56 = vld [vmem:[#allocation15_spill] sm:$0xff]  ;;  %v6596_v36 = vld [vmem:[#allocation16_spill] sm:$0xff]  ;;  %6600 = vst [vmem:[#allocation32_spill] sm:$0xff] %v4156_v12  ;;  %v4182_v20 = vld [vmem:[#allocation2 + $0x83] sm:$0xff] }
 0x101   :  { %v4146_v41 = vrot.slane %v6594_v56, %v6590_v22  ;;  %v4150_v33 = vrot.slane %v6596_v36, %v6590_v22  ;;  %v4154_v47 = vld [vmem:[#allocation2 + $0x5b] sm:$0x1]  ;;  %v4160_v6 = vrot.slane %v6601_v51, %v6590_v22  ;;  %v4164_v1 = vrot.slane %v6603_v32, %v6590_v22  ;;  %6610 = vst [vmem:[#allocation33_spill] sm:$0xff] %v4176_v58 }
 0x102   :  { %6599 = vst [vmem:[#allocation25_spill] sm:$0xff] %v4154_v47  ;;  %v6605_v10 = vld [vmem:[#allocation24_spill] sm:$0xff]  ;;  %v4172_v61 = vrot.slane %v6607_v46, %v6590_v22  ;;  %v1140_v2 = vmul.f32 %v1139_v37, %v1104_v13  ;;  %v1141_v60 = vmul.f32 %v1139_v37, %v1105_v52  ;;  %v1142_v63 = vmul.f32 %v1139_v37, %v4122_v43 }
 0x103   :  { %6595 = vst [vmem:[#allocation20_spill] sm:$0xff] %v4146_v41  ;;  %6597 = vst [vmem:[#allocation31_spill] sm:$0xff] %v4150_v33  ;;  %v4168_v15 = vrot.slane %v6605_v10, %v6590_v22  ;;  %v1143_v5 = vmul.f32 %v1139_v37, %v4124_v21  ;;  %v1144_v57 = vmul.f32 %v1139_v37, %v4128_v23 }
 0x104   :  { %6602 = vst [vmem:[#allocation36_spill] sm:$0xff] %v4160_v6  ;;  %6604 = vst [vmem:[#allocation12_spill] sm:$0xff] %v4164_v1  ;;  %v1145_v8 = vmul.f32 %v1139_v37, %v4130_v34  ;;  %v1146_v0 = vmul.f32 %v1139_v37, %v4132_v35  ;;  %v1147_v40 = vmul.f32 %v1139_v37, %v4134_v54 }
 0x105   :  { %6606 = vst [vmem:[#allocation26_spill] sm:$0xff] %v4168_v15  ;;  %6608 = vst [vmem:[#allocation30_spill] sm:$0xff] %v4172_v61  ;;  %v1148_v26 = vmul.f32 %v1139_v37, %v4136_v53  ;;  %v1149_v50 = vmul.f32 %v1139_v37, %v4138_v62  ;;  %v1150_v7 = vmul.f32 %v1139_v37, %v4152_v14 }
 0x106   :  { %6612 = vst [vmem:[#allocation17_spill] sm:$0xff] %v4182_v20  ;;  %v1151_v13 = vmul.f32 %v1139_v37, %v4154_v47  ;;  %v1152_v52 = vmul.f32 %v1139_v37, %v4156_v12  ;;  %v1153_v22 = vmul.f32 %v1139_v37, %v4174_v9  ;;  %v1154_v44 = vmul.f32 %v1139_v37, %v4176_v58 }
 0x107   :  { %v1155_v30 = vmul.f32 %v1139_v37, %v4178_v27  ;;  %v1156_v56 = vmul.f32 %v1139_v37, %v4182_v20  ;;  %v1157_v36 = vmul.f32 %v1139_v37, %v4184_v24  ;;  %v1158_v51 = vadd.f32 %v1140_v2, %v1086_v49  ;;  %v6619_v37 = vld [vmem:[#allocation32_spill] sm:$0xff]  ;;  %v6622_v2 = vld [vmem:[#allocation29_spill] sm:$0xff] }
 0x108   :  { %v1159_v32 = vadd.f32 %v1141_v60, %v1087_v3  ;;  %v1160_v10 = vadd.f32 %v1142_v63, %v1088_v16  ;;  %v1161_v46 = vadd.f32 %v1143_v5, %v1089_v38  ;;  %v1162_v61 = vadd.f32 %v1144_v57, %v1090_v48  ;;  %v4208_v48 = vld [vmem:[#allocation2 + $0x93] sm:$0xff] }
 0x109   :  { %v1163_v15 = vadd.f32 %v1145_v8, %v1091_v25  ;;  %v1164_v1 = vadd.f32 %v1146_v0, %v1092_v45  ;;  %v1165_v6 = vadd.f32 %v1147_v40, %v1093_v18  ;;  %v1166_v33 = vadd.f32 %v1148_v26, %v1094_v42  ;;  %6614 = vst [vmem:[#allocation22_spill] sm:$0xff] %v4208_v48  ;;  %v4210_v25 = vld [vmem:[#allocation2 + $0x9b] sm:$0x1] }
 0x10a   :  { %v1167_v41 = vadd.f32 %v1149_v50, %v1095_v4  ;;  %v1168_v12 = vadd.f32 %v1150_v7, %v1096_v17  ;;  %v1169_v9 = vadd.f32 %v1151_v13, %v1097_v28  ;;  %v1170_v47 = vadd.f32 %v1152_v52, %v1098_v19  ;;  %6615 = vst [vmem:[#allocation18_spill] sm:$0xff] %v4210_v25  ;;  %v6616_v4 = vld [vmem:[#allocation23_spill] sm:$0xff]  ;;  %v6617_v28 = vld [vmem:[#allocation28_spill] sm:$0xff] }
 0x10b   :  { %v1171_v58 = vadd.f32 %v1153_v22, %v1099_v11  ;;  %v1172_v14 = vadd.f32 %v1154_v44, %v1100_v59  ;;  %v1173_v27 = vadd.f32 %v1155_v30, %v1101_v39  ;;  %v1174_v62 = vadd.f32 %v1156_v56, %v1102_v31  ;;  %v6620_v59 = vld [vmem:[#allocation21_spill] sm:$0xff] }
 0x10c   :  { %v1175_v20 = vadd.f32 %v1157_v36, %v1103_v29  ;;  %v1180_v49 = vmul.f32 %v4142_v55, %v4122_v43  ;;  %v1181_v3 = vmul.f32 %v4142_v55, %v4124_v21  ;;  %v1182_v16 = vmul.f32 %v4142_v55, %v4128_v23  ;;  %v6618_v43 = vld [vmem:[#allocation25_spill] sm:$0xff] }
 0x10d   :  { %v1183_v38 = vmul.f32 %v4142_v55, %v4130_v34  ;;  %v1184_v45 = vmul.f32 %v4142_v55, %v4132_v35  ;;  %v1185_v18 = vmul.f32 %v4142_v55, %v4134_v54  ;;  %v1186_v42 = vmul.f32 %v4142_v55, %v4136_v53  ;;  %v6621_v31 = vld [vmem:[#allocation33_spill] sm:$0xff] }
 0x10e   :  { %v1187_v17 = vmul.f32 %v4142_v55, %v6616_v4  ;;  %v1188_v19 = vmul.f32 %v4142_v55, %v6617_v28  ;;  %v1189_v21 = vmul.f32 %v4142_v55, %v6618_v43  ;;  %v1190_v11 = vmul.f32 %v4142_v55, %v6619_v37  ;;  %v6623_v63 = vld [vmem:[#allocation17_spill] sm:$0xff] }
 0x10f   :  { %v1191_v39 = vmul.f32 %v4142_v55, %v6620_v59  ;;  %v1192_v29 = vmul.f32 %v4142_v55, %v6621_v31  ;;  %v1193_v60 = vmul.f32 %v4142_v55, %v6622_v2  ;;  %v1194_v5 = vmul.f32 %v4142_v55, %v6623_v63 }
 0x110   :  { %v1195_v57 = vmul.f32 %v4142_v55, %v4184_v24  ;;  %v1196_v8 = vmul.f32 %v4142_v55, %v4208_v48  ;;  %v1197_v0 = vmul.f32 %v4142_v55, %v4210_v25  ;;  %v1198_v40 = vadd.f32 %v1180_v49, %v1158_v51  ;;  %v6624_v55 = vld [vmem:[#allocation20_spill] sm:$0xff]  ;;  %v6632_v49 = vld [vmem:[#allocation27_spill] sm:$0xff] }
 0x111   :  { %v1199_v26 = vadd.f32 %v1181_v3, %v1159_v32  ;;  %v1200_v50 = vadd.f32 %v1182_v16, %v1160_v10  ;;  %v1201_v7 = vadd.f32 %v1183_v38, %v1161_v46  ;;  %v1202_v13 = vadd.f32 %v1184_v45, %v1162_v61  ;;  %v6631_v10 = vld [vmem:[#allocation17_spill] sm:$0xff]  ;;  %v6633_v16 = vld [vmem:[#allocation22_spill] sm:$0xff] }
 0x112   :  { %v1203_v52 = vadd.f32 %v1185_v18, %v1163_v15  ;;  %v1204_v22 = vadd.f32 %v1186_v42, %v1164_v1  ;;  %v1205_v44 = vadd.f32 %v1187_v17, %v1165_v6  ;;  %v1206_v30 = vadd.f32 %v1188_v19, %v1166_v33  ;;  %v4248_v33 = vld [vmem:[#allocation2 + $0xa3] sm:$0xff] }
 0x113   :  { %v1207_v56 = vadd.f32 %v1189_v21, %v1167_v41  ;;  %v1208_v36 = vadd.f32 %v1190_v11, %v1168_v12  ;;  %v1209_v63 = vadd.f32 %v1191_v39, %v1169_v9  ;;  %v1210_v2 = vadd.f32 %v1192_v29, %v1170_v47  ;;  %6625 = vst [vmem:[#allocation13_spill] sm:$0xff] %v4248_v33  ;;  %v4250_v47 = vld [vmem:[#allocation2 + $0xab] sm:$0x1]  ;;  %v6627_v12 = vld [vmem:[#allocation32_spill] sm:$0xff]  ;;  %v6628_v15 = vld [vmem:[#allocation21_spill] sm:$0xff] }
 0x114   :  { %v1211_v24 = vadd.f32 %v1193_v60, %v1171_v58  ;;  %v1212_v31 = vadd.f32 %v1194_v5, %v1172_v14  ;;  %v1213_v59 = vadd.f32 %v1195_v57, %v1173_v27  ;;  %v1214_v48 = vadd.f32 %v1196_v8, %v1174_v62  ;;  %6626 = vst [vmem:[#allocation14_spill] sm:$0xff] %v4250_v47  ;;  %v6629_v9 = vld [vmem:[#allocation33_spill] sm:$0xff] }
 0x115   :  { %v1215_v37 = vadd.f32 %v1197_v0, %v1175_v20  ;;  %v1220_v51 = vmul.f32 %v6624_v55, %v4128_v23  ;;  %v1221_v32 = vmul.f32 %v6624_v55, %v4130_v34  ;;  %v1222_v1 = vmul.f32 %v6624_v55, %v4132_v35  ;;  %v6630_v27 = vld [vmem:[#allocation29_spill] sm:$0xff] }
 0x116   :  { %v1223_v41 = vmul.f32 %v6624_v55, %v4134_v54  ;;  %v1224_v62 = vmul.f32 %v6624_v55, %v4136_v53  ;;  %v1225_v14 = vmul.f32 %v6624_v55, %v6616_v4  ;;  %v1226_v23 = vmul.f32 %v6624_v55, %v6617_v28 }
 0x117   :  { %v1227_v34 = vmul.f32 %v6624_v55, %v6618_v43  ;;  %v1228_v6 = vmul.f32 %v6624_v55, %v6627_v12  ;;  %v1229_v61 = vmul.f32 %v6624_v55, %v6628_v15  ;;  %v1230_v58 = vmul.f32 %v6624_v55, %v6629_v9 }
 0x118   :  { %v1231_v20 = vmul.f32 %v6624_v55, %v6630_v27  ;;  %v1232_v46 = vmul.f32 %v6624_v55, %v6631_v10  ;;  %v1233_v3 = vmul.f32 %v6624_v55, %v6632_v49  ;;  %v1234_v38 = vmul.f32 %v6624_v55, %v6633_v16 }
 0x119   :  { %v1235_v45 = vmul.f32 %v6624_v55, %v4210_v25  ;;  %v1236_v18 = vmul.f32 %v6624_v55, %v4248_v33  ;;  %v1237_v42 = vmul.f32 %v6624_v55, %v4250_v47  ;;  %v1238_v17 = vadd.f32 %v1220_v51, %v1198_v40  ;;  %v6634_v55 = vld [vmem:[#allocation31_spill] sm:$0xff]  ;;  %v6642_v51 = vld [vmem:[#allocation18_spill] sm:$0xff] }
 0x11a   :  { %v1239_v19 = vadd.f32 %v1221_v32, %v1199_v26  ;;  %v1240_v21 = vadd.f32 %v1222_v1, %v1200_v50  ;;  %v1241_v11 = vadd.f32 %v1223_v41, %v1201_v7  ;;  %v1242_v39 = vadd.f32 %v1224_v62, %v1202_v13  ;;  %v4288_v13 = vld [vmem:[#allocation2 + $0xb3] sm:$0xff]  ;;  %v6643_v1 = vld [vmem:[#allocation13_spill] sm:$0xff] }
 0x11b   :  { %v1243_v29 = vadd.f32 %v1225_v14, %v1203_v52  ;;  %v1244_v60 = vadd.f32 %v1226_v23, %v1204_v22  ;;  %v1245_v5 = vadd.f32 %v1227_v34, %v1205_v44  ;;  %v1246_v57 = vadd.f32 %v1228_v6, %v1206_v30  ;;  %6635 = vst [vmem:[#allocation15_spill] sm:$0xff] %v4288_v13  ;;  %v6639_v52 = vld [vmem:[#allocation17_spill] sm:$0xff]  ;;  %v6640_v44 = vld [vmem:[#allocation27_spill] sm:$0xff] }
 0x11c   :  { %v1247_v8 = vadd.f32 %v1229_v61, %v1207_v56  ;;  %v1248_v0 = vadd.f32 %v1230_v58, %v1208_v36  ;;  %v1249_v16 = vadd.f32 %v1231_v20, %v1209_v63  ;;  %v1250_v49 = vadd.f32 %v1232_v46, %v1210_v2  ;;  %v4290_v2 = vld [vmem:[#allocation2 + $0xbb] sm:$0x1]  ;;  %v6641_v56 = vld [vmem:[#allocation22_spill] sm:$0xff] }
 0x11d   :  { %v1251_v25 = vadd.f32 %v1233_v3, %v1211_v24  ;;  %v1252_v10 = vadd.f32 %v1234_v38, %v1212_v31  ;;  %v1253_v27 = vadd.f32 %v1235_v45, %v1213_v59  ;;  %v1254_v33 = vadd.f32 %v1236_v18, %v1214_v48  ;;  %6636 = vst [vmem:[#allocation16_spill] sm:$0xff] %v4290_v2  ;;  %v6638_v31 = vld [vmem:[#allocation29_spill] sm:$0xff] }
 0x11e   :  { %v1255_v9 = vadd.f32 %v1237_v42, %v1215_v37  ;;  %v1260_v40 = vmul.f32 %v6634_v55, %v4132_v35  ;;  %v1261_v26 = vmul.f32 %v6634_v55, %v4134_v54  ;;  %v1262_v50 = vmul.f32 %v6634_v55, %v4136_v53  ;;  %v6637_v37 = vld [vmem:[#allocation33_spill] sm:$0xff] }
 0x11f   :  { %v1263_v7 = vmul.f32 %v6634_v55, %v6616_v4  ;;  %v1264_v24 = vmul.f32 %v6634_v55, %v6617_v28  ;;  %v1265_v48 = vmul.f32 %v6634_v55, %v6618_v43  ;;  %v1266_v35 = vmul.f32 %v6634_v55, %v6627_v12 }
 0x120   :  { %v1267_v54 = vmul.f32 %v6634_v55, %v6628_v15  ;;  %v1268_v59 = vmul.f32 %v6634_v55, %v6637_v37  ;;  %v1269_v63 = vmul.f32 %v6634_v55, %v6638_v31  ;;  %v1270_v22 = vmul.f32 %v6634_v55, %v6639_v52 }
 0x121   :  { %v1271_v30 = vmul.f32 %v6634_v55, %v6640_v44  ;;  %v1272_v36 = vmul.f32 %v6634_v55, %v6641_v56  ;;  %v1273_v32 = vmul.f32 %v6634_v55, %v6642_v51  ;;  %v1274_v41 = vmul.f32 %v6634_v55, %v6643_v1 }
 0x122   :  { %v1275_v62 = vmul.f32 %v6634_v55, %v4250_v47  ;;  %v1276_v14 = vmul.f32 %v6634_v55, %v4288_v13  ;;  %v1277_v23 = vmul.f32 %v6634_v55, %v4290_v2  ;;  %v1278_v34 = vadd.f32 %v1260_v40, %v1238_v17  ;;  %v6644_v55 = vld [vmem:[#allocation36_spill] sm:$0xff]  ;;  %v6652_v40 = vld [vmem:[#allocation14_spill] sm:$0xff] }
 0x123   :  { %v1279_v6 = vadd.f32 %v1261_v26, %v1239_v19  ;;  %v1280_v61 = vadd.f32 %v1262_v50, %v1240_v21  ;;  %v1281_v58 = vadd.f32 %v1263_v7, %v1241_v11  ;;  %v1282_v20 = vadd.f32 %v1264_v24, %v1242_v39  ;;  %v4328_v39 = vld [vmem:[#allocation2 + $0xc3] sm:$0xff]  ;;  %v6653_v50 = vld [vmem:[#allocation15_spill] sm:$0xff] }
 0x124   :  { %v1283_v46 = vadd.f32 %v1265_v48, %v1243_v29  ;;  %v1284_v3 = vadd.f32 %v1266_v35, %v1244_v60  ;;  %v1285_v38 = vadd.f32 %v1267_v54, %v1245_v5  ;;  %v1286_v45 = vadd.f32 %v1268_v59, %v1246_v57  ;;  %6645 = vst [vmem:[#allocation34_spill] sm:$0xff] %v4328_v39  ;;  %v6649_v29 = vld [vmem:[#allocation22_spill] sm:$0xff] }
 0x125   :  { %v1287_v18 = vadd.f32 %v1269_v63, %v1247_v8  ;;  %v1288_v42 = vadd.f32 %v1270_v22, %v1248_v0  ;;  %v1289_v1 = vadd.f32 %v1271_v30, %v1249_v16  ;;  %v1290_v51 = vadd.f32 %v1272_v36, %v1250_v49  ;;  %v4330_v49 = vld [vmem:[#allocation2 + $0xcb] sm:$0x1]  ;;  %v6651_v8 = vld [vmem:[#allocation13_spill] sm:$0xff] }
 0x126   :  { %v1291_v47 = vadd.f32 %v1273_v32, %v1251_v25  ;;  %v1292_v56 = vadd.f32 %v1274_v41, %v1252_v10  ;;  %v1293_v44 = vadd.f32 %v1275_v62, %v1253_v27  ;;  %v1294_v13 = vadd.f32 %v1276_v14, %v1254_v33  ;;  %6646 = vst [vmem:[#allocation35_spill] sm:$0xff] %v4330_v49  ;;  %v6648_v10 = vld [vmem:[#allocation27_spill] sm:$0xff]  ;;  %v6650_v5 = vld [vmem:[#allocation18_spill] sm:$0xff] }
 0x127   :  { %v1295_v52 = vadd.f32 %v1277_v23, %v1255_v9  ;;  %v1300_v17 = vmul.f32 %v6644_v55, %v4136_v53  ;;  %v1301_v19 = vmul.f32 %v6644_v55, %v6616_v4  ;;  %v1302_v21 = vmul.f32 %v6644_v55, %v6617_v28  ;;  %v6647_v9 = vld [vmem:[#allocation17_spill] sm:$0xff] }
 0x128   :  { %v1303_v11 = vmul.f32 %v6644_v55, %v6618_v43  ;;  %v1304_v25 = vmul.f32 %v6644_v55, %v6627_v12  ;;  %v1305_v33 = vmul.f32 %v6644_v55, %v6628_v15  ;;  %v1306_v53 = vmul.f32 %v6644_v55, %v6637_v37 }
 0x129   :  { %v1307_v4 = vmul.f32 %v6644_v55, %v6638_v31  ;;  %v1308_v27 = vmul.f32 %v6644_v55, %v6647_v9  ;;  %v1309_v16 = vmul.f32 %v6644_v55, %v6648_v10  ;;  %v1310_v60 = vmul.f32 %v6644_v55, %v6649_v29 }
 0x12a   :  { %v1311_v57 = vmul.f32 %v6644_v55, %v6650_v5  ;;  %v1312_v0 = vmul.f32 %v6644_v55, %v6651_v8  ;;  %v1313_v26 = vmul.f32 %v6644_v55, %v6652_v40  ;;  %v1314_v7 = vmul.f32 %v6644_v55, %v6653_v50 }
 0x12b   :  { %v1315_v24 = vmul.f32 %v6644_v55, %v4290_v2  ;;  %v1316_v48 = vmul.f32 %v6644_v55, %v4328_v39  ;;  %v1317_v35 = vmul.f32 %v6644_v55, %v4330_v49  ;;  %v1318_v54 = vadd.f32 %v1300_v17, %v1278_v34  ;;  %v6654_v55 = vld [vmem:[#allocation12_spill] sm:$0xff] }
 0x12c   :  { %v1319_v59 = vadd.f32 %v1301_v19, %v1279_v6  ;;  %v1320_v63 = vadd.f32 %v1302_v21, %v1280_v61  ;;  %v1321_v22 = vadd.f32 %v1303_v11, %v1281_v58  ;;  %v1322_v30 = vadd.f32 %v1304_v25, %v1282_v20  ;;  %v4368_v20 = vld [vmem:[#allocation2 + $0xd3] sm:$0xff]  ;;  %v6663_v21 = vld [vmem:[#allocation34_spill] sm:$0xff] }
 0x12d   :  { %v1323_v36 = vadd.f32 %v1305_v33, %v1283_v46  ;;  %v1324_v32 = vadd.f32 %v1306_v53, %v1284_v3  ;;  %v1325_v41 = vadd.f32 %v1307_v4, %v1285_v38  ;;  %v1326_v62 = vadd.f32 %v1308_v27, %v1286_v45  ;;  %6655 = vst [vmem:[#allocation24_spill] sm:$0xff] %v4368_v20  ;;  %v6659_v46 = vld [vmem:[#allocation13_spill] sm:$0xff]  ;;  %v6660_v38 = vld [vmem:[#allocation14_spill] sm:$0xff]  ;;  %v6662_v17 = vld [vmem:[#allocation16_spill] sm:$0xff] }
 0x12e   :  { %v1327_v14 = vadd.f32 %v1309_v16, %v1287_v18  ;;  %v1328_v23 = vadd.f32 %v1310_v60, %v1288_v42  ;;  %v1329_v50 = vadd.f32 %v1311_v57, %v1289_v1  ;;  %v1330_v40 = vadd.f32 %v1312_v0, %v1290_v51  ;;  %v4370_v51 = vld [vmem:[#allocation2 + $0xdb] sm:$0x1]  ;;  %v6661_v18 = vld [vmem:[#allocation15_spill] sm:$0xff] }
 0x12f   :  { %v1331_v2 = vadd.f32 %v1313_v26, %v1291_v47  ;;  %v1332_v8 = vadd.f32 %v1314_v7, %v1292_v56  ;;  %v1333_v5 = vadd.f32 %v1315_v24, %v1293_v44  ;;  %v1334_v39 = vadd.f32 %v1316_v48, %v1294_v13  ;;  %6656 = vst [vmem:[#allocation19_spill] sm:$0xff] %v4370_v51  ;;  %v6658_v56 = vld [vmem:[#allocation18_spill] sm:$0xff] }
 0x130   :  { %v1335_v29 = vadd.f32 %v1317_v35, %v1295_v52  ;;  %v1340_v34 = vmul.f32 %v6654_v55, %v6617_v28  ;;  %v1341_v6 = vmul.f32 %v6654_v55, %v6618_v43  ;;  %v1342_v61 = vmul.f32 %v6654_v55, %v6627_v12  ;;  %v6657_v52 = vld [vmem:[#allocation22_spill] sm:$0xff] }
 0x131   :  { %v1343_v58 = vmul.f32 %v6654_v55, %v6628_v15  ;;  %v1344_v47 = vmul.f32 %v6654_v55, %v6637_v37  ;;  %v1345_v13 = vmul.f32 %v6654_v55, %v6638_v31  ;;  %v1346_v28 = vmul.f32 %v6654_v55, %v6647_v9 }
 0x132   :  { %v1347_v43 = vmul.f32 %v6654_v55, %v6648_v10  ;;  %v1348_v44 = vmul.f32 %v6654_v55, %v6657_v52  ;;  %v1349_v1 = vmul.f32 %v6654_v55, %v6658_v56  ;;  %v1350_v3 = vmul.f32 %v6654_v55, %v6659_v46 }
 0x133   :  { %v1351_v45 = vmul.f32 %v6654_v55, %v6660_v38  ;;  %v1352_v42 = vmul.f32 %v6654_v55, %v6661_v18  ;;  %v1353_v19 = vmul.f32 %v6654_v55, %v6662_v17  ;;  %v1354_v11 = vmul.f32 %v6654_v55, %v6663_v21 }
 0x134   :  { %v1355_v25 = vmul.f32 %v6654_v55, %v4330_v49  ;;  %v1356_v33 = vmul.f32 %v6654_v55, %v4368_v20  ;;  %v1357_v53 = vmul.f32 %v6654_v55, %v4370_v51  ;;  %v1358_v4 = vadd.f32 %v1340_v34, %v1318_v54  ;;  %v6664_v55 = vld [vmem:[#allocation26_spill] sm:$0xff]  ;;  %v6670_v34 = vld [vmem:[#allocation35_spill] sm:$0xff] }
 0x135   :  { %v1359_v27 = vadd.f32 %v1341_v6, %v1319_v59  ;;  %v1360_v16 = vadd.f32 %v1342_v61, %v1320_v63  ;;  %v1361_v60 = vadd.f32 %v1343_v58, %v1321_v22  ;;  %v1362_v57 = vadd.f32 %v1344_v47, %v1322_v30  ;;  %v1132_v30 = vld [vmem:[#allocation2 + $0xe3] sm:$0xff]  ;;  %v6671_v61 = vld [vmem:[#allocation24_spill] sm:$0xff] }
 0x136   :  { %v1363_v0 = vadd.f32 %v1345_v13, %v1323_v36  ;;  %v1364_v26 = vadd.f32 %v1346_v28, %v1324_v32  ;;  %v1365_v7 = vadd.f32 %v1347_v43, %v1325_v41  ;;  %v1366_v24 = vadd.f32 %v1348_v44, %v1326_v62  ;;  %v6667_v36 = vld [vmem:[#allocation15_spill] sm:$0xff]  ;;  %v6668_v41 = vld [vmem:[#allocation16_spill] sm:$0xff] }
 0x137   :  { %v1367_v48 = vadd.f32 %v1349_v1, %v1327_v14  ;;  %v1368_v35 = vadd.f32 %v1350_v3, %v1328_v23  ;;  %v1369_v21 = vadd.f32 %v1351_v45, %v1329_v50  ;;  %v1370_v17 = vadd.f32 %v1352_v42, %v1330_v40  ;;  %v1133_v50 = vld [vmem:[#allocation2 + $0xeb] sm:$0x1] }
 0x138   :  { %v1371_v49 = vadd.f32 %v1353_v19, %v1331_v2  ;;  %v1372_v18 = vadd.f32 %v1354_v11, %v1332_v8  ;;  %v1373_v38 = vadd.f32 %v1355_v25, %v1333_v5  ;;  %v1374_v20 = vadd.f32 %v1356_v33, %v1334_v39  ;;  %v6666_v8 = vld [vmem:[#allocation14_spill] sm:$0xff] }
 0x139   :  { %v1375_v46 = vadd.f32 %v1357_v53, %v1335_v29  ;;  %v1380_v54 = vmul.f32 %v6664_v55, %v6627_v12  ;;  %v1381_v59 = vmul.f32 %v6664_v55, %v6628_v15  ;;  %v1382_v63 = vmul.f32 %v6664_v55, %v6637_v37  ;;  %v6665_v29 = vld [vmem:[#allocation13_spill] sm:$0xff]  ;;  %v6669_v14 = vld [vmem:[#allocation34_spill] sm:$0xff] }
 0x13a   :  { %v1383_v22 = vmul.f32 %v6664_v55, %v6638_v31  ;;  %v1384_v2 = vmul.f32 %v6664_v55, %v6647_v9  ;;  %v1385_v39 = vmul.f32 %v6664_v55, %v6648_v10  ;;  %v1386_v12 = vmul.f32 %v6664_v55, %v6657_v52 }
 0x13b   :  { %v1387_v15 = vmul.f32 %v6664_v55, %v6658_v56  ;;  %v1388_v5 = vmul.f32 %v6664_v55, %v6665_v29  ;;  %v1389_v40 = vmul.f32 %v6664_v55, %v6666_v8  ;;  %v1390_v32 = vmul.f32 %v6664_v55, %v6667_v36 }
 0x13c   :  { %v1391_v62 = vmul.f32 %v6664_v55, %v6668_v41  ;;  %v1392_v23 = vmul.f32 %v6664_v55, %v6669_v14  ;;  %v1393_v6 = vmul.f32 %v6664_v55, %v6670_v34  ;;  %v1394_v58 = vmul.f32 %v6664_v55, %v6671_v61 }
 0x13d   :  { %v1395_v47 = vmul.f32 %v6664_v55, %v4370_v51  ;;  %v1396_v13 = vmul.f32 %v6664_v55, %v1132_v30  ;;  %v1397_v28 = vmul.f32 %v6664_v55, %v1133_v50  ;;  %v1398_v43 = vadd.f32 %v1380_v54, %v1358_v4  ;;  %v6672_v55 = vld [vmem:[#allocation30_spill] sm:$0xff] }
 0x13e   :  { %v1399_v44 = vadd.f32 %v1381_v59, %v1359_v27  ;;  %v1400_v1 = vadd.f32 %v1382_v63, %v1360_v16  ;;  %v1401_v3 = vadd.f32 %v1383_v22, %v1361_v60  ;;  %v1402_v45 = vadd.f32 %v1384_v2, %v1362_v57  ;;  %v1134_v57 = vld [vmem:[#allocation2 + $0xf3] sm:$0xff] }
 0x13f   :  { %v1403_v42 = vadd.f32 %v1385_v39, %v1363_v0  ;;  %v1404_v19 = vadd.f32 %v1386_v12, %v1364_v26  ;;  %v1405_v11 = vadd.f32 %v1387_v15, %v1365_v7  ;;  %v1406_v25 = vadd.f32 %v1388_v5, %v1366_v24  ;;  %v6677_v26 = vld [vmem:[#allocation35_spill] sm:$0xff]  ;;  %v6678_v7 = vld [vmem:[#allocation24_spill] sm:$0xff] }
 0x140   :  { %v1407_v33 = vadd.f32 %v1389_v40, %v1367_v48  ;;  %v1408_v53 = vadd.f32 %v1390_v32, %v1368_v35  ;;  %v1409_v34 = vadd.f32 %v1391_v62, %v1369_v21  ;;  %v1410_v61 = vadd.f32 %v1392_v23, %v1370_v17  ;;  %v1135_v21 = vld [vmem:[#allocation2 + $0xfb] sm:$0x1]  ;;  %v6676_v17 = vld [vmem:[#allocation34_spill] sm:$0xff]  ;;  %v6679_v24 = vld [vmem:[#allocation19_spill] sm:$0xff] }
 0x141   :  { %v1411_v14 = vadd.f32 %v1393_v6, %v1371_v49  ;;  %v1412_v41 = vadd.f32 %v1394_v58, %v1372_v18  ;;  %v1413_v51 = vadd.f32 %v1395_v47, %v1373_v38  ;;  %v1414_v36 = vadd.f32 %v1396_v13, %v1374_v20  ;;  %v6674_v38 = vld [vmem:[#allocation15_spill] sm:$0xff]  ;;  %v6675_v18 = vld [vmem:[#allocation16_spill] sm:$0xff]  ;;  %v1456_v47 = vld [vmem:[#allocation2 + $0x4] sm:$0xff] }
 0x142   :  { %v1415_v8 = vadd.f32 %v1397_v28, %v1375_v46  ;;  %v1420_v4 = vmul.f32 %v6672_v55, %v6637_v37  ;;  %v1421_v27 = vmul.f32 %v6672_v55, %v6638_v31  ;;  %v1422_v16 = vmul.f32 %v6672_v55, %v6647_v9  ;;  %v6673_v46 = vld [vmem:[#allocation14_spill] sm:$0xff]  ;;  %v6680_v40 = vld [vmem:[#allocation11_spill] sm:$0xff] }
 0x143   :  { %v1423_v60 = vmul.f32 %v6672_v55, %v6648_v10  ;;  %v1424_v49 = vmul.f32 %v6672_v55, %v6657_v52  ;;  %v1425_v20 = vmul.f32 %v6672_v55, %v6658_v56  ;;  %v1426_v37 = vmul.f32 %v6672_v55, %v6665_v29  ;;  %v1457_v13 = vld [vmem:[#allocation2 + $0xc] sm:$0x1]  ;;  %v4493_v28 = vld [vmem:[#allocation2 + $0x14] sm:$0xff] }
 0x144   :  { %v1427_v31 = vmul.f32 %v6672_v55, %v6673_v46  ;;  %v1428_v9 = vmul.f32 %v6672_v55, %v6674_v38  ;;  %v1429_v10 = vmul.f32 %v6672_v55, %v6675_v18  ;;  %v1430_v0 = vmul.f32 %v6672_v55, %v6676_v17  ;;  %v4556_v46 = vld [vmem:[#allocation2 + $0x6c] sm:$0x1]  ;;  %v4560_v18 = vld [vmem:[#allocation5 + $0x30] sm:$0xff]  ;;  %v4565_v17 = vld [vmem:[#allocation5 + $0x38] sm:$0xff] }
 0x145   :  { %v1431_v52 = vmul.f32 %v6672_v55, %v6677_v26  ;;  %v1432_v56 = vmul.f32 %v6672_v55, %v6678_v7  ;;  %v1433_v48 = vmul.f32 %v6672_v55, %v6679_v24  ;;  %v1434_v35 = vmul.f32 %v6672_v55, %v1132_v30  ;;  %6693 = vst [vmem:[#allocation12_spill] sm:$0xff] %v4556_v46  ;;  %v4570_v26 = vld [vmem:[#allocation2 + $0x7c] sm:$0x1]  ;;  %v4574_v7 = vld [vmem:[#allocation2 + $0x8c] sm:$0x1] }
 0x146   :  { %v1435_v54 = vmul.f32 %v6672_v55, %v1133_v50  ;;  %v1436_v59 = vmul.f32 %v6672_v55, %v1134_v57  ;;  %v1437_v63 = vmul.f32 %v6672_v55, %v1135_v21  ;;  %v4466_v22 = vadd.f32 %v1420_v4, %v1398_v43  ;;  %v4528_v55 = vld [vmem:[#allocation2 + $0x4c] sm:$0x1]  ;;  %v4534_v4 = vld [vmem:[#allocation5 + $0x10] sm:$0xff]  ;;  %v4544_v57 = vld [vmem:[#allocation5 + $0x20] sm:$0xff]  ;;  %6695 = vst [vmem:[#allocation18_spill] sm:$0xff] %v4560_v18 }
 0x147   :  { %v4468_v2 = vadd.f32 %v1421_v27, %v1399_v44  ;;  %v4470_v39 = vadd.f32 %v1422_v16, %v1400_v1  ;;  %v4472_v12 = vadd.f32 %v1423_v60, %v1401_v3  ;;  %v4474_v15 = vadd.f32 %v1424_v49, %v1402_v45  ;;  %v4501_v3 = vld [vmem:[#allocation2 + $0x1c] sm:$0x1]  ;;  %v4503_v45 = vld [vmem:[#allocation2 + $0x24] sm:$0xff]  ;;  %6685 = vst [vmem:[#allocation32_spill] sm:$0xff] %v4534_v4 }
 0x148   :  { %v4476_v29 = vadd.f32 %v1425_v20, %v1403_v42  ;;  %v4478_v5 = vadd.f32 %v1426_v37, %v1404_v19  ;;  %v4480_v30 = vadd.f32 %v1427_v31, %v1405_v11  ;;  %v4482_v50 = vadd.f32 %v1428_v9, %v1406_v25  ;;  %v4505_v42 = vld [vmem:[#allocation2 + $0x2c] sm:$0x1]  ;;  %v4539_v16 = vld [vmem:[#allocation5 + $0x18] sm:$0xff]  ;;  %6688 = vst [vmem:[#allocation33_spill] sm:$0xff] %v4544_v57  ;;  %v4554_v37 = vld [vmem:[#allocation2 + $0x64] sm:$0xff] }
 0x149   :  { %v1490_v32 = vsub.s32 4, %v6680_v40  ;;  %v4485_v62 = vadd.f32 %v1429_v10, %v1407_v33  ;;  %v4487_v23 = vadd.f32 %v1430_v0, %v1408_v53  ;;  %v4489_v6 = vadd.f32 %v1431_v52, %v1409_v34  ;;  %v4507_v34 = vld [vmem:[#allocation5] sm:$0xff]  ;;  %v4520_v25 = vld [vmem:[#allocation5 + $0x8] sm:$0xff]  ;;  %6686 = vst [vmem:[#allocation21_spill] sm:$0xff] %v4539_v16  ;;  %6692 = vst [vmem:[#allocation27_spill] sm:$0xff] %v4554_v37 }
 0x14a   :  { %v4491_v58 = vadd.f32 %v1432_v56, %v1410_v61  ;;  %v4495_v43 = vadd.f32 %v1433_v48, %v1411_v14  ;;  %v4497_v44 = vadd.f32 %v1434_v35, %v1412_v41  ;;  %v4499_v1 = vadd.f32 %v1435_v54, %v1413_v51  ;;  %6681 = vst [vmem:[#allocation23_spill] sm:$0xff] %v4507_v34  ;;  %v4514_v14 = vld [vmem:[#allocation2 + $0x34] sm:$0xff]  ;;  %v4516_v41 = vld [vmem:[#allocation2 + $0x3c] sm:$0x1]  ;;  %v4518_v51 = vld [vmem:[#allocation2 + $0x44] sm:$0xff] }
 0x14b   :  { %v1491_v61 = vrot.slane %v4507_v34, %v1490_v32  ;;  %v4510_v19 = vadd.f32 %v1436_v59, %v1414_v36  ;;  %v4512_v11 = vadd.f32 %v1437_v63, %v1415_v8  ;;  %6682 = vst [vmem:[#allocation28_spill] sm:$0xff] %v4520_v25  ;;  %v4523_v33 = vrot.slane %v4520_v25, %v1490_v32  ;;  %v4530_v36 = vld [vmem:[#allocation2 + $0x54] sm:$0xff]  ;;  %v4532_v8 = vld [vmem:[#allocation2 + $0x5c] sm:$0x1]  ;;  %v4549_v49 = vld [vmem:[#allocation5 + $0x28] sm:$0xff] }
 0x14c   :  { %v4526_v53 = vsub.s32 5, %v6680_v40  ;;  %6684 = vst [vmem:[#allocation20_spill] sm:$0xff] %v4532_v8  ;;  %v4537_v27 = vrot.slane %v4534_v4, %v1490_v32  ;;  %v4542_v60 = vrot.slane %v4539_v16, %v1490_v32  ;;  %v4547_v21 = vrot.slane %v4544_v57, %v1490_v32  ;;  %6690 = vst [vmem:[#allocation36_spill] sm:$0xff] %v4549_v49  ;;  %v4558_v31 = vld [vmem:[#allocation2 + $0x74] sm:$0xff]  ;;  %v4572_v52 = vld [vmem:[#allocation2 + $0x84] sm:$0xff] }
 0x14d   :  { %v4552_v20 = vrot.slane %v4549_v49, %v1490_v32  ;;  %6694 = vst [vmem:[#allocation22_spill] sm:$0xff] %v4558_v31  ;;  %v1492_v38 = vmul.f32 %v1491_v61, %v1456_v47  ;;  %v1493_v9 = vmul.f32 %v1491_v61, %v1457_v13  ;;  %v4563_v10 = vrot.slane %v4560_v18, %v1490_v32 }
 0x14e   :  { %6683 = vst [vmem:[#allocation25_spill] sm:$0xff] %v4526_v53  ;;  %6687 = vst [vmem:[#allocation31_spill] sm:$0xff] %v4542_v60  ;;  %v4568_v0 = vrot.slane %v4565_v17, %v1490_v32  ;;  %v1494_v56 = vmul.f32 %v1491_v61, %v4493_v28  ;;  %v1495_v24 = vmul.f32 %v1491_v61, %v4501_v3 }
 0x14f   :  { %6689 = vst [vmem:[#allocation29_spill] sm:$0xff] %v4547_v21  ;;  %6691 = vst [vmem:[#allocation17_spill] sm:$0xff] %v4552_v20  ;;  %v1496_v48 = vmul.f32 %v1491_v61, %v4503_v45  ;;  %v1497_v35 = vmul.f32 %v1491_v61, %v4505_v42  ;;  %v1498_v54 = vmul.f32 %v1491_v61, %v4514_v14 }
 0x150   :  { %6696 = vst [vmem:[#allocation26_spill] sm:$0xff] %v4563_v10  ;;  %6697 = vst [vmem:[#allocation13_spill] sm:$0xff] %v4565_v17  ;;  %v1499_v59 = vmul.f32 %v1491_v61, %v4516_v41  ;;  %v1500_v63 = vmul.f32 %v1491_v61, %v4518_v51  ;;  %v1501_v32 = vmul.f32 %v1491_v61, %v4528_v55 }
 0x151   :  { %6698 = vst [vmem:[#allocation30_spill] sm:$0xff] %v4568_v0  ;;  %6699 = vst [vmem:[#allocation14_spill] sm:$0xff] %v4570_v26  ;;  %v1502_v47 = vmul.f32 %v1491_v61, %v4530_v36  ;;  %v1503_v13 = vmul.f32 %v1491_v61, %v4532_v8  ;;  %v1504_v40 = vmul.f32 %v1491_v61, %v4554_v37 }
 0x152   :  { %6700 = vst [vmem:[#allocation15_spill] sm:$0xff] %v4572_v52  ;;  %6701 = vst [vmem:[#allocation16_spill] sm:$0xff] %v4574_v7  ;;  %v1505_v17 = vmul.f32 %v1491_v61, %v4556_v46  ;;  %v1506_v18 = vmul.f32 %v1491_v61, %v4558_v31  ;;  %v1507_v49 = vmul.f32 %v1491_v61, %v4570_v26 }
 0x153   :  { %v1508_v57 = vmul.f32 %v1491_v61, %v4572_v52  ;;  %v1509_v16 = vmul.f32 %v1491_v61, %v4574_v7  ;;  %v1510_v4 = vadd.f32 %v1492_v38, %v4466_v22  ;;  %v1511_v25 = vadd.f32 %v1493_v9, %v4468_v2 }
 0x154   :  { %v1512_v34 = vadd.f32 %v1494_v56, %v4470_v39  ;;  %v1513_v53 = vadd.f32 %v1495_v24, %v4472_v12  ;;  %v1514_v0 = vadd.f32 %v1496_v48, %v4474_v15  ;;  %v1515_v10 = vadd.f32 %v1497_v35, %v4476_v29 }
 0x155   :  { %v1516_v20 = vadd.f32 %v1498_v54, %v4478_v5  ;;  %v1517_v21 = vadd.f32 %v1499_v59, %v4480_v30  ;;  %v1518_v60 = vadd.f32 %v1500_v63, %v4482_v50  ;;  %v1519_v61 = vadd.f32 %v1501_v32, %v4485_v62 }
 0x156   :  { %v1520_v22 = vadd.f32 %v1502_v47, %v4487_v23  ;;  %v1521_v2 = vadd.f32 %v1503_v13, %v4489_v6  ;;  %v1522_v39 = vadd.f32 %v1504_v40, %v4491_v58  ;;  %v1523_v12 = vadd.f32 %v1505_v17, %v4495_v43  ;;  %v4614_v23 = vld [vmem:[#allocation2 + $0x94] sm:$0xff]  ;;  %v4616_v6 = vld [vmem:[#allocation2 + $0x9c] sm:$0x1] }
 0x157   :  { %v1524_v15 = vadd.f32 %v1506_v18, %v4497_v44  ;;  %v1525_v29 = vadd.f32 %v1507_v49, %v4499_v1  ;;  %v1526_v5 = vadd.f32 %v1508_v57, %v4510_v19  ;;  %v1527_v30 = vadd.f32 %v1509_v16, %v4512_v11  ;;  %6702 = vst [vmem:[#allocation34_spill] sm:$0xff] %v4614_v23 }
 0x158   :  { %v1532_v50 = vmul.f32 %v4523_v33, %v4493_v28  ;;  %v1533_v62 = vmul.f32 %v4523_v33, %v4501_v3  ;;  %6703 = vst [vmem:[#allocation35_spill] sm:$0xff] %v4616_v6  ;;  %v1534_v40 = vmul.f32 %v4523_v33, %v4503_v45  ;;  %v1535_v58 = vmul.f32 %v4523_v33, %v4505_v42 }
 0x159   :  { %v1536_v43 = vmul.f32 %v4523_v33, %v4514_v14  ;;  %v1537_v44 = vmul.f32 %v4523_v33, %v4516_v41  ;;  %v1538_v28 = vmul.f32 %v4523_v33, %v4518_v51  ;;  %v1539_v1 = vmul.f32 %v4523_v33, %v4528_v55 }
 0x15a   :  { %v1540_v3 = vmul.f32 %v4523_v33, %v4530_v36  ;;  %v1541_v19 = vmul.f32 %v4523_v33, %v4532_v8  ;;  %v1542_v11 = vmul.f32 %v4523_v33, %v4554_v37  ;;  %v1543_v16 = vmul.f32 %v4523_v33, %v4556_v46 }
 0x15b   :  { %v1544_v57 = vmul.f32 %v4523_v33, %v4558_v31  ;;  %v1545_v49 = vmul.f32 %v4523_v33, %v4570_v26  ;;  %v1546_v38 = vmul.f32 %v4523_v33, %v4572_v52  ;;  %v1547_v9 = vmul.f32 %v4523_v33, %v4574_v7 }
 0x15c   :  { %v1548_v18 = vmul.f32 %v4523_v33, %v4614_v23  ;;  %v1549_v17 = vmul.f32 %v4523_v33, %v4616_v6  ;;  %v1550_v56 = vadd.f32 %v1532_v50, %v1510_v4  ;;  %v1551_v24 = vadd.f32 %v1533_v62, %v1511_v25  ;;  %v4654_v25 = vld [vmem:[#allocation2 + $0xa4] sm:$0xff]  ;;  %v6712_v50 = vld [vmem:[#allocation16_spill] sm:$0xff] }
 0x15d   :  { %v1552_v48 = vadd.f32 %v1534_v40, %v1512_v34  ;;  %v1553_v35 = vadd.f32 %v1535_v58, %v1513_v53  ;;  %v1554_v54 = vadd.f32 %v1536_v43, %v1514_v0  ;;  %v1555_v59 = vadd.f32 %v1537_v44, %v1515_v10  ;;  %6704 = vst [vmem:[#allocation24_spill] sm:$0xff] %v4654_v25  ;;  %v4656_v53 = vld [vmem:[#allocation2 + $0xac] sm:$0x1]  ;;  %v6707_v0 = vld [vmem:[#allocation27_spill] sm:$0xff] }
 0x15e   :  { %v1556_v63 = vadd.f32 %v1538_v28, %v1516_v20  ;;  %v1557_v32 = vadd.f32 %v1539_v1, %v1517_v21  ;;  %v1558_v47 = vadd.f32 %v1540_v3, %v1518_v60  ;;  %v1559_v13 = vadd.f32 %v1541_v19, %v1519_v61  ;;  %6705 = vst [vmem:[#allocation19_spill] sm:$0xff] %v4656_v53  ;;  %v6713_v40 = vld [vmem:[#allocation34_spill] sm:$0xff] }
 0x15f   :  { %v1560_v52 = vadd.f32 %v1542_v11, %v1520_v22  ;;  %v1561_v26 = vadd.f32 %v1543_v16, %v1521_v2  ;;  %v1562_v31 = vadd.f32 %v1544_v57, %v1522_v39  ;;  %v1563_v7 = vadd.f32 %v1545_v49, %v1523_v12  ;;  %v6708_v22 = vld [vmem:[#allocation12_spill] sm:$0xff]  ;;  %v6709_v39 = vld [vmem:[#allocation22_spill] sm:$0xff] }
 0x160   :  { %v1564_v46 = vadd.f32 %v1546_v38, %v1524_v15  ;;  %v1565_v37 = vadd.f32 %v1547_v9, %v1525_v29  ;;  %v1566_v23 = vadd.f32 %v1548_v18, %v1526_v5  ;;  %v1567_v8 = vadd.f32 %v1549_v17, %v1527_v30  ;;  %v6710_v15 = vld [vmem:[#allocation14_spill] sm:$0xff]  ;;  %v6711_v5 = vld [vmem:[#allocation15_spill] sm:$0xff] }
 0x161   :  { %v1572_v33 = vmul.f32 %v4537_v27, %v4503_v45  ;;  %v1573_v34 = vmul.f32 %v4537_v27, %v4505_v42  ;;  %v1574_v4 = vmul.f32 %v4537_v27, %v4514_v14  ;;  %v1575_v60 = vmul.f32 %v4537_v27, %v4516_v41  ;;  %v6706_v42 = vld [vmem:[#allocation20_spill] sm:$0xff] }
 0x162   :  { %v1576_v21 = vmul.f32 %v4537_v27, %v4518_v51  ;;  %v1577_v20 = vmul.f32 %v4537_v27, %v4528_v55  ;;  %v1578_v45 = vmul.f32 %v4537_v27, %v4530_v36  ;;  %v1579_v10 = vmul.f32 %v4537_v27, %v6706_v42 }
 0x163   :  { %v1580_v61 = vmul.f32 %v4537_v27, %v6707_v0  ;;  %v1581_v2 = vmul.f32 %v4537_v27, %v6708_v22  ;;  %v1582_v12 = vmul.f32 %v4537_v27, %v6709_v39  ;;  %v1583_v29 = vmul.f32 %v4537_v27, %v6710_v15 }
 0x164   :  { %v1584_v30 = vmul.f32 %v4537_v27, %v6711_v5  ;;  %v1585_v62 = vmul.f32 %v4537_v27, %v6712_v50  ;;  %v1586_v58 = vmul.f32 %v4537_v27, %v6713_v40  ;;  %v1587_v43 = vmul.f32 %v4537_v27, %v4616_v6 }
 0x165   :  { %v1588_v44 = vmul.f32 %v4537_v27, %v4654_v25  ;;  %v1589_v28 = vmul.f32 %v4537_v27, %v4656_v53  ;;  %v1590_v1 = vadd.f32 %v1572_v33, %v1550_v56  ;;  %v1591_v3 = vadd.f32 %v1573_v34, %v1551_v24  ;;  %v6714_v27 = vld [vmem:[#allocation31_spill] sm:$0xff] }
 0x166   :  { %v1592_v19 = vadd.f32 %v1574_v4, %v1552_v48  ;;  %v1593_v11 = vadd.f32 %v1575_v60, %v1553_v35  ;;  %v1594_v16 = vadd.f32 %v1576_v21, %v1554_v54  ;;  %v1595_v57 = vadd.f32 %v1577_v20, %v1555_v59  ;;  %v4694_v48 = vld [vmem:[#allocation2 + $0xb4] sm:$0xff]  ;;  %v4696_v35 = vld [vmem:[#allocation2 + $0xbc] sm:$0x1] }
 0x167   :  { %v1596_v49 = vadd.f32 %v1578_v45, %v1556_v63  ;;  %v1597_v38 = vadd.f32 %v1579_v10, %v1557_v32  ;;  %v1598_v9 = vadd.f32 %v1580_v61, %v1558_v47  ;;  %v1599_v18 = vadd.f32 %v1581_v2, %v1559_v13  ;;  %6715 = vst [vmem:[#allocation20_spill] sm:$0xff] %v4694_v48  ;;  %v6719_v54 = vld [vmem:[#allocation15_spill] sm:$0xff]  ;;  %v6720_v63 = vld [vmem:[#allocation16_spill] sm:$0xff]  ;;  %v6721_v47 = vld [vmem:[#allocation34_spill] sm:$0xff] }
 0x168   :  { %v1600_v17 = vadd.f32 %v1582_v12, %v1560_v52  ;;  %v1601_v40 = vadd.f32 %v1583_v29, %v1561_v26  ;;  %v1602_v50 = vadd.f32 %v1584_v30, %v1562_v31  ;;  %v1603_v6 = vadd.f32 %v1585_v62, %v1563_v7  ;;  %6716 = vst [vmem:[#allocation27_spill] sm:$0xff] %v4696_v35  ;;  %v6718_v7 = vld [vmem:[#allocation14_spill] sm:$0xff]  ;;  %v6722_v33 = vld [vmem:[#allocation35_spill] sm:$0xff]  ;;  %v6723_v4 = vld [vmem:[#allocation24_spill] sm:$0xff] }
 0x169   :  { %v1604_v5 = vadd.f32 %v1586_v58, %v1564_v46  ;;  %v1605_v15 = vadd.f32 %v1587_v43, %v1565_v37  ;;  %v1606_v25 = vadd.f32 %v1588_v44, %v1566_v23  ;;  %v1607_v39 = vadd.f32 %v1589_v28, %v1567_v8  ;;  %v6717_v46 = vld [vmem:[#allocation22_spill] sm:$0xff] }
 0x16a   :  { %v1612_v56 = vmul.f32 %v6714_v27, %v4514_v14  ;;  %v1613_v24 = vmul.f32 %v6714_v27, %v4516_v41  ;;  %v1614_v52 = vmul.f32 %v6714_v27, %v4518_v51  ;;  %v1615_v31 = vmul.f32 %v6714_v27, %v4528_v55 }
 0x16b   :  { %v1616_v37 = vmul.f32 %v6714_v27, %v4530_v36  ;;  %v1617_v8 = vmul.f32 %v6714_v27, %v6706_v42  ;;  %v1618_v14 = vmul.f32 %v6714_v27, %v6707_v0  ;;  %v1619_v41 = vmul.f32 %v6714_v27, %v6708_v22 }
 0x16c   :  { %v1620_v26 = vmul.f32 %v6714_v27, %v6717_v46  ;;  %v1621_v23 = vmul.f32 %v6714_v27, %v6718_v7  ;;  %v1622_v59 = vmul.f32 %v6714_v27, %v6719_v54  ;;  %v1623_v32 = vmul.f32 %v6714_v27, %v6720_v63 }
 0x16d   :  { %v1624_v13 = vmul.f32 %v6714_v27, %v6721_v47  ;;  %v1625_v34 = vmul.f32 %v6714_v27, %v6722_v33  ;;  %v1626_v60 = vmul.f32 %v6714_v27, %v6723_v4  ;;  %v1627_v21 = vmul.f32 %v6714_v27, %v4656_v53 }
 0x16e   :  { %v1628_v20 = vmul.f32 %v6714_v27, %v4694_v48  ;;  %v1629_v45 = vmul.f32 %v6714_v27, %v4696_v35  ;;  %v1630_v10 = vadd.f32 %v1612_v56, %v1590_v1  ;;  %v1631_v61 = vadd.f32 %v1613_v24, %v1591_v3  ;;  %v6724_v27 = vld [vmem:[#allocation29_spill] sm:$0xff]  ;;  %v6732_v56 = vld [vmem:[#allocation19_spill] sm:$0xff] }
 0x16f   :  { %v1632_v2 = vadd.f32 %v1614_v52, %v1592_v19  ;;  %v1633_v12 = vadd.f32 %v1615_v31, %v1593_v11  ;;  %v1634_v29 = vadd.f32 %v1616_v37, %v1594_v16  ;;  %v1635_v30 = vadd.f32 %v1617_v8, %v1595_v57  ;;  %v4734_v19 = vld [vmem:[#allocation2 + $0xc4] sm:$0xff]  ;;  %v4736_v11 = vld [vmem:[#allocation2 + $0xcc] sm:$0x1]  ;;  %v6733_v52 = vld [vmem:[#allocation20_spill] sm:$0xff] }
 0x170   :  { %v1636_v62 = vadd.f32 %v1618_v14, %v1596_v49  ;;  %v1637_v58 = vadd.f32 %v1619_v41, %v1597_v38  ;;  %v1638_v43 = vadd.f32 %v1620_v26, %v1598_v9  ;;  %v1639_v44 = vadd.f32 %v1621_v23, %v1599_v18  ;;  %6725 = vst [vmem:[#allocation12_spill] sm:$0xff] %v4734_v19  ;;  %v6729_v57 = vld [vmem:[#allocation34_spill] sm:$0xff]  ;;  %v6730_v38 = vld [vmem:[#allocation35_spill] sm:$0xff]  ;;  %v6731_v18 = vld [vmem:[#allocation24_spill] sm:$0xff] }
 0x171   :  { %v1640_v28 = vadd.f32 %v1622_v59, %v1600_v17  ;;  %v1641_v4 = vadd.f32 %v1623_v32, %v1601_v40  ;;  %v1642_v33 = vadd.f32 %v1624_v13, %v1602_v50  ;;  %v1643_v53 = vadd.f32 %v1625_v34, %v1603_v6  ;;  %6726 = vst [vmem:[#allocation31_spill] sm:$0xff] %v4736_v11  ;;  %v6728_v50 = vld [vmem:[#allocation16_spill] sm:$0xff] }
 0x172   :  { %v1644_v47 = vadd.f32 %v1626_v60, %v1604_v5  ;;  %v1645_v63 = vadd.f32 %v1627_v21, %v1605_v15  ;;  %v1646_v48 = vadd.f32 %v1628_v20, %v1606_v25  ;;  %v1647_v54 = vadd.f32 %v1629_v45, %v1607_v39  ;;  %v6727_v15 = vld [vmem:[#allocation15_spill] sm:$0xff] }
 0x173   :  { %v1652_v1 = vmul.f32 %v6724_v27, %v4518_v51  ;;  %v1653_v3 = vmul.f32 %v6724_v27, %v4528_v55  ;;  %v1654_v16 = vmul.f32 %v6724_v27, %v4530_v36  ;;  %v1655_v6 = vmul.f32 %v6724_v27, %v6706_v42 }
 0x174   :  { %v1656_v25 = vmul.f32 %v6724_v27, %v6707_v0  ;;  %v1657_v39 = vmul.f32 %v6724_v27, %v6708_v22  ;;  %v1658_v51 = vmul.f32 %v6724_v27, %v6717_v46  ;;  %v1659_v55 = vmul.f32 %v6724_v27, %v6718_v7 }
 0x175   :  { %v1660_v5 = vmul.f32 %v6724_v27, %v6727_v15  ;;  %v1661_v40 = vmul.f32 %v6724_v27, %v6728_v50  ;;  %v1662_v49 = vmul.f32 %v6724_v27, %v6729_v57  ;;  %v1663_v9 = vmul.f32 %v6724_v27, %v6730_v38 }
 0x176   :  { %v1664_v17 = vmul.f32 %v6724_v27, %v6731_v18  ;;  %v1665_v24 = vmul.f32 %v6724_v27, %v6732_v56  ;;  %v1666_v31 = vmul.f32 %v6724_v27, %v6733_v52  ;;  %v1667_v37 = vmul.f32 %v6724_v27, %v4696_v35 }
 0x177   :  { %v1668_v8 = vmul.f32 %v6724_v27, %v4734_v19  ;;  %v1669_v14 = vmul.f32 %v6724_v27, %v4736_v11  ;;  %v1670_v41 = vadd.f32 %v1652_v1, %v1630_v10  ;;  %v1671_v26 = vadd.f32 %v1653_v3, %v1631_v61  ;;  %v6734_v27 = vld [vmem:[#allocation17_spill] sm:$0xff]  ;;  %v6742_v1 = vld [vmem:[#allocation27_spill] sm:$0xff] }
 0x178   :  { %v1672_v23 = vadd.f32 %v1654_v16, %v1632_v2  ;;  %v1673_v59 = vadd.f32 %v1655_v6, %v1633_v12  ;;  %v1674_v32 = vadd.f32 %v1656_v25, %v1634_v29  ;;  %v1675_v13 = vadd.f32 %v1657_v39, %v1635_v30  ;;  %v4774_v2 = vld [vmem:[#allocation2 + $0xd4] sm:$0xff]  ;;  %v4776_v12 = vld [vmem:[#allocation2 + $0xdc] sm:$0x1] }
 0x179   :  { %v1676_v34 = vadd.f32 %v1658_v51, %v1636_v62  ;;  %v1677_v60 = vadd.f32 %v1659_v55, %v1637_v58  ;;  %v1678_v21 = vadd.f32 %v1660_v5, %v1638_v43  ;;  %v1679_v20 = vadd.f32 %v1661_v40, %v1639_v44  ;;  %6735 = vst [vmem:[#allocation22_spill] sm:$0xff] %v4774_v2  ;;  %v6739_v30 = vld [vmem:[#allocation24_spill] sm:$0xff]  ;;  %v6740_v58 = vld [vmem:[#allocation19_spill] sm:$0xff] }
 0x17a   :  { %v1680_v45 = vadd.f32 %v1662_v49, %v1640_v28  ;;  %v1681_v52 = vadd.f32 %v1663_v9, %v1641_v4  ;;  %v1682_v56 = vadd.f32 %v1664_v17, %v1642_v33  ;;  %v1683_v35 = vadd.f32 %v1665_v24, %v1643_v53  ;;  %6736 = vst [vmem:[#allocation14_spill] sm:$0xff] %v4776_v12  ;;  %v6738_v33 = vld [vmem:[#allocation35_spill] sm:$0xff]  ;;  %v6741_v44 = vld [vmem:[#allocation20_spill] sm:$0xff] }
 0x17b   :  { %v1684_v18 = vadd.f32 %v1666_v31, %v1644_v47  ;;  %v1685_v38 = vadd.f32 %v1667_v37, %v1645_v63  ;;  %v1686_v19 = vadd.f32 %v1668_v8, %v1646_v48  ;;  %v1687_v57 = vadd.f32 %v1669_v14, %v1647_v54  ;;  %v6737_v63 = vld [vmem:[#allocation34_spill] sm:$0xff]  ;;  %v6743_v16 = vld [vmem:[#allocation12_spill] sm:$0xff] }
 0x17c   :  { %v1692_v10 = vmul.f32 %v6734_v27, %v4530_v36  ;;  %v1693_v61 = vmul.f32 %v6734_v27, %v6706_v42  ;;  %v1694_v29 = vmul.f32 %v6734_v27, %v6707_v0  ;;  %v1695_v53 = vmul.f32 %v6734_v27, %v6708_v22 }
 0x17d   :  { %v1696_v48 = vmul.f32 %v6734_v27, %v6717_v46  ;;  %v1697_v54 = vmul.f32 %v6734_v27, %v6718_v7  ;;  %v1698_v36 = vmul.f32 %v6734_v27, %v6727_v15  ;;  %v1699_v42 = vmul.f32 %v6734_v27, %v6728_v50 }
 0x17e   :  { %v1700_v47 = vmul.f32 %v6734_v27, %v6737_v63  ;;  %v1701_v4 = vmul.f32 %v6734_v27, %v6738_v33  ;;  %v1702_v62 = vmul.f32 %v6734_v27, %v6739_v30  ;;  %v1703_v43 = vmul.f32 %v6734_v27, %v6740_v58 }
 0x17f   :  { %v1704_v28 = vmul.f32 %v6734_v27, %v6741_v44  ;;  %v1705_v3 = vmul.f32 %v6734_v27, %v6742_v1  ;;  %v1706_v6 = vmul.f32 %v6734_v27, %v6743_v16  ;;  %v1707_v25 = vmul.f32 %v6734_v27, %v4736_v11 }
 0x180   :  { %v1708_v39 = vmul.f32 %v6734_v27, %v4774_v2  ;;  %v1709_v51 = vmul.f32 %v6734_v27, %v4776_v12  ;;  %v1710_v55 = vadd.f32 %v1692_v10, %v1670_v41  ;;  %v1711_v5 = vadd.f32 %v1693_v61, %v1671_v26  ;;  %v6744_v27 = vld [vmem:[#allocation26_spill] sm:$0xff]  ;;  %v6750_v10 = vld [vmem:[#allocation31_spill] sm:$0xff] }
 0x181   :  { %v1712_v40 = vadd.f32 %v1694_v29, %v1672_v23  ;;  %v1713_v49 = vadd.f32 %v1695_v53, %v1673_v59  ;;  %v1714_v9 = vadd.f32 %v1696_v48, %v1674_v32  ;;  %v1715_v17 = vadd.f32 %v1697_v54, %v1675_v13  ;;  %v1484_v23 = vld [vmem:[#allocation2 + $0xe4] sm:$0xff]  ;;  %v1485_v59 = vld [vmem:[#allocation2 + $0xec] sm:$0x1]  ;;  %v6747_v13 = vld [vmem:[#allocation20_spill] sm:$0xff] }
 0x182   :  { %v1716_v24 = vadd.f32 %v1698_v36, %v1676_v34  ;;  %v1717_v31 = vadd.f32 %v1699_v42, %v1677_v60  ;;  %v1718_v37 = vadd.f32 %v1700_v47, %v1678_v21  ;;  %v1719_v8 = vadd.f32 %v1701_v4, %v1679_v20  ;;  %v6748_v60 = vld [vmem:[#allocation27_spill] sm:$0xff]  ;;  %v6749_v20 = vld [vmem:[#allocation12_spill] sm:$0xff]  ;;  %v6751_v29 = vld [vmem:[#allocation22_spill] sm:$0xff] }
 0x183   :  { %v1720_v14 = vadd.f32 %v1702_v62, %v1680_v45  ;;  %v1721_v16 = vadd.f32 %v1703_v43, %v1681_v52  ;;  %v1722_v1 = vadd.f32 %v1704_v28, %v1682_v56  ;;  %v1723_v11 = vadd.f32 %v1705_v3, %v1683_v35 }
 0x184   :  { %v1724_v44 = vadd.f32 %v1706_v6, %v1684_v18  ;;  %v1725_v58 = vadd.f32 %v1707_v25, %v1685_v38  ;;  %v1726_v2 = vadd.f32 %v1708_v39, %v1686_v19  ;;  %v1727_v30 = vadd.f32 %v1709_v51, %v1687_v57  ;;  %v6745_v57 = vld [vmem:[#allocation24_spill] sm:$0xff]  ;;  %v6746_v18 = vld [vmem:[#allocation19_spill] sm:$0xff] }
 0x185   :  { %v1732_v41 = vmul.f32 %v6744_v27, %v6707_v0  ;;  %v1733_v26 = vmul.f32 %v6744_v27, %v6708_v22  ;;  %v1734_v32 = vmul.f32 %v6744_v27, %v6717_v46  ;;  %v1735_v52 = vmul.f32 %v6744_v27, %v6718_v7 }
 0x186   :  { %v1736_v35 = vmul.f32 %v6744_v27, %v6727_v15  ;;  %v1737_v19 = vmul.f32 %v6744_v27, %v6728_v50  ;;  %v1738_v0 = vmul.f32 %v6744_v27, %v6737_v63  ;;  %v1739_v22 = vmul.f32 %v6744_v27, %v6738_v33 }
 0x187   :  { %v1740_v38 = vmul.f32 %v6744_v27, %v6745_v57  ;;  %v1741_v56 = vmul.f32 %v6744_v27, %v6746_v18  ;;  %v1742_v34 = vmul.f32 %v6744_v27, %v6747_v13  ;;  %v1743_v21 = vmul.f32 %v6744_v27, %v6748_v60 }
 0x188   :  { %v1744_v45 = vmul.f32 %v6744_v27, %v6749_v20  ;;  %v1745_v61 = vmul.f32 %v6744_v27, %v6750_v10  ;;  %v1746_v53 = vmul.f32 %v6744_v27, %v6751_v29  ;;  %v1747_v48 = vmul.f32 %v6744_v27, %v4776_v12 }
 0x189   :  { %v1748_v54 = vmul.f32 %v6744_v27, %v1484_v23  ;;  %v1749_v36 = vmul.f32 %v6744_v27, %v1485_v59  ;;  %v1750_v42 = vadd.f32 %v1732_v41, %v1710_v55  ;;  %v1751_v47 = vadd.f32 %v1733_v26, %v1711_v5  ;;  %v6752_v27 = vld [vmem:[#allocation30_spill] sm:$0xff] }
 0x18a   :  { %v1752_v4 = vadd.f32 %v1734_v32, %v1712_v40  ;;  %v1753_v62 = vadd.f32 %v1735_v52, %v1713_v49  ;;  %v1754_v43 = vadd.f32 %v1736_v35, %v1714_v9  ;;  %v1755_v28 = vadd.f32 %v1737_v19, %v1715_v17  ;;  %v1486_v40 = vld [vmem:[#allocation2 + $0xf4] sm:$0xff]  ;;  %v1487_v49 = vld [vmem:[#allocation2 + $0xfc] sm:$0x1] }
 0x18b   :  { %v1756_v3 = vadd.f32 %v1738_v0, %v1716_v24  ;;  %v1757_v6 = vadd.f32 %v1739_v22, %v1717_v31  ;;  %v1758_v25 = vadd.f32 %v1740_v38, %v1718_v37  ;;  %v1759_v39 = vadd.f32 %v1741_v56, %v1719_v8  ;;  %v6756_v17 = vld [vmem:[#allocation12_spill] sm:$0xff]  ;;  %v6757_v24 = vld [vmem:[#allocation31_spill] sm:$0xff]  ;;  %v6758_v31 = vld [vmem:[#allocation22_spill] sm:$0xff] }
 0x18c   :  { %v1760_v51 = vadd.f32 %v1742_v34, %v1720_v14  ;;  %v1761_v10 = vadd.f32 %v1743_v21, %v1721_v16  ;;  %v1762_v29 = vadd.f32 %v1744_v45, %v1722_v1  ;;  %v1763_v20 = vadd.f32 %v1745_v61, %v1723_v11  ;;  %v6755_v1 = vld [vmem:[#allocation27_spill] sm:$0xff]  ;;  %v6759_v37 = vld [vmem:[#allocation14_spill] sm:$0xff] }
 0x18d   :  { %v1764_v60 = vadd.f32 %v1746_v53, %v1724_v44  ;;  %v1765_v12 = vadd.f32 %v1747_v48, %v1725_v58  ;;  %v1766_v13 = vadd.f32 %v1748_v54, %v1726_v2  ;;  %v1767_v18 = vadd.f32 %v1749_v36, %v1727_v30  ;;  %v6753_v30 = vld [vmem:[#allocation19_spill] sm:$0xff]  ;;  %v6754_v58 = vld [vmem:[#allocation20_spill] sm:$0xff]  ;;  %v1808_v53 = vld [vmem:[#allocation2 + $0x5] sm:$0xff] }
 0x18e   :  { %v1772_v55 = vmul.f32 %v6752_v27, %v6717_v46  ;;  %v1773_v5 = vmul.f32 %v6752_v27, %v6718_v7  ;;  %v1774_v9 = vmul.f32 %v6752_v27, %v6727_v15  ;;  %v1775_v16 = vmul.f32 %v6752_v27, %v6728_v50  ;;  %v4876_v48 = vld [vmem:[#allocation2 + $0x15] sm:$0xff] }
 0x18f   :  { %v1776_v11 = vmul.f32 %v6752_v27, %v6737_v63  ;;  %v1777_v2 = vmul.f32 %v6752_v27, %v6738_v33  ;;  %v1778_v46 = vmul.f32 %v6752_v27, %v6745_v57  ;;  %v1779_v7 = vmul.f32 %v6752_v27, %v6753_v30 }
 0x190   :  { %v1780_v44 = vmul.f32 %v6752_v27, %v6754_v58  ;;  %v1781_v15 = vmul.f32 %v6752_v27, %v6755_v1  ;;  %v1782_v50 = vmul.f32 %v6752_v27, %v6756_v17  ;;  %v1783_v63 = vmul.f32 %v6752_v27, %v6757_v24  ;;  %v6777_v58 = vld [vmem:[#allocation18_spill] sm:$0xff]  ;;  %v6779_v1 = vld [vmem:[#allocation13_spill] sm:$0xff]  ;;  %v4932_v17 = vld [vmem:[#allocation2 + $0x7d] sm:$0x1] }
 0x191   :  { %v1784_v33 = vmul.f32 %v6752_v27, %v6758_v31  ;;  %v1785_v8 = vmul.f32 %v6752_v27, %v6759_v37  ;;  %v1786_v14 = vmul.f32 %v6752_v27, %v1484_v23  ;;  %v1787_v41 = vmul.f32 %v6752_v27, %v1485_v59  ;;  %v1809_v23 = vld [vmem:[#allocation2 + $0xd] sm:$0x1]  ;;  %6781 = vst [vmem:[#allocation12_spill] sm:$0xff] %v4932_v17 }
 0x192   :  { %v1788_v26 = vmul.f32 %v6752_v27, %v1486_v40  ;;  %v1789_v32 = vmul.f32 %v6752_v27, %v1487_v49  ;;  %v1790_v52 = vadd.f32 %v1772_v55, %v1750_v42  ;;  %v1791_v35 = vadd.f32 %v1773_v5, %v1751_v47  ;;  %v4878_v27 = vld [vmem:[#allocation2 + $0x1d] sm:$0x1]  ;;  %v4880_v42 = vld [vmem:[#allocation2 + $0x25] sm:$0xff]  ;;  %v4882_v47 = vld [vmem:[#allocation2 + $0x2d] sm:$0x1] }
 0x193   :  { %v1792_v19 = vadd.f32 %v1774_v9, %v1752_v4  ;;  %v1793_v0 = vadd.f32 %v1775_v16, %v1753_v62  ;;  %v1794_v22 = vadd.f32 %v1776_v11, %v1754_v43  ;;  %v1795_v57 = vadd.f32 %v1777_v2, %v1755_v28  ;;  %v6760_v4 = vld [vmem:[#allocation25_spill] sm:$0xff]  ;;  %v6761_v62 = vld [vmem:[#allocation23_spill] sm:$0xff]  ;;  %v4900_v55 = vld [vmem:[#allocation2 + $0x5d] sm:$0x1] }
 0x194   :  { %v1796_v38 = vadd.f32 %v1778_v46, %v1756_v3  ;;  %v1797_v56 = vadd.f32 %v1779_v7, %v1757_v6  ;;  %v1798_v34 = vadd.f32 %v1780_v44, %v1758_v25  ;;  %v1799_v21 = vadd.f32 %v1781_v15, %v1759_v39  ;;  %v4888_v25 = vld [vmem:[#allocation2 + $0x3d] sm:$0x1]  ;;  %v4890_v39 = vld [vmem:[#allocation2 + $0x45] sm:$0xff]  ;;  %6765 = vst [vmem:[#allocation16_spill] sm:$0xff] %v4900_v55  ;;  %v4920_v2 = vld [vmem:[#allocation2 + $0x6d] sm:$0x1] }
 0x195   :  { %v1800_v45 = vadd.f32 %v1782_v50, %v1760_v51  ;;  %v1801_v61 = vadd.f32 %v1783_v63, %v1761_v10  ;;  %v1802_v59 = vadd.f32 %v1784_v33, %v1762_v29  ;;  %v1803_v54 = vadd.f32 %v1785_v8, %v1763_v20  ;;  %v4886_v10 = vld [vmem:[#allocation2 + $0x35] sm:$0xff]  ;;  %v4896_v29 = vld [vmem:[#allocation2 + $0x4d] sm:$0x1]  ;;  %v6770_v40 = vld [vmem:[#allocation33_spill] sm:$0xff]  ;;  %6775 = vst [vmem:[#allocation30_spill] sm:$0xff] %v4920_v2 }
 0x196   :  { %v1804_v36 = vadd.f32 %v1786_v14, %v1764_v60  ;;  %v1843_v43 = vrot.slane %v6761_v62, %v6760_v4  ;;  %v1805_v28 = vadd.f32 %v1787_v41, %v1765_v12  ;;  %v1806_v3 = vadd.f32 %v1788_v26, %v1766_v13  ;;  %v6762_v60 = vld [vmem:[#allocation28_spill] sm:$0xff]  ;;  %6763 = vst [vmem:[#allocation29_spill] sm:$0xff] %v4896_v29  ;;  %v4918_v11 = vld [vmem:[#allocation2 + $0x65] sm:$0xff]  ;;  %v4936_v24 = vld [vmem:[#allocation2 + $0x8d] sm:$0x1] }
 0x197   :  { %v1807_v6 = vadd.f32 %v1789_v32, %v1767_v18  ;;  %v4894_v20 = vrot.slane %v6762_v60, %v6760_v4  ;;  %v4898_v51 = vld [vmem:[#allocation2 + $0x55] sm:$0xff]  ;;  %v6768_v18 = vld [vmem:[#allocation21_spill] sm:$0xff]  ;;  %v4912_v49 = vrot.slane %v6770_v40, %v6760_v4  ;;  %6774 = vst [vmem:[#allocation24_spill] sm:$0xff] %v4918_v11  ;;  %v4926_v44 = vrot.slane %v6777_v58, %v6760_v4 }
 0x198   :  { %6764 = vst [vmem:[#allocation15_spill] sm:$0xff] %v4898_v51  ;;  %v6766_v12 = vld [vmem:[#allocation32_spill] sm:$0xff]  ;;  %v4908_v5 = vrot.slane %v6768_v18, %v6760_v4  ;;  %v1844_v30 = vmul.f32 %v1843_v43, %v1808_v53  ;;  %v1845_v7 = vmul.f32 %v1843_v43, %v1809_v23  ;;  %v4930_v15 = vrot.slane %v6779_v1, %v6760_v4  ;;  %v4934_v50 = vld [vmem:[#allocation2 + $0x85] sm:$0xff] }
 0x199   :  { %v4904_v13 = vrot.slane %v6766_v12, %v6760_v4  ;;  %6771 = vst [vmem:[#allocation35_spill] sm:$0xff] %v4912_v49  ;;  %v6772_v9 = vld [vmem:[#allocation36_spill] sm:$0xff]  ;;  %6778 = vst [vmem:[#allocation20_spill] sm:$0xff] %v4926_v44  ;;  %v1846_v63 = vmul.f32 %v1843_v43, %v4876_v48  ;;  %v1847_v31 = vmul.f32 %v1843_v43, %v4878_v27 }
 0x19a   :  { %6769 = vst [vmem:[#allocation34_spill] sm:$0xff] %v4908_v5  ;;  %v4916_v16 = vrot.slane %v6772_v9, %v6760_v4  ;;  %v4922_v46 = vld [vmem:[#allocation2 + $0x75] sm:$0xff]  ;;  %6780 = vst [vmem:[#allocation27_spill] sm:$0xff] %v4930_v15  ;;  %v1848_v33 = vmul.f32 %v1843_v43, %v4880_v42  ;;  %v1849_v37 = vmul.f32 %v1843_v43, %v4882_v47 }
 0x19b   :  { %6767 = vst [vmem:[#allocation17_spill] sm:$0xff] %v4904_v13  ;;  %6776 = vst [vmem:[#allocation19_spill] sm:$0xff] %v4922_v46  ;;  %v1850_v8 = vmul.f32 %v1843_v43, %v4886_v10  ;;  %v1851_v14 = vmul.f32 %v1843_v43, %v4888_v25  ;;  %v1852_v41 = vmul.f32 %v1843_v43, %v4890_v39 }
 0x19c   :  { %6773 = vst [vmem:[#allocation26_spill] sm:$0xff] %v4916_v16  ;;  %6782 = vst [vmem:[#allocation31_spill] sm:$0xff] %v4934_v50  ;;  %v1853_v26 = vmul.f32 %v1843_v43, %v4896_v29  ;;  %v1854_v32 = vmul.f32 %v1843_v43, %v4898_v51  ;;  %v1855_v53 = vmul.f32 %v1843_v43, %v4900_v55 }
 0x19d   :  { %6783 = vst [vmem:[#allocation22_spill] sm:$0xff] %v4936_v24  ;;  %v1856_v23 = vmul.f32 %v1843_v43, %v4918_v11  ;;  %v1857_v4 = vmul.f32 %v1843_v43, %v4920_v2  ;;  %v1858_v62 = vmul.f32 %v1843_v43, %v4922_v46  ;;  %v1859_v60 = vmul.f32 %v1843_v43, %v4932_v17 }
 0x19e   :  { %v1860_v12 = vmul.f32 %v1843_v43, %v4934_v50  ;;  %v1861_v18 = vmul.f32 %v1843_v43, %v4936_v24  ;;  %v1862_v40 = vadd.f32 %v1844_v30, %v1790_v52  ;;  %v1863_v9 = vadd.f32 %v1845_v7, %v1791_v35  ;;  %v6790_v43 = vld [vmem:[#allocation30_spill] sm:$0xff]  ;;  %v6792_v30 = vld [vmem:[#allocation12_spill] sm:$0xff] }
 0x19f   :  { %v1864_v58 = vadd.f32 %v1846_v63, %v1792_v19  ;;  %v1865_v1 = vadd.f32 %v1847_v31, %v1793_v0  ;;  %v1866_v15 = vadd.f32 %v1848_v33, %v1794_v22  ;;  %v1867_v44 = vadd.f32 %v1849_v37, %v1795_v57  ;;  %v4958_v19 = vld [vmem:[#allocation2 + $0x95] sm:$0xff]  ;;  %v4960_v0 = vld [vmem:[#allocation2 + $0x9d] sm:$0x1] }
 0x1a0   :  { %v1868_v16 = vadd.f32 %v1850_v8, %v1796_v38  ;;  %v1869_v49 = vadd.f32 %v1851_v14, %v1797_v56  ;;  %v1870_v5 = vadd.f32 %v1852_v41, %v1798_v34  ;;  %v1871_v13 = vadd.f32 %v1853_v26, %v1799_v21  ;;  %6784 = vst [vmem:[#allocation14_spill] sm:$0xff] %v4958_v19  ;;  %v6786_v21 = vld [vmem:[#allocation29_spill] sm:$0xff] }
 0x1a1   :  { %v1872_v11 = vadd.f32 %v1854_v32, %v1800_v45  ;;  %v1873_v2 = vadd.f32 %v1855_v53, %v1801_v61  ;;  %v1874_v55 = vadd.f32 %v1856_v23, %v1802_v59  ;;  %v1875_v46 = vadd.f32 %v1857_v4, %v1803_v54  ;;  %6785 = vst [vmem:[#allocation25_spill] sm:$0xff] %v4960_v0  ;;  %v6787_v61 = vld [vmem:[#allocation15_spill] sm:$0xff]  ;;  %v6788_v59 = vld [vmem:[#allocation16_spill] sm:$0xff] }
 0x1a2   :  { %v1876_v51 = vadd.f32 %v1858_v62, %v1804_v36  ;;  %v1877_v17 = vadd.f32 %v1859_v60, %v1805_v28  ;;  %v1878_v29 = vadd.f32 %v1860_v12, %v1806_v3  ;;  %v1879_v50 = vadd.f32 %v1861_v18, %v1807_v6  ;;  %v6789_v36 = vld [vmem:[#allocation24_spill] sm:$0xff]  ;;  %v6791_v3 = vld [vmem:[#allocation19_spill] sm:$0xff] }
 0x1a3   :  { %v1884_v52 = vmul.f32 %v4894_v20, %v4876_v48  ;;  %v1885_v35 = vmul.f32 %v4894_v20, %v4878_v27  ;;  %v1886_v22 = vmul.f32 %v4894_v20, %v4880_v42  ;;  %v1887_v57 = vmul.f32 %v4894_v20, %v4882_v47  ;;  %v6793_v63 = vld [vmem:[#allocation31_spill] sm:$0xff] }
 0x1a4   :  { %v1888_v38 = vmul.f32 %v4894_v20, %v4886_v10  ;;  %v1889_v56 = vmul.f32 %v4894_v20, %v4888_v25  ;;  %v1890_v34 = vmul.f32 %v4894_v20, %v4890_v39  ;;  %v1891_v45 = vmul.f32 %v4894_v20, %v6786_v21 }
 0x1a5   :  { %v1892_v48 = vmul.f32 %v4894_v20, %v6787_v61  ;;  %v1893_v54 = vmul.f32 %v4894_v20, %v6788_v59  ;;  %v1894_v27 = vmul.f32 %v4894_v20, %v6789_v36  ;;  %v1895_v28 = vmul.f32 %v4894_v20, %v6790_v43 }
 0x1a6   :  { %v1896_v6 = vmul.f32 %v4894_v20, %v6791_v3  ;;  %v1897_v7 = vmul.f32 %v4894_v20, %v6792_v30  ;;  %v1898_v31 = vmul.f32 %v4894_v20, %v6793_v63  ;;  %v1899_v33 = vmul.f32 %v4894_v20, %v4936_v24 }
 0x1a7   :  { %v1900_v37 = vmul.f32 %v4894_v20, %v4958_v19  ;;  %v1901_v8 = vmul.f32 %v4894_v20, %v4960_v0  ;;  %v1902_v14 = vadd.f32 %v1884_v52, %v1862_v40  ;;  %v1903_v41 = vadd.f32 %v1885_v35, %v1863_v9  ;;  %v6794_v20 = vld [vmem:[#allocation17_spill] sm:$0xff]  ;;  %v6802_v52 = vld [vmem:[#allocation22_spill] sm:$0xff] }
 0x1a8   :  { %v1904_v26 = vadd.f32 %v1886_v22, %v1864_v58  ;;  %v1905_v32 = vadd.f32 %v1887_v57, %v1865_v1  ;;  %v1906_v53 = vadd.f32 %v1888_v38, %v1866_v15  ;;  %v1907_v23 = vadd.f32 %v1889_v56, %v1867_v44  ;;  %v4998_v15 = vld [vmem:[#allocation2 + $0xa5] sm:$0xff]  ;;  %v6801_v58 = vld [vmem:[#allocation31_spill] sm:$0xff] }
 0x1a9   :  { %v1908_v4 = vadd.f32 %v1890_v34, %v1868_v16  ;;  %v1909_v62 = vadd.f32 %v1891_v45, %v1869_v49  ;;  %v1910_v60 = vadd.f32 %v1892_v48, %v1870_v5  ;;  %v1911_v12 = vadd.f32 %v1893_v54, %v1871_v13  ;;  %6795 = vst [vmem:[#allocation23_spill] sm:$0xff] %v4998_v15  ;;  %v5000_v16 = vld [vmem:[#allocation2 + $0xad] sm:$0x1]  ;;  %v6797_v5 = vld [vmem:[#allocation24_spill] sm:$0xff] }
 0x1aa   :  { %v1912_v18 = vadd.f32 %v1894_v27, %v1872_v11  ;;  %v1913_v63 = vadd.f32 %v1895_v28, %v1873_v2  ;;  %v1914_v30 = vadd.f32 %v1896_v6, %v1874_v55  ;;  %v1915_v24 = vadd.f32 %v1897_v7, %v1875_v46  ;;  %6796 = vst [vmem:[#allocation28_spill] sm:$0xff] %v5000_v16  ;;  %v6798_v11 = vld [vmem:[#allocation30_spill] sm:$0xff]  ;;  %v6799_v46 = vld [vmem:[#allocation19_spill] sm:$0xff] }
 0x1ab   :  { %v1916_v3 = vadd.f32 %v1898_v31, %v1876_v51  ;;  %v1917_v43 = vadd.f32 %v1899_v33, %v1877_v17  ;;  %v1918_v19 = vadd.f32 %v1900_v37, %v1878_v29  ;;  %v1919_v36 = vadd.f32 %v1901_v8, %v1879_v50  ;;  %v6800_v17 = vld [vmem:[#allocation12_spill] sm:$0xff]  ;;  %v6803_v22 = vld [vmem:[#allocation14_spill] sm:$0xff] }
 0x1ac   :  { %v1924_v40 = vmul.f32 %v6794_v20, %v4880_v42  ;;  %v1925_v9 = vmul.f32 %v6794_v20, %v4882_v47  ;;  %v1926_v13 = vmul.f32 %v6794_v20, %v4886_v10  ;;  %v1927_v55 = vmul.f32 %v6794_v20, %v4888_v25 }
 0x1ad   :  { %v1928_v29 = vmul.f32 %v6794_v20, %v4890_v39  ;;  %v1929_v51 = vmul.f32 %v6794_v20, %v6786_v21  ;;  %v1930_v42 = vmul.f32 %v6794_v20, %v6787_v61  ;;  %v1931_v47 = vmul.f32 %v6794_v20, %v6788_v59 }
 0x1ae   :  { %v1932_v49 = vmul.f32 %v6794_v20, %v6797_v5  ;;  %v1933_v2 = vmul.f32 %v6794_v20, %v6798_v11  ;;  %v1934_v44 = vmul.f32 %v6794_v20, %v6799_v46  ;;  %v1935_v50 = vmul.f32 %v6794_v20, %v6800_v17 }
 0x1af   :  { %v1936_v1 = vmul.f32 %v6794_v20, %v6801_v58  ;;  %v1937_v35 = vmul.f32 %v6794_v20, %v6802_v52  ;;  %v1938_v57 = vmul.f32 %v6794_v20, %v6803_v22  ;;  %v1939_v38 = vmul.f32 %v6794_v20, %v4960_v0 }
 0x1b0   :  { %v1940_v56 = vmul.f32 %v6794_v20, %v4998_v15  ;;  %v1941_v34 = vmul.f32 %v6794_v20, %v5000_v16  ;;  %v1942_v45 = vadd.f32 %v1924_v40, %v1902_v14  ;;  %v1943_v48 = vadd.f32 %v1925_v9, %v1903_v41  ;;  %v6804_v20 = vld [vmem:[#allocation34_spill] sm:$0xff]  ;;  %v6812_v40 = vld [vmem:[#allocation25_spill] sm:$0xff] }
 0x1b1   :  { %v1944_v54 = vadd.f32 %v1926_v13, %v1904_v26  ;;  %v1945_v27 = vadd.f32 %v1927_v55, %v1905_v32  ;;  %v1946_v28 = vadd.f32 %v1928_v29, %v1906_v53  ;;  %v1947_v6 = vadd.f32 %v1929_v51, %v1907_v23  ;;  %v5038_v26 = vld [vmem:[#allocation2 + $0xb5] sm:$0xff]  ;;  %v5040_v32 = vld [vmem:[#allocation2 + $0xbd] sm:$0x1] }
 0x1b2   :  { %v1948_v7 = vadd.f32 %v1930_v42, %v1908_v4  ;;  %v1949_v31 = vadd.f32 %v1931_v47, %v1909_v62  ;;  %v1950_v33 = vadd.f32 %v1932_v49, %v1910_v60  ;;  %v1951_v37 = vadd.f32 %v1933_v2, %v1911_v12  ;;  %6805 = vst [vmem:[#allocation32_spill] sm:$0xff] %v5038_v26  ;;  %v6809_v23 = vld [vmem:[#allocation31_spill] sm:$0xff]  ;;  %v6810_v62 = vld [vmem:[#allocation22_spill] sm:$0xff] }
 0x1b3   :  { %v1952_v8 = vadd.f32 %v1934_v44, %v1912_v18  ;;  %v1953_v22 = vadd.f32 %v1935_v50, %v1913_v63  ;;  %v1954_v52 = vadd.f32 %v1936_v1, %v1914_v30  ;;  %v1955_v0 = vadd.f32 %v1937_v35, %v1915_v24  ;;  %6806 = vst [vmem:[#allocation21_spill] sm:$0xff] %v5040_v32  ;;  %v6808_v30 = vld [vmem:[#allocation12_spill] sm:$0xff]  ;;  %v6811_v12 = vld [vmem:[#allocation14_spill] sm:$0xff]  ;;  %v6813_v13 = vld [vmem:[#allocation23_spill] sm:$0xff] }
 0x1b4   :  { %v1956_v58 = vadd.f32 %v1938_v57, %v1916_v3  ;;  %v1957_v17 = vadd.f32 %v1939_v38, %v1917_v43  ;;  %v1958_v15 = vadd.f32 %v1940_v56, %v1918_v19  ;;  %v1959_v46 = vadd.f32 %v1941_v34, %v1919_v36  ;;  %v6807_v43 = vld [vmem:[#allocation19_spill] sm:$0xff] }
 0x1b5   :  { %v1964_v14 = vmul.f32 %v6804_v20, %v4886_v10  ;;  %v1965_v41 = vmul.f32 %v6804_v20, %v4888_v25  ;;  %v1966_v53 = vmul.f32 %v6804_v20, %v4890_v39  ;;  %v1967_v24 = vmul.f32 %v6804_v20, %v6786_v21 }
 0x1b6   :  { %v1968_v19 = vmul.f32 %v6804_v20, %v6787_v61  ;;  %v1969_v36 = vmul.f32 %v6804_v20, %v6788_v59  ;;  %v1970_v10 = vmul.f32 %v6804_v20, %v6797_v5  ;;  %v1971_v25 = vmul.f32 %v6804_v20, %v6798_v11 }
 0x1b7   :  { %v1972_v3 = vmul.f32 %v6804_v20, %v6807_v43  ;;  %v1973_v63 = vmul.f32 %v6804_v20, %v6808_v30  ;;  %v1974_v4 = vmul.f32 %v6804_v20, %v6809_v23  ;;  %v1975_v60 = vmul.f32 %v6804_v20, %v6810_v62 }
 0x1b8   :  { %v1976_v18 = vmul.f32 %v6804_v20, %v6811_v12  ;;  %v1977_v9 = vmul.f32 %v6804_v20, %v6812_v40  ;;  %v1978_v55 = vmul.f32 %v6804_v20, %v6813_v13  ;;  %v1979_v29 = vmul.f32 %v6804_v20, %v5000_v16 }
 0x1b9   :  { %v1980_v51 = vmul.f32 %v6804_v20, %v5038_v26  ;;  %v1981_v42 = vmul.f32 %v6804_v20, %v5040_v32  ;;  %v1982_v47 = vadd.f32 %v1964_v14, %v1942_v45  ;;  %v1983_v49 = vadd.f32 %v1965_v41, %v1943_v48  ;;  %v6814_v20 = vld [vmem:[#allocation35_spill] sm:$0xff]  ;;  %v6822_v14 = vld [vmem:[#allocation28_spill] sm:$0xff] }
 0x1ba   :  { %v1984_v2 = vadd.f32 %v1966_v53, %v1944_v54  ;;  %v1985_v44 = vadd.f32 %v1967_v24, %v1945_v27  ;;  %v1986_v50 = vadd.f32 %v1968_v19, %v1946_v28  ;;  %v1987_v1 = vadd.f32 %v1969_v36, %v1947_v6  ;;  %v5078_v54 = vld [vmem:[#allocation2 + $0xc5] sm:$0xff]  ;;  %v5080_v27 = vld [vmem:[#allocation2 + $0xcd] sm:$0x1]  ;;  %v6823_v53 = vld [vmem:[#allocation32_spill] sm:$0xff] }
 0x1bb   :  { %v1988_v35 = vadd.f32 %v1970_v10, %v1948_v7  ;;  %v1989_v57 = vadd.f32 %v1971_v25, %v1949_v31  ;;  %v1990_v38 = vadd.f32 %v1972_v3, %v1950_v33  ;;  %v1991_v56 = vadd.f32 %v1973_v63, %v1951_v37  ;;  %6815 = vst [vmem:[#allocation33_spill] sm:$0xff] %v5078_v54  ;;  %v6819_v6 = vld [vmem:[#allocation14_spill] sm:$0xff]  ;;  %v6820_v31 = vld [vmem:[#allocation25_spill] sm:$0xff]  ;;  %v6821_v37 = vld [vmem:[#allocation23_spill] sm:$0xff] }
 0x1bc   :  { %v1992_v34 = vadd.f32 %v1974_v4, %v1952_v8  ;;  %v1993_v13 = vadd.f32 %v1975_v60, %v1953_v22  ;;  %v1994_v40 = vadd.f32 %v1976_v18, %v1954_v52  ;;  %v1995_v16 = vadd.f32 %v1977_v9, %v1955_v0  ;;  %6816 = vst [vmem:[#allocation36_spill] sm:$0xff] %v5080_v27  ;;  %v6818_v52 = vld [vmem:[#allocation22_spill] sm:$0xff] }
 0x1bd   :  { %v1996_v12 = vadd.f32 %v1978_v55, %v1956_v58  ;;  %v1997_v62 = vadd.f32 %v1979_v29, %v1957_v17  ;;  %v1998_v26 = vadd.f32 %v1980_v51, %v1958_v15  ;;  %v1999_v23 = vadd.f32 %v1981_v42, %v1959_v46  ;;  %v6817_v17 = vld [vmem:[#allocation31_spill] sm:$0xff] }
 0x1be   :  { %v2004_v45 = vmul.f32 %v6814_v20, %v4890_v39  ;;  %v2005_v48 = vmul.f32 %v6814_v20, %v6786_v21  ;;  %v2006_v28 = vmul.f32 %v6814_v20, %v6787_v61  ;;  %v2007_v0 = vmul.f32 %v6814_v20, %v6788_v59 }
 0x1bf   :  { %v2008_v15 = vmul.f32 %v6814_v20, %v6797_v5  ;;  %v2009_v46 = vmul.f32 %v6814_v20, %v6798_v11  ;;  %v2010_v39 = vmul.f32 %v6814_v20, %v6807_v43  ;;  %v2011_v21 = vmul.f32 %v6814_v20, %v6808_v30 }
 0x1c0   :  { %v2012_v58 = vmul.f32 %v6814_v20, %v6817_v17  ;;  %v2013_v22 = vmul.f32 %v6814_v20, %v6818_v52  ;;  %v2014_v7 = vmul.f32 %v6814_v20, %v6819_v6  ;;  %v2015_v33 = vmul.f32 %v6814_v20, %v6820_v31 }
 0x1c1   :  { %v2016_v8 = vmul.f32 %v6814_v20, %v6821_v37  ;;  %v2017_v41 = vmul.f32 %v6814_v20, %v6822_v14  ;;  %v2018_v24 = vmul.f32 %v6814_v20, %v6823_v53  ;;  %v2019_v19 = vmul.f32 %v6814_v20, %v5040_v32 }
 0x1c2   :  { %v2020_v36 = vmul.f32 %v6814_v20, %v5078_v54  ;;  %v2021_v10 = vmul.f32 %v6814_v20, %v5080_v27  ;;  %v2022_v25 = vadd.f32 %v2004_v45, %v1982_v47  ;;  %v2023_v3 = vadd.f32 %v2005_v48, %v1983_v49  ;;  %v6824_v20 = vld [vmem:[#allocation26_spill] sm:$0xff]  ;;  %v6832_v45 = vld [vmem:[#allocation21_spill] sm:$0xff] }
 0x1c3   :  { %v2024_v63 = vadd.f32 %v2006_v28, %v1984_v2  ;;  %v2025_v4 = vadd.f32 %v2007_v0, %v1985_v44  ;;  %v2026_v60 = vadd.f32 %v2008_v15, %v1986_v50  ;;  %v2027_v18 = vadd.f32 %v2009_v46, %v1987_v1  ;;  %v5118_v2 = vld [vmem:[#allocation2 + $0xd5] sm:$0xff]  ;;  %v5120_v44 = vld [vmem:[#allocation2 + $0xdd] sm:$0x1]  ;;  %v6833_v28 = vld [vmem:[#allocation33_spill] sm:$0xff] }
 0x1c4   :  { %v2028_v9 = vadd.f32 %v2010_v39, %v1988_v35  ;;  %v2029_v55 = vadd.f32 %v2011_v21, %v1989_v57  ;;  %v2030_v29 = vadd.f32 %v2012_v58, %v1990_v38  ;;  %v2031_v51 = vadd.f32 %v2013_v22, %v1991_v56  ;;  %6825 = vst [vmem:[#allocation18_spill] sm:$0xff] %v5118_v2  ;;  %v6829_v1 = vld [vmem:[#allocation23_spill] sm:$0xff]  ;;  %v6830_v57 = vld [vmem:[#allocation28_spill] sm:$0xff] }
 0x1c5   :  { %v2032_v42 = vadd.f32 %v2014_v7, %v1992_v34  ;;  %v2033_v53 = vadd.f32 %v2015_v33, %v1993_v13  ;;  %v2034_v14 = vadd.f32 %v2016_v8, %v1994_v40  ;;  %v2035_v32 = vadd.f32 %v2017_v41, %v1995_v16  ;;  %6826 = vst [vmem:[#allocation13_spill] sm:$0xff] %v5120_v44  ;;  %v6828_v40 = vld [vmem:[#allocation25_spill] sm:$0xff]  ;;  %v6831_v56 = vld [vmem:[#allocation32_spill] sm:$0xff] }
 0x1c6   :  { %v2036_v37 = vadd.f32 %v2018_v24, %v1996_v12  ;;  %v2037_v31 = vadd.f32 %v2019_v19, %v1997_v62  ;;  %v2038_v54 = vadd.f32 %v2020_v36, %v1998_v26  ;;  %v2039_v6 = vadd.f32 %v2021_v10, %v1999_v23  ;;  %v6827_v62 = vld [vmem:[#allocation14_spill] sm:$0xff] }
 0x1c7   :  { %v2044_v47 = vmul.f32 %v6824_v20, %v6787_v61  ;;  %v2045_v49 = vmul.f32 %v6824_v20, %v6788_v59  ;;  %v2046_v50 = vmul.f32 %v6824_v20, %v6797_v5  ;;  %v2047_v16 = vmul.f32 %v6824_v20, %v6798_v11 }
 0x1c8   :  { %v2048_v26 = vmul.f32 %v6824_v20, %v6807_v43  ;;  %v2049_v23 = vmul.f32 %v6824_v20, %v6808_v30  ;;  %v2050_v61 = vmul.f32 %v6824_v20, %v6817_v17  ;;  %v2051_v59 = vmul.f32 %v6824_v20, %v6818_v52 }
 0x1c9   :  { %v2052_v12 = vmul.f32 %v6824_v20, %v6827_v62  ;;  %v2053_v13 = vmul.f32 %v6824_v20, %v6828_v40  ;;  %v2054_v35 = vmul.f32 %v6824_v20, %v6829_v1  ;;  %v2055_v38 = vmul.f32 %v6824_v20, %v6830_v57 }
 0x1ca   :  { %v2056_v34 = vmul.f32 %v6824_v20, %v6831_v56  ;;  %v2057_v48 = vmul.f32 %v6824_v20, %v6832_v45  ;;  %v2058_v0 = vmul.f32 %v6824_v20, %v6833_v28  ;;  %v2059_v15 = vmul.f32 %v6824_v20, %v5080_v27 }
 0x1cb   :  { %v2060_v46 = vmul.f32 %v6824_v20, %v5118_v2  ;;  %v2061_v39 = vmul.f32 %v6824_v20, %v5120_v44  ;;  %v2062_v21 = vadd.f32 %v2044_v47, %v2022_v25  ;;  %v2063_v58 = vadd.f32 %v2045_v49, %v2023_v3  ;;  %v6834_v20 = vld [vmem:[#allocation20_spill] sm:$0xff] }
 0x1cc   :  { %v2064_v22 = vadd.f32 %v2046_v50, %v2024_v63  ;;  %v2065_v7 = vadd.f32 %v2047_v16, %v2025_v4  ;;  %v2066_v33 = vadd.f32 %v2048_v26, %v2026_v60  ;;  %v2067_v8 = vadd.f32 %v2049_v23, %v2027_v18  ;;  %v1836_v63 = vld [vmem:[#allocation2 + $0xe5] sm:$0xff]  ;;  %v1837_v4 = vld [vmem:[#allocation2 + $0xed] sm:$0x1]  ;;  %v6837_v18 = vld [vmem:[#allocation32_spill] sm:$0xff] }
 0x1cd   :  { %v2068_v41 = vadd.f32 %v2050_v61, %v2028_v9  ;;  %v2069_v24 = vadd.f32 %v2051_v59, %v2029_v55  ;;  %v2070_v19 = vadd.f32 %v2052_v12, %v2030_v29  ;;  %v2071_v36 = vadd.f32 %v2053_v13, %v2031_v51  ;;  %v6838_v55 = vld [vmem:[#allocation21_spill] sm:$0xff]  ;;  %v6840_v47 = vld [vmem:[#allocation36_spill] sm:$0xff]  ;;  %v6841_v50 = vld [vmem:[#allocation18_spill] sm:$0xff] }
 0x1ce   :  { %v2072_v10 = vadd.f32 %v2054_v35, %v2032_v42  ;;  %v2073_v28 = vadd.f32 %v2055_v38, %v2033_v53  ;;  %v2074_v45 = vadd.f32 %v2056_v34, %v2034_v14  ;;  %v2075_v27 = vadd.f32 %v2057_v48, %v2035_v32  ;;  %v6839_v51 = vld [vmem:[#allocation33_spill] sm:$0xff] }
 0x1cf   :  { %v2076_v56 = vadd.f32 %v2058_v0, %v2036_v37  ;;  %v2077_v57 = vadd.f32 %v2059_v15, %v2037_v31  ;;  %v2078_v2 = vadd.f32 %v2060_v46, %v2038_v54  ;;  %v2079_v1 = vadd.f32 %v2061_v39, %v2039_v6  ;;  %v6835_v6 = vld [vmem:[#allocation23_spill] sm:$0xff]  ;;  %v6836_v37 = vld [vmem:[#allocation28_spill] sm:$0xff] }
 0x1d0   :  { %v2084_v25 = vmul.f32 %v6834_v20, %v6797_v5  ;;  %v2085_v3 = vmul.f32 %v6834_v20, %v6798_v11  ;;  %v2086_v60 = vmul.f32 %v6834_v20, %v6807_v43  ;;  %v2087_v53 = vmul.f32 %v6834_v20, %v6808_v30 }
 0x1d1   :  { %v2088_v32 = vmul.f32 %v6834_v20, %v6817_v17  ;;  %v2089_v54 = vmul.f32 %v6834_v20, %v6818_v52  ;;  %v2090_v5 = vmul.f32 %v6834_v20, %v6827_v62  ;;  %v2091_v11 = vmul.f32 %v6834_v20, %v6828_v40 }
 0x1d2   :  { %v2092_v31 = vmul.f32 %v6834_v20, %v6835_v6  ;;  %v2093_v14 = vmul.f32 %v6834_v20, %v6836_v37  ;;  %v2094_v9 = vmul.f32 %v6834_v20, %v6837_v18  ;;  %v2095_v29 = vmul.f32 %v6834_v20, %v6838_v55 }
 0x1d3   :  { %v2096_v42 = vmul.f32 %v6834_v20, %v6839_v51  ;;  %v2097_v49 = vmul.f32 %v6834_v20, %v6840_v47  ;;  %v2098_v16 = vmul.f32 %v6834_v20, %v6841_v50  ;;  %v2099_v26 = vmul.f32 %v6834_v20, %v5120_v44 }
 0x1d4   :  { %v2100_v23 = vmul.f32 %v6834_v20, %v1836_v63  ;;  %v2101_v61 = vmul.f32 %v6834_v20, %v1837_v4  ;;  %v2102_v59 = vadd.f32 %v2084_v25, %v2062_v21  ;;  %v2103_v12 = vadd.f32 %v2085_v3, %v2063_v58  ;;  %v6842_v20 = vld [vmem:[#allocation27_spill] sm:$0xff] }
 0x1d5   :  { %v2104_v13 = vadd.f32 %v2086_v60, %v2064_v22  ;;  %v2105_v35 = vadd.f32 %v2087_v53, %v2065_v7  ;;  %v2106_v38 = vadd.f32 %v2088_v32, %v2066_v33  ;;  %v2107_v34 = vadd.f32 %v2089_v54, %v2067_v8  ;;  %v1838_v22 = vld [vmem:[#allocation2 + $0xf5] sm:$0xff]  ;;  %v1839_v7 = vld [vmem:[#allocation2 + $0xfd] sm:$0x1]  ;;  %v6846_v8 = vld [vmem:[#allocation33_spill] sm:$0xff] }
 0x1d6   :  { %v2108_v48 = vadd.f32 %v2090_v5, %v2068_v41  ;;  %v2109_v0 = vadd.f32 %v2091_v11, %v2069_v24  ;;  %v2110_v15 = vadd.f32 %v2092_v31, %v2070_v19  ;;  %v2111_v46 = vadd.f32 %v2093_v14, %v2071_v36  ;;  %v6847_v41 = vld [vmem:[#allocation36_spill] sm:$0xff]  ;;  %v6848_v24 = vld [vmem:[#allocation18_spill] sm:$0xff]  ;;  %v6849_v19 = vld [vmem:[#allocation13_spill] sm:$0xff] }
 0x1d7   :  { %v2112_v39 = vadd.f32 %v2094_v9, %v2072_v10  ;;  %v2113_v47 = vadd.f32 %v2095_v29, %v2073_v28  ;;  %v2114_v50 = vadd.f32 %v2096_v42, %v2074_v45  ;;  %v2115_v51 = vadd.f32 %v2097_v49, %v2075_v27  ;;  %v6845_v45 = vld [vmem:[#allocation21_spill] sm:$0xff] }
 0x1d8   :  { %v2116_v55 = vadd.f32 %v2098_v16, %v2076_v56  ;;  %v2117_v44 = vadd.f32 %v2099_v26, %v2077_v57  ;;  %v2118_v18 = vadd.f32 %v2100_v23, %v2078_v2  ;;  %v2119_v37 = vadd.f32 %v2101_v61, %v2079_v1  ;;  %v6843_v1 = vld [vmem:[#allocation28_spill] sm:$0xff]  ;;  %v2160_v42 = vld [vmem:[#allocation2 + $0x6] sm:$0xff]  ;;  %v2161_v23 = vld [vmem:[#allocation2 + $0xe] sm:$0x1] }
 0x1d9   :  { %v2124_v21 = vmul.f32 %v6842_v20, %v6807_v43  ;;  %v2125_v58 = vmul.f32 %v6842_v20, %v6808_v30  ;;  %v2126_v33 = vmul.f32 %v6842_v20, %v6817_v17  ;;  %v2127_v28 = vmul.f32 %v6842_v20, %v6818_v52  ;;  %v6844_v57 = vld [vmem:[#allocation32_spill] sm:$0xff] }
 0x1da   :  { %v2128_v27 = vmul.f32 %v6842_v20, %v6827_v62  ;;  %v2129_v2 = vmul.f32 %v6842_v20, %v6828_v40  ;;  %v2130_v43 = vmul.f32 %v6842_v20, %v6835_v6  ;;  %v2131_v30 = vmul.f32 %v6842_v20, %v6843_v1  ;;  %v5250_v61 = vld [vmem:[#allocation2 + $0x16] sm:$0xff] }
 0x1db   :  { %v2132_v56 = vmul.f32 %v6842_v20, %v6844_v57  ;;  %v2133_v17 = vmul.f32 %v6842_v20, %v6845_v45  ;;  %v2134_v52 = vmul.f32 %v6842_v20, %v6846_v8  ;;  %v2135_v62 = vmul.f32 %v6842_v20, %v6847_v41  ;;  %v5310_v1 = vld [vmem:[#allocation5 + $0x30] sm:$0xff]  ;;  %v5315_v57 = vld [vmem:[#allocation5 + $0x38] sm:$0xff]  ;;  %v5320_v45 = vld [vmem:[#allocation2 + $0x6e] sm:$0x1] }
 0x1dc   :  { %v2136_v40 = vmul.f32 %v6842_v20, %v6848_v24  ;;  %v2137_v36 = vmul.f32 %v6842_v20, %v6849_v19  ;;  %v2138_v10 = vmul.f32 %v6842_v20, %v1836_v63  ;;  %v2139_v25 = vmul.f32 %v6842_v20, %v1837_v4  ;;  %6863 = vst [vmem:[#allocation26_spill] sm:$0xff] %v5310_v1  ;;  %v5324_v8 = vld [vmem:[#allocation2 + $0x7e] sm:$0x1]  ;;  %v5330_v19 = vld [vmem:[#allocation2 + $0x8e] sm:$0x1] }
 0x1dd   :  { %v2140_v3 = vmul.f32 %v6842_v20, %v1838_v22  ;;  %v2141_v60 = vmul.f32 %v6842_v20, %v1839_v7  ;;  %v5220_v53 = vadd.f32 %v2124_v21, %v2102_v59  ;;  %v5222_v32 = vadd.f32 %v2125_v58, %v2103_v12  ;;  %v5252_v59 = vld [vmem:[#allocation2 + $0x1e] sm:$0x1]  ;;  %v6850_v12 = vld [vmem:[#allocation11_spill] sm:$0xff]  ;;  %6865 = vst [vmem:[#allocation25_spill] sm:$0xff] %v5315_v57 }
 0x1de   :  { %v5224_v54 = vadd.f32 %v2126_v33, %v2104_v13  ;;  %v5226_v5 = vadd.f32 %v2127_v28, %v2105_v35  ;;  %v5228_v11 = vadd.f32 %v2128_v27, %v2106_v38  ;;  %v5230_v6 = vadd.f32 %v2129_v2, %v2107_v34  ;;  %v5261_v34 = vld [vmem:[#allocation2 + $0x26] sm:$0xff]  ;;  %v5289_v21 = vld [vmem:[#allocation5 + $0x18] sm:$0xff]  ;;  %6867 = vst [vmem:[#allocation23_spill] sm:$0xff] %v5320_v45 }
 0x1df   :  { %v5232_v31 = vadd.f32 %v2130_v43, %v2108_v48  ;;  %v5234_v63 = vadd.f32 %v2131_v30, %v2109_v0  ;;  %v5236_v4 = vadd.f32 %v2132_v56, %v2110_v15  ;;  %v5238_v14 = vadd.f32 %v2133_v17, %v2111_v46  ;;  %v5270_v48 = vld [vmem:[#allocation2 + $0x3e] sm:$0x1]  ;;  %v5272_v0 = vld [vmem:[#allocation2 + $0x46] sm:$0xff]  ;;  %v5274_v15 = vld [vmem:[#allocation2 + $0x4e] sm:$0x1]  ;;  %6855 = vst [vmem:[#allocation24_spill] sm:$0xff] %v5289_v21 }
 0x1e0   :  { %v5240_v9 = vadd.f32 %v2134_v52, %v2112_v39  ;;  %v5242_v29 = vadd.f32 %v2135_v62, %v2113_v47  ;;  %v5244_v49 = vadd.f32 %v2136_v40, %v2114_v50  ;;  %v5246_v16 = vadd.f32 %v2137_v36, %v2115_v51  ;;  %v5263_v50 = vld [vmem:[#allocation2 + $0x2e] sm:$0x1]  ;;  %v5265_v51 = vld [vmem:[#allocation2 + $0x36] sm:$0xff]  ;;  %v5296_v7 = vld [vmem:[#allocation2 + $0x5e] sm:$0x1]  ;;  %6869 = vst [vmem:[#allocation28_spill] sm:$0xff] %v5324_v8 }
 0x1e1   :  { %v5248_v26 = vadd.f32 %v2138_v10, %v2116_v55  ;;  %v2194_v13 = vsub.s32 6, %v6850_v12  ;;  %v5255_v35 = vadd.f32 %v2139_v25, %v2117_v44  ;;  %v5257_v38 = vadd.f32 %v2140_v3, %v2118_v18  ;;  %v5276_v44 = vld [vmem:[#allocation5] sm:$0xff]  ;;  %v5279_v18 = vld [vmem:[#allocation5 + $0x8] sm:$0xff]  ;;  %v5284_v39 = vld [vmem:[#allocation5 + $0x10] sm:$0xff]  ;;  %6857 = vst [vmem:[#allocation34_spill] sm:$0xff] %v5296_v7 }
 0x1e2   :  { %v5259_v47 = vadd.f32 %v2141_v60, %v2119_v37  ;;  %v5268_v55 = vsub.s32 7, %v6850_v12  ;;  %6852 = vst [vmem:[#allocation15_spill] sm:$0xff] %v5276_v44  ;;  %6853 = vst [vmem:[#allocation16_spill] sm:$0xff] %v5279_v18  ;;  %v5294_v22 = vld [vmem:[#allocation2 + $0x56] sm:$0xff]  ;;  %v5298_v33 = vld [vmem:[#allocation2 + $0x66] sm:$0xff] }
 0x1e3   :  { %v2195_v37 = vrot.slane %v5276_v44, %v2194_v13  ;;  %v5282_v46 = vrot.slane %v5279_v18, %v2194_v13  ;;  %6854 = vst [vmem:[#allocation17_spill] sm:$0xff] %v5284_v39  ;;  %v5287_v20 = vrot.slane %v5284_v39, %v2194_v13  ;;  %v5292_v58 = vrot.slane %v5289_v21, %v2194_v13  ;;  %v5300_v28 = vld [vmem:[#allocation5 + $0x20] sm:$0xff]  ;;  %v5305_v2 = vld [vmem:[#allocation5 + $0x28] sm:$0xff]  ;;  %v5322_v17 = vld [vmem:[#allocation2 + $0x76] sm:$0xff] }
 0x1e4   :  { %6851 = vst [vmem:[#allocation29_spill] sm:$0xff] %v5268_v55  ;;  %6858 = vst [vmem:[#allocation19_spill] sm:$0xff] %v5298_v33  ;;  %v5303_v27 = vrot.slane %v5300_v28, %v2194_v13  ;;  %v5308_v43 = vrot.slane %v5305_v2, %v2194_v13  ;;  %v5313_v30 = vrot.slane %v5310_v1, %v2194_v13  ;;  %v5328_v40 = vld [vmem:[#allocation2 + $0x86] sm:$0xff] }
 0x1e5   :  { %6856 = vst [vmem:[#allocation30_spill] sm:$0xff] %v5292_v58  ;;  %6859 = vst [vmem:[#allocation12_spill] sm:$0xff] %v5300_v28  ;;  %v5318_v56 = vrot.slane %v5315_v57, %v2194_v13  ;;  %v2196_v52 = vmul.f32 %v2195_v37, %v2160_v42  ;;  %v2197_v41 = vmul.f32 %v2195_v37, %v2161_v23 }
 0x1e6   :  { %6860 = vst [vmem:[#allocation35_spill] sm:$0xff] %v5303_v27  ;;  %6861 = vst [vmem:[#allocation31_spill] sm:$0xff] %v5305_v2  ;;  %v2198_v62 = vmul.f32 %v2195_v37, %v5250_v61  ;;  %v2199_v24 = vmul.f32 %v2195_v37, %v5252_v59  ;;  %v2200_v36 = vmul.f32 %v2195_v37, %v5261_v34 }
 0x1e7   :  { %6862 = vst [vmem:[#allocation22_spill] sm:$0xff] %v5308_v43  ;;  %6864 = vst [vmem:[#allocation14_spill] sm:$0xff] %v5313_v30  ;;  %v2201_v10 = vmul.f32 %v2195_v37, %v5263_v50  ;;  %v2202_v25 = vmul.f32 %v2195_v37, %v5265_v51  ;;  %v2203_v3 = vmul.f32 %v2195_v37, %v5270_v48 }
 0x1e8   :  { %6866 = vst [vmem:[#allocation20_spill] sm:$0xff] %v5318_v56  ;;  %6868 = vst [vmem:[#allocation27_spill] sm:$0xff] %v5322_v17  ;;  %v2204_v60 = vmul.f32 %v2195_v37, %v5272_v0  ;;  %v2205_v42 = vmul.f32 %v2195_v37, %v5274_v15  ;;  %v2206_v23 = vmul.f32 %v2195_v37, %v5294_v22 }
 0x1e9   :  { %6870 = vst [vmem:[#allocation32_spill] sm:$0xff] %v5328_v40  ;;  %6871 = vst [vmem:[#allocation21_spill] sm:$0xff] %v5330_v19  ;;  %v2207_v12 = vmul.f32 %v2195_v37, %v5296_v7  ;;  %v2208_v13 = vmul.f32 %v2195_v37, %v5298_v33  ;;  %v2209_v57 = vmul.f32 %v2195_v37, %v5320_v45 }
 0x1ea   :  { %v2210_v1 = vmul.f32 %v2195_v37, %v5322_v17  ;;  %v2211_v2 = vmul.f32 %v2195_v37, %v5324_v8  ;;  %v2212_v28 = vmul.f32 %v2195_v37, %v5328_v40  ;;  %v2213_v21 = vmul.f32 %v2195_v37, %v5330_v19 }
 0x1eb   :  { %v2214_v39 = vadd.f32 %v2196_v52, %v5220_v53  ;;  %v2215_v18 = vadd.f32 %v2197_v41, %v5222_v32  ;;  %v2216_v44 = vadd.f32 %v2198_v62, %v5224_v54  ;;  %v2217_v55 = vadd.f32 %v2199_v24, %v5226_v5 }
 0x1ec   :  { %v2218_v56 = vadd.f32 %v2200_v36, %v5228_v11  ;;  %v2219_v30 = vadd.f32 %v2201_v10, %v5230_v6  ;;  %v2220_v43 = vadd.f32 %v2202_v25, %v5232_v31  ;;  %v2221_v27 = vadd.f32 %v2203_v3, %v5234_v63 }
 0x1ed   :  { %v2222_v58 = vadd.f32 %v2204_v60, %v5236_v4  ;;  %v2223_v37 = vadd.f32 %v2205_v42, %v5238_v14  ;;  %v2224_v53 = vadd.f32 %v2206_v23, %v5240_v9  ;;  %v2225_v32 = vadd.f32 %v2207_v12, %v5242_v29 }
 0x1ee   :  { %v2226_v54 = vadd.f32 %v2208_v13, %v5244_v49  ;;  %v2227_v5 = vadd.f32 %v2209_v57, %v5246_v16  ;;  %v2228_v11 = vadd.f32 %v2210_v1, %v5248_v26  ;;  %v2229_v6 = vadd.f32 %v2211_v2, %v5255_v35  ;;  %v5372_v49 = vld [vmem:[#allocation2 + $0x96] sm:$0xff]  ;;  %v5374_v16 = vld [vmem:[#allocation2 + $0x9e] sm:$0x1] }
 0x1ef   :  { %v2230_v31 = vadd.f32 %v2212_v28, %v5257_v38  ;;  %v2231_v63 = vadd.f32 %v2213_v21, %v5259_v47  ;;  %v2236_v4 = vmul.f32 %v5282_v46, %v5250_v61  ;;  %v2237_v14 = vmul.f32 %v5282_v46, %v5252_v59  ;;  %6872 = vst [vmem:[#allocation33_spill] sm:$0xff] %v5372_v49 }
 0x1f0   :  { %v2238_v9 = vmul.f32 %v5282_v46, %v5261_v34  ;;  %v2239_v29 = vmul.f32 %v5282_v46, %v5263_v50  ;;  %6873 = vst [vmem:[#allocation36_spill] sm:$0xff] %v5374_v16  ;;  %v2240_v26 = vmul.f32 %v5282_v46, %v5265_v51  ;;  %v2241_v35 = vmul.f32 %v5282_v46, %v5270_v48 }
 0x1f1   :  { %v2242_v61 = vmul.f32 %v5282_v46, %v5272_v0  ;;  %v2243_v59 = vmul.f32 %v5282_v46, %v5274_v15  ;;  %v2244_v38 = vmul.f32 %v5282_v46, %v5294_v22  ;;  %v2245_v47 = vmul.f32 %v5282_v46, %v5296_v7 }
 0x1f2   :  { %v2246_v21 = vmul.f32 %v5282_v46, %v5298_v33  ;;  %v2247_v28 = vmul.f32 %v5282_v46, %v5320_v45  ;;  %v2248_v2 = vmul.f32 %v5282_v46, %v5322_v17  ;;  %v2249_v1 = vmul.f32 %v5282_v46, %v5324_v8 }
 0x1f3   :  { %v2250_v57 = vmul.f32 %v5282_v46, %v5328_v40  ;;  %v2251_v52 = vmul.f32 %v5282_v46, %v5330_v19  ;;  %v2252_v41 = vmul.f32 %v5282_v46, %v5372_v49  ;;  %v2253_v62 = vmul.f32 %v5282_v46, %v5374_v16 }
 0x1f4   :  { %v2254_v24 = vadd.f32 %v2236_v4, %v2214_v39  ;;  %v2255_v36 = vadd.f32 %v2237_v14, %v2215_v18  ;;  %v2256_v10 = vadd.f32 %v2238_v9, %v2216_v44  ;;  %v2257_v25 = vadd.f32 %v2239_v29, %v2217_v55  ;;  %v5412_v39 = vld [vmem:[#allocation2 + $0xa6] sm:$0xff] }
 0x1f5   :  { %v2258_v3 = vadd.f32 %v2240_v26, %v2218_v56  ;;  %v2259_v60 = vadd.f32 %v2241_v35, %v2219_v30  ;;  %v2260_v42 = vadd.f32 %v2242_v61, %v2220_v43  ;;  %v2261_v23 = vadd.f32 %v2243_v59, %v2221_v27  ;;  %6874 = vst [vmem:[#allocation18_spill] sm:$0xff] %v5412_v39  ;;  %v6877_v56 = vld [vmem:[#allocation19_spill] sm:$0xff]  ;;  %v6882_v4 = vld [vmem:[#allocation21_spill] sm:$0xff] }
 0x1f6   :  { %v2262_v12 = vadd.f32 %v2244_v38, %v2222_v58  ;;  %v2263_v13 = vadd.f32 %v2245_v47, %v2223_v37  ;;  %v2264_v40 = vadd.f32 %v2246_v21, %v2224_v53  ;;  %v2265_v8 = vadd.f32 %v2247_v28, %v2225_v32  ;;  %v5414_v58 = vld [vmem:[#allocation2 + $0xae] sm:$0x1]  ;;  %v6878_v53 = vld [vmem:[#allocation23_spill] sm:$0xff]  ;;  %v6883_v9 = vld [vmem:[#allocation33_spill] sm:$0xff] }
 0x1f7   :  { %v2266_v17 = vadd.f32 %v2248_v2, %v2226_v54  ;;  %v2267_v19 = vadd.f32 %v2249_v1, %v2227_v5  ;;  %v2268_v45 = vadd.f32 %v2250_v57, %v2228_v11  ;;  %v2269_v33 = vadd.f32 %v2251_v52, %v2229_v6  ;;  %6875 = vst [vmem:[#allocation13_spill] sm:$0xff] %v5414_v58  ;;  %v6879_v54 = vld [vmem:[#allocation27_spill] sm:$0xff]  ;;  %v6880_v11 = vld [vmem:[#allocation28_spill] sm:$0xff] }
 0x1f8   :  { %v2270_v49 = vadd.f32 %v2252_v41, %v2230_v31  ;;  %v2271_v7 = vadd.f32 %v2253_v62, %v2231_v63  ;;  %v2276_v46 = vmul.f32 %v5287_v20, %v5261_v34  ;;  %v2277_v55 = vmul.f32 %v5287_v20, %v5263_v50  ;;  %v6876_v50 = vld [vmem:[#allocation34_spill] sm:$0xff]  ;;  %v6881_v31 = vld [vmem:[#allocation32_spill] sm:$0xff] }
 0x1f9   :  { %v2278_v44 = vmul.f32 %v5287_v20, %v5265_v51  ;;  %v2279_v18 = vmul.f32 %v5287_v20, %v5270_v48  ;;  %v2280_v27 = vmul.f32 %v5287_v20, %v5272_v0  ;;  %v2281_v43 = vmul.f32 %v5287_v20, %v5274_v15 }
 0x1fa   :  { %v2282_v34 = vmul.f32 %v5287_v20, %v5294_v22  ;;  %v2283_v30 = vmul.f32 %v5287_v20, %v6876_v50  ;;  %v2284_v37 = vmul.f32 %v5287_v20, %v6877_v56  ;;  %v2285_v32 = vmul.f32 %v5287_v20, %v6878_v53 }
 0x1fb   :  { %v2286_v5 = vmul.f32 %v5287_v20, %v6879_v54  ;;  %v2287_v6 = vmul.f32 %v5287_v20, %v6880_v11  ;;  %v2288_v63 = vmul.f32 %v5287_v20, %v6881_v31  ;;  %v2289_v14 = vmul.f32 %v5287_v20, %v6882_v4 }
 0x1fc   :  { %v2290_v29 = vmul.f32 %v5287_v20, %v6883_v9  ;;  %v2291_v26 = vmul.f32 %v5287_v20, %v5374_v16  ;;  %v2292_v35 = vmul.f32 %v5287_v20, %v5412_v39  ;;  %v2293_v61 = vmul.f32 %v5287_v20, %v5414_v58  ;;  %v6884_v20 = vld [vmem:[#allocation30_spill] sm:$0xff] }
 0x1fd   :  { %v2294_v59 = vadd.f32 %v2276_v46, %v2254_v24  ;;  %v2295_v38 = vadd.f32 %v2277_v55, %v2255_v36  ;;  %v2296_v47 = vadd.f32 %v2278_v44, %v2256_v10  ;;  %v2297_v21 = vadd.f32 %v2279_v18, %v2257_v25  ;;  %v6892_v46 = vld [vmem:[#allocation36_spill] sm:$0xff]  ;;  %v6893_v44 = vld [vmem:[#allocation18_spill] sm:$0xff] }
 0x1fe   :  { %v2298_v28 = vadd.f32 %v2280_v27, %v2258_v3  ;;  %v2299_v2 = vadd.f32 %v2281_v43, %v2259_v60  ;;  %v2300_v1 = vadd.f32 %v2282_v34, %v2260_v42  ;;  %v2301_v57 = vadd.f32 %v2283_v30, %v2261_v23  ;;  %v6889_v3 = vld [vmem:[#allocation32_spill] sm:$0xff]  ;;  %v6890_v42 = vld [vmem:[#allocation21_spill] sm:$0xff] }
 0x1ff   :  { %v2302_v52 = vadd.f32 %v2284_v37, %v2262_v12  ;;  %v2303_v41 = vadd.f32 %v2285_v32, %v2263_v13  ;;  %v2304_v62 = vadd.f32 %v2286_v5, %v2264_v40  ;;  %v2305_v9 = vadd.f32 %v2287_v6, %v2265_v8  ;;  %v5452_v40 = vld [vmem:[#allocation2 + $0xb6] sm:$0xff]  ;;  %v6891_v12 = vld [vmem:[#allocation33_spill] sm:$0xff] }
 0x200   :  { %v2306_v4 = vadd.f32 %v2288_v63, %v2266_v17  ;;  %v2307_v16 = vadd.f32 %v2289_v14, %v2267_v19  ;;  %v2308_v31 = vadd.f32 %v2290_v29, %v2268_v45  ;;  %v2309_v11 = vadd.f32 %v2291_v26, %v2269_v33  ;;  %6885 = vst [vmem:[#allocation11_spill] sm:$0xff] %v5452_v40  ;;  %v5454_v17 = vld [vmem:[#allocation2 + $0xbe] sm:$0x1]  ;;  %v6887_v45 = vld [vmem:[#allocation27_spill] sm:$0xff] }
 0x201   :  { %v2310_v39 = vadd.f32 %v2292_v35, %v2270_v49  ;;  %v2311_v54 = vadd.f32 %v2293_v61, %v2271_v7  ;;  %v2316_v24 = vmul.f32 %v6884_v20, %v5265_v51  ;;  %v2317_v36 = vmul.f32 %v6884_v20, %v5270_v48  ;;  %6886 = vst [vmem:[#allocation34_spill] sm:$0xff] %v5454_v17  ;;  %v6888_v19 = vld [vmem:[#allocation28_spill] sm:$0xff] }
 0x202   :  { %v2318_v10 = vmul.f32 %v6884_v20, %v5272_v0  ;;  %v2319_v25 = vmul.f32 %v6884_v20, %v5274_v15  ;;  %v2320_v33 = vmul.f32 %v6884_v20, %v5294_v22  ;;  %v2321_v7 = vmul.f32 %v6884_v20, %v6876_v50 }
 0x203   :  { %v2322_v51 = vmul.f32 %v6884_v20, %v6877_v56  ;;  %v2323_v48 = vmul.f32 %v6884_v20, %v6878_v53  ;;  %v2324_v8 = vmul.f32 %v6884_v20, %v6887_v45  ;;  %v2325_v49 = vmul.f32 %v6884_v20, %v6888_v19 }
 0x204   :  { %v2326_v60 = vmul.f32 %v6884_v20, %v6889_v3  ;;  %v2327_v23 = vmul.f32 %v6884_v20, %v6890_v42  ;;  %v2328_v13 = vmul.f32 %v6884_v20, %v6891_v12  ;;  %v2329_v55 = vmul.f32 %v6884_v20, %v6892_v46 }
 0x205   :  { %v2330_v18 = vmul.f32 %v6884_v20, %v6893_v44  ;;  %v2331_v27 = vmul.f32 %v6884_v20, %v5414_v58  ;;  %v2332_v43 = vmul.f32 %v6884_v20, %v5452_v40  ;;  %v2333_v34 = vmul.f32 %v6884_v20, %v5454_v17  ;;  %v6894_v20 = vld [vmem:[#allocation35_spill] sm:$0xff] }
 0x206   :  { %v2334_v30 = vadd.f32 %v2316_v24, %v2294_v59  ;;  %v2335_v37 = vadd.f32 %v2317_v36, %v2295_v38  ;;  %v2336_v32 = vadd.f32 %v2318_v10, %v2296_v47  ;;  %v2337_v5 = vadd.f32 %v2319_v25, %v2297_v21  ;;  %v6902_v24 = vld [vmem:[#allocation13_spill] sm:$0xff] }
 0x207   :  { %v2338_v6 = vadd.f32 %v2320_v33, %v2298_v28  ;;  %v2339_v63 = vadd.f32 %v2321_v7, %v2299_v2  ;;  %v2340_v14 = vadd.f32 %v2322_v51, %v2300_v1  ;;  %v2341_v29 = vadd.f32 %v2323_v48, %v2301_v57  ;;  %v5492_v28 = vld [vmem:[#allocation2 + $0xc6] sm:$0xff]  ;;  %v6900_v57 = vld [vmem:[#allocation36_spill] sm:$0xff]  ;;  %v6903_v10 = vld [vmem:[#allocation11_spill] sm:$0xff] }
 0x208   :  { %v2342_v26 = vadd.f32 %v2324_v8, %v2302_v52  ;;  %v2343_v35 = vadd.f32 %v2325_v49, %v2303_v41  ;;  %v2344_v61 = vadd.f32 %v2326_v60, %v2304_v62  ;;  %v2345_v44 = vadd.f32 %v2327_v23, %v2305_v9  ;;  %6895 = vst [vmem:[#allocation19_spill] sm:$0xff] %v5492_v28  ;;  %v6899_v2 = vld [vmem:[#allocation33_spill] sm:$0xff]  ;;  %v6901_v41 = vld [vmem:[#allocation18_spill] sm:$0xff] }
 0x209   :  { %v2346_v46 = vadd.f32 %v2328_v13, %v2306_v4  ;;  %v2347_v58 = vadd.f32 %v2329_v55, %v2307_v16  ;;  %v2348_v12 = vadd.f32 %v2330_v18, %v2308_v31  ;;  %v2349_v42 = vadd.f32 %v2331_v27, %v2309_v11  ;;  %v5494_v4 = vld [vmem:[#allocation2 + $0xce] sm:$0x1]  ;;  %v6898_v31 = vld [vmem:[#allocation21_spill] sm:$0xff] }
 0x20a   :  { %v2350_v40 = vadd.f32 %v2332_v43, %v2310_v39  ;;  %v2351_v3 = vadd.f32 %v2333_v34, %v2311_v54  ;;  %v2356_v59 = vmul.f32 %v6894_v20, %v5272_v0  ;;  %v2357_v38 = vmul.f32 %v6894_v20, %v5274_v15  ;;  %6896 = vst [vmem:[#allocation23_spill] sm:$0xff] %v5494_v4  ;;  %v6897_v54 = vld [vmem:[#allocation32_spill] sm:$0xff] }
 0x20b   :  { %v2358_v47 = vmul.f32 %v6894_v20, %v5294_v22  ;;  %v2359_v21 = vmul.f32 %v6894_v20, %v6876_v50  ;;  %v2360_v16 = vmul.f32 %v6894_v20, %v6877_v56  ;;  %v2361_v39 = vmul.f32 %v6894_v20, %v6878_v53 }
 0x20c   :  { %v2362_v0 = vmul.f32 %v6894_v20, %v6887_v45  ;;  %v2363_v15 = vmul.f32 %v6894_v20, %v6888_v19  ;;  %v2364_v11 = vmul.f32 %v6894_v20, %v6897_v54  ;;  %v2365_v9 = vmul.f32 %v6894_v20, %v6898_v31 }
 0x20d   :  { %v2366_v1 = vmul.f32 %v6894_v20, %v6899_v2  ;;  %v2367_v52 = vmul.f32 %v6894_v20, %v6900_v57  ;;  %v2368_v62 = vmul.f32 %v6894_v20, %v6901_v41  ;;  %v2369_v36 = vmul.f32 %v6894_v20, %v6902_v24 }
 0x20e   :  { %v2370_v25 = vmul.f32 %v6894_v20, %v6903_v10  ;;  %v2371_v33 = vmul.f32 %v6894_v20, %v5454_v17  ;;  %v2372_v7 = vmul.f32 %v6894_v20, %v5492_v28  ;;  %v2373_v51 = vmul.f32 %v6894_v20, %v5494_v4  ;;  %v6904_v20 = vld [vmem:[#allocation22_spill] sm:$0xff] }
 0x20f   :  { %v2374_v48 = vadd.f32 %v2356_v59, %v2334_v30  ;;  %v2375_v8 = vadd.f32 %v2357_v38, %v2335_v37  ;;  %v2376_v49 = vadd.f32 %v2358_v47, %v2336_v32  ;;  %v2377_v60 = vadd.f32 %v2359_v21, %v2337_v5  ;;  %v6912_v59 = vld [vmem:[#allocation34_spill] sm:$0xff]  ;;  %v6913_v47 = vld [vmem:[#allocation19_spill] sm:$0xff] }
 0x210   :  { %v2378_v23 = vadd.f32 %v2360_v16, %v2338_v6  ;;  %v2379_v13 = vadd.f32 %v2361_v39, %v2339_v63  ;;  %v2380_v55 = vadd.f32 %v2362_v0, %v2340_v14  ;;  %v2381_v18 = vadd.f32 %v2363_v15, %v2341_v29  ;;  %v5532_v6 = vld [vmem:[#allocation2 + $0xd6] sm:$0xff]  ;;  %v6909_v63 = vld [vmem:[#allocation18_spill] sm:$0xff]  ;;  %v6910_v29 = vld [vmem:[#allocation13_spill] sm:$0xff] }
 0x211   :  { %v2382_v27 = vadd.f32 %v2364_v11, %v2342_v26  ;;  %v2383_v43 = vadd.f32 %v2365_v9, %v2343_v35  ;;  %v2384_v34 = vadd.f32 %v2366_v1, %v2344_v61  ;;  %v2385_v10 = vadd.f32 %v2367_v52, %v2345_v44  ;;  %6905 = vst [vmem:[#allocation30_spill] sm:$0xff] %v5532_v6  ;;  %v6911_v35 = vld [vmem:[#allocation11_spill] sm:$0xff] }
 0x212   :  { %v2386_v24 = vadd.f32 %v2368_v62, %v2346_v46  ;;  %v2387_v17 = vadd.f32 %v2369_v36, %v2347_v58  ;;  %v2388_v41 = vadd.f32 %v2370_v25, %v2348_v12  ;;  %v2389_v57 = vadd.f32 %v2371_v33, %v2349_v42  ;;  %v5534_v46 = vld [vmem:[#allocation2 + $0xde] sm:$0x1] }
 0x213   :  { %v2390_v28 = vadd.f32 %v2372_v7, %v2350_v40  ;;  %v2391_v2 = vadd.f32 %v2373_v51, %v2351_v3  ;;  %v2396_v30 = vmul.f32 %v6904_v20, %v5294_v22  ;;  %v2397_v37 = vmul.f32 %v6904_v20, %v6876_v50  ;;  %6906 = vst [vmem:[#allocation27_spill] sm:$0xff] %v5534_v46  ;;  %v6907_v3 = vld [vmem:[#allocation33_spill] sm:$0xff]  ;;  %v6908_v12 = vld [vmem:[#allocation36_spill] sm:$0xff] }
 0x214   :  { %v2398_v32 = vmul.f32 %v6904_v20, %v6877_v56  ;;  %v2399_v5 = vmul.f32 %v6904_v20, %v6878_v53  ;;  %v2400_v58 = vmul.f32 %v6904_v20, %v6887_v45  ;;  %v2401_v40 = vmul.f32 %v6904_v20, %v6888_v19 }
 0x215   :  { %v2402_v22 = vmul.f32 %v6904_v20, %v6897_v54  ;;  %v2403_v50 = vmul.f32 %v6904_v20, %v6898_v31  ;;  %v2404_v42 = vmul.f32 %v6904_v20, %v6907_v3  ;;  %v2405_v44 = vmul.f32 %v6904_v20, %v6908_v12 }
 0x216   :  { %v2406_v14 = vmul.f32 %v6904_v20, %v6909_v63  ;;  %v2407_v26 = vmul.f32 %v6904_v20, %v6910_v29  ;;  %v2408_v61 = vmul.f32 %v6904_v20, %v6911_v35  ;;  %v2409_v38 = vmul.f32 %v6904_v20, %v6912_v59 }
 0x217   :  { %v2410_v21 = vmul.f32 %v6904_v20, %v6913_v47  ;;  %v2411_v16 = vmul.f32 %v6904_v20, %v5494_v4  ;;  %v2412_v39 = vmul.f32 %v6904_v20, %v5532_v6  ;;  %v2413_v0 = vmul.f32 %v6904_v20, %v5534_v46  ;;  %v6914_v20 = vld [vmem:[#allocation14_spill] sm:$0xff] }
 0x218   :  { %v2414_v15 = vadd.f32 %v2396_v30, %v2374_v48  ;;  %v2415_v11 = vadd.f32 %v2397_v37, %v2375_v8  ;;  %v2416_v9 = vadd.f32 %v2398_v32, %v2376_v49  ;;  %v2417_v1 = vadd.f32 %v2399_v5, %v2377_v60  ;;  %v6920_v30 = vld [vmem:[#allocation23_spill] sm:$0xff]  ;;  %v6921_v32 = vld [vmem:[#allocation30_spill] sm:$0xff] }
 0x219   :  { %v2418_v52 = vadd.f32 %v2400_v58, %v2378_v23  ;;  %v2419_v62 = vadd.f32 %v2401_v40, %v2379_v13  ;;  %v2420_v36 = vadd.f32 %v2402_v22, %v2380_v55  ;;  %v2421_v25 = vadd.f32 %v2403_v50, %v2381_v18  ;;  %v2188_v23 = vld [vmem:[#allocation2 + $0xe6] sm:$0xff]  ;;  %v6917_v13 = vld [vmem:[#allocation11_spill] sm:$0xff] }
 0x21a   :  { %v2422_v33 = vadd.f32 %v2404_v42, %v2382_v27  ;;  %v2423_v7 = vadd.f32 %v2405_v44, %v2383_v43  ;;  %v2424_v51 = vadd.f32 %v2406_v14, %v2384_v34  ;;  %v2425_v47 = vadd.f32 %v2407_v26, %v2385_v10  ;;  %v2189_v10 = vld [vmem:[#allocation2 + $0xee] sm:$0x1]  ;;  %v6919_v43 = vld [vmem:[#allocation19_spill] sm:$0xff] }
 0x21b   :  { %v2426_v59 = vadd.f32 %v2408_v61, %v2386_v24  ;;  %v2427_v4 = vadd.f32 %v2409_v38, %v2387_v17  ;;  %v2428_v35 = vadd.f32 %v2410_v21, %v2388_v41  ;;  %v2429_v29 = vadd.f32 %v2411_v16, %v2389_v57  ;;  %v6916_v41 = vld [vmem:[#allocation13_spill] sm:$0xff]  ;;  %v6918_v18 = vld [vmem:[#allocation34_spill] sm:$0xff] }
 0x21c   :  { %v2430_v6 = vadd.f32 %v2412_v39, %v2390_v28  ;;  %v2431_v63 = vadd.f32 %v2413_v0, %v2391_v2  ;;  %v2436_v48 = vmul.f32 %v6914_v20, %v6877_v56  ;;  %v2437_v8 = vmul.f32 %v6914_v20, %v6878_v53  ;;  %v6915_v2 = vld [vmem:[#allocation18_spill] sm:$0xff] }
 0x21d   :  { %v2438_v49 = vmul.f32 %v6914_v20, %v6887_v45  ;;  %v2439_v60 = vmul.f32 %v6914_v20, %v6888_v19  ;;  %v2440_v17 = vmul.f32 %v6914_v20, %v6897_v54  ;;  %v2441_v28 = vmul.f32 %v6914_v20, %v6898_v31 }
 0x21e   :  { %v2442_v56 = vmul.f32 %v6914_v20, %v6907_v3  ;;  %v2443_v53 = vmul.f32 %v6914_v20, %v6908_v12  ;;  %v2444_v57 = vmul.f32 %v6914_v20, %v6915_v2  ;;  %v2445_v24 = vmul.f32 %v6914_v20, %v6916_v41 }
 0x21f   :  { %v2446_v55 = vmul.f32 %v6914_v20, %v6917_v13  ;;  %v2447_v27 = vmul.f32 %v6914_v20, %v6918_v18  ;;  %v2448_v34 = vmul.f32 %v6914_v20, %v6919_v43  ;;  %v2449_v37 = vmul.f32 %v6914_v20, %v6920_v30 }
 0x220   :  { %v2450_v5 = vmul.f32 %v6914_v20, %v6921_v32  ;;  %v2451_v58 = vmul.f32 %v6914_v20, %v5534_v46  ;;  %v2452_v40 = vmul.f32 %v6914_v20, %v2188_v23  ;;  %v2453_v22 = vmul.f32 %v6914_v20, %v2189_v10  ;;  %v6922_v20 = vld [vmem:[#allocation20_spill] sm:$0xff] }
 0x221   :  { %v2454_v50 = vadd.f32 %v2436_v48, %v2414_v15  ;;  %v2455_v42 = vadd.f32 %v2437_v8, %v2415_v11  ;;  %v2456_v44 = vadd.f32 %v2438_v49, %v2416_v9  ;;  %v2457_v14 = vadd.f32 %v2439_v60, %v2417_v1 }
 0x222   :  { %v2458_v26 = vadd.f32 %v2440_v17, %v2418_v52  ;;  %v2459_v61 = vadd.f32 %v2441_v28, %v2419_v62  ;;  %v2460_v38 = vadd.f32 %v2442_v56, %v2420_v36  ;;  %v2461_v21 = vadd.f32 %v2443_v53, %v2421_v25  ;;  %v2190_v52 = vld [vmem:[#allocation2 + $0xf6] sm:$0xff]  ;;  %v6928_v25 = vld [vmem:[#allocation30_spill] sm:$0xff] }
 0x223   :  { %v2462_v16 = vadd.f32 %v2444_v57, %v2422_v33  ;;  %v2463_v39 = vadd.f32 %v2445_v24, %v2423_v7  ;;  %v2464_v0 = vadd.f32 %v2446_v55, %v2424_v51  ;;  %v2465_v30 = vadd.f32 %v2447_v27, %v2425_v47  ;;  %v2191_v47 = vld [vmem:[#allocation2 + $0xfe] sm:$0x1]  ;;  %v6927_v36 = vld [vmem:[#allocation23_spill] sm:$0xff] }
 0x224   :  { %v2466_v32 = vadd.f32 %v2448_v34, %v2426_v59  ;;  %v2467_v43 = vadd.f32 %v2449_v37, %v2427_v4  ;;  %v2468_v18 = vadd.f32 %v2450_v5, %v2428_v35  ;;  %v2469_v46 = vadd.f32 %v2451_v58, %v2429_v29  ;;  %v6924_v29 = vld [vmem:[#allocation11_spill] sm:$0xff]  ;;  %v6925_v35 = vld [vmem:[#allocation34_spill] sm:$0xff] }
 0x225   :  { %v2470_v13 = vadd.f32 %v2452_v40, %v2430_v6  ;;  %v2471_v41 = vadd.f32 %v2453_v22, %v2431_v63  ;;  %v2476_v15 = vmul.f32 %v6922_v20, %v6887_v45  ;;  %v2477_v11 = vmul.f32 %v6922_v20, %v6888_v19  ;;  %v6923_v63 = vld [vmem:[#allocation13_spill] sm:$0xff]  ;;  %v6926_v59 = vld [vmem:[#allocation19_spill] sm:$0xff]  ;;  %v5632_v22 = vld [vmem:[#allocation2 + $0x1f] sm:$0x1] }
 0x226   :  { %v2478_v9 = vmul.f32 %v6922_v20, %v6897_v54  ;;  %v2479_v1 = vmul.f32 %v6922_v20, %v6898_v31  ;;  %v2480_v4 = vmul.f32 %v6922_v20, %v6907_v3  ;;  %v2481_v6 = vmul.f32 %v6922_v20, %v6908_v12  ;;  %v6929_v33 = vld [vmem:[#allocation27_spill] sm:$0xff]  ;;  %v2512_v34 = vld [vmem:[#allocation2 + $0x7] sm:$0xff] }
 0x227   :  { %v2482_v45 = vmul.f32 %v6922_v20, %v6915_v2  ;;  %v2483_v19 = vmul.f32 %v6922_v20, %v6923_v63  ;;  %v2484_v54 = vmul.f32 %v6922_v20, %v6924_v29  ;;  %v2485_v31 = vmul.f32 %v6922_v20, %v6925_v35  ;;  %v5630_v40 = vld [vmem:[#allocation2 + $0x17] sm:$0xff]  ;;  %v6947_v63 = vld [vmem:[#allocation25_spill] sm:$0xff]  ;;  %v5682_v29 = vld [vmem:[#allocation2 + $0x6f] sm:$0x1] }
 0x228   :  { %v2486_v62 = vmul.f32 %v6922_v20, %v6926_v59  ;;  %v2487_v3 = vmul.f32 %v6922_v20, %v6927_v36  ;;  %v2488_v12 = vmul.f32 %v6922_v20, %v6928_v25  ;;  %v2489_v7 = vmul.f32 %v6922_v20, %v6929_v33  ;;  %6949 = vst [vmem:[#allocation13_spill] sm:$0xff] %v5682_v29  ;;  %v5686_v35 = vld [vmem:[#allocation2 + $0x7f] sm:$0x1]  ;;  %v5692_v25 = vld [vmem:[#allocation2 + $0x8f] sm:$0x1] }
 0x229   :  { %v2490_v51 = vmul.f32 %v6922_v20, %v2188_v23  ;;  %v2491_v48 = vmul.f32 %v6922_v20, %v2189_v10  ;;  %v2492_v8 = vmul.f32 %v6922_v20, %v2190_v52  ;;  %v2493_v49 = vmul.f32 %v6922_v20, %v2191_v47  ;;  %v2513_v10 = vld [vmem:[#allocation2 + $0xf] sm:$0x1]  ;;  %v6943_v47 = vld [vmem:[#allocation31_spill] sm:$0xff]  ;;  %6951 = vst [vmem:[#allocation34_spill] sm:$0xff] %v5686_v35 }
 0x22a   :  { %v2494_v60 = vadd.f32 %v2476_v15, %v2454_v50  ;;  %v2495_v17 = vadd.f32 %v2477_v11, %v2455_v42  ;;  %v2496_v28 = vadd.f32 %v2478_v9, %v2456_v44  ;;  %v2497_v56 = vadd.f32 %v2479_v1, %v2457_v14  ;;  %v5660_v15 = vld [vmem:[#allocation2 + $0x57] sm:$0xff]  ;;  %v5662_v11 = vld [vmem:[#allocation2 + $0x5f] sm:$0x1]  ;;  %v5664_v9 = vld [vmem:[#allocation2 + $0x67] sm:$0xff]  ;;  %6953 = vst [vmem:[#allocation23_spill] sm:$0xff] %v5692_v25 }
 0x22b   :  { %v2498_v53 = vadd.f32 %v2480_v4, %v2458_v26  ;;  %v2499_v2 = vadd.f32 %v2481_v6, %v2459_v61  ;;  %v2500_v57 = vadd.f32 %v2482_v45, %v2460_v38  ;;  %v2501_v24 = vadd.f32 %v2483_v19, %v2461_v21  ;;  %v5634_v26 = vld [vmem:[#allocation2 + $0x27] sm:$0xff]  ;;  %v5636_v61 = vld [vmem:[#allocation2 + $0x2f] sm:$0x1]  ;;  %v5638_v38 = vld [vmem:[#allocation2 + $0x37] sm:$0xff]  ;;  %6938 = vst [vmem:[#allocation21_spill] sm:$0xff] %v5660_v15 }
 0x22c   :  { %v2502_v55 = vadd.f32 %v2484_v54, %v2462_v16  ;;  %v2503_v27 = vadd.f32 %v2485_v31, %v2463_v39  ;;  %v2504_v37 = vadd.f32 %v2486_v62, %v2464_v0  ;;  %v2505_v5 = vadd.f32 %v2487_v3, %v2465_v30  ;;  %v5640_v21 = vld [vmem:[#allocation2 + $0x3f] sm:$0x1]  ;;  %v5642_v30 = vld [vmem:[#allocation2 + $0x47] sm:$0xff]  ;;  %v6932_v16 = vld [vmem:[#allocation15_spill] sm:$0xff]  ;;  %6939 = vst [vmem:[#allocation22_spill] sm:$0xff] %v5662_v11 }
 0x22d   :  { %v2506_v23 = vadd.f32 %v2488_v12, %v2466_v32  ;;  %v2507_v58 = vadd.f32 %v2489_v7, %v2467_v43  ;;  %v2508_v50 = vadd.f32 %v2490_v51, %v2468_v18  ;;  %v2509_v42 = vadd.f32 %v2491_v48, %v2469_v46  ;;  %v5644_v43 = vld [vmem:[#allocation2 + $0x4f] sm:$0x1]  ;;  %v6931_v32 = vld [vmem:[#allocation29_spill] sm:$0xff]  ;;  %v6933_v18 = vld [vmem:[#allocation16_spill] sm:$0xff]  ;;  %6940 = vst [vmem:[#allocation33_spill] sm:$0xff] %v5664_v9 }
 0x22e   :  { %v2510_v44 = vadd.f32 %v2492_v8, %v2470_v13  ;;  %v2511_v14 = vadd.f32 %v2493_v49, %v2471_v41  ;;  %6930 = vst [vmem:[#allocation28_spill] sm:$0xff] %v5644_v43  ;;  %v2547_v39 = vrot.slane %v6932_v16, %v6931_v32  ;;  %v5650_v46 = vrot.slane %v6933_v18, %v6931_v32  ;;  %v6934_v41 = vld [vmem:[#allocation17_spill] sm:$0xff]  ;;  %v6936_v0 = vld [vmem:[#allocation24_spill] sm:$0xff]  ;;  %v6945_v6 = vld [vmem:[#allocation26_spill] sm:$0xff] }
 0x22f   :  { %v5654_v13 = vrot.slane %v6934_v41, %v6931_v32  ;;  %v5658_v20 = vrot.slane %v6936_v0, %v6931_v32  ;;  %v6941_v1 = vld [vmem:[#allocation12_spill] sm:$0xff]  ;;  %v5672_v4 = vrot.slane %v6943_v47, %v6931_v32  ;;  %v5676_v45 = vrot.slane %v6945_v6, %v6931_v32  ;;  %v5690_v3 = vld [vmem:[#allocation2 + $0x87] sm:$0xff] }
 0x230   :  { %v5668_v52 = vrot.slane %v6941_v1, %v6931_v32  ;;  %v5680_v19 = vrot.slane %v6947_v63, %v6931_v32  ;;  %v5684_v54 = vld [vmem:[#allocation2 + $0x77] sm:$0xff]  ;;  %v2548_v31 = vmul.f32 %v2547_v39, %v2512_v34  ;;  %v2549_v59 = vmul.f32 %v2547_v39, %v2513_v10  ;;  %6952 = vst [vmem:[#allocation19_spill] sm:$0xff] %v5690_v3 }
 0x231   :  { %6935 = vst [vmem:[#allocation35_spill] sm:$0xff] %v5654_v13  ;;  %6937 = vst [vmem:[#allocation32_spill] sm:$0xff] %v5658_v20  ;;  %v2550_v62 = vmul.f32 %v2547_v39, %v5630_v40  ;;  %v2551_v36 = vmul.f32 %v2547_v39, %v5632_v22  ;;  %v2552_v12 = vmul.f32 %v2547_v39, %v5634_v26 }
 0x232   :  { %6942 = vst [vmem:[#allocation36_spill] sm:$0xff] %v5668_v52  ;;  %6944 = vst [vmem:[#allocation14_spill] sm:$0xff] %v5672_v4  ;;  %v2553_v33 = vmul.f32 %v2547_v39, %v5636_v61  ;;  %v2554_v7 = vmul.f32 %v2547_v39, %v5638_v38  ;;  %v2555_v51 = vmul.f32 %v2547_v39, %v5640_v21 }
 0x233   :  { %6946 = vst [vmem:[#allocation18_spill] sm:$0xff] %v5676_v45  ;;  %6948 = vst [vmem:[#allocation20_spill] sm:$0xff] %v5680_v19  ;;  %v2556_v48 = vmul.f32 %v2547_v39, %v5642_v30  ;;  %v2557_v8 = vmul.f32 %v2547_v39, %v5644_v43  ;;  %v2558_v49 = vmul.f32 %v2547_v39, %v5660_v15 }
 0x234   :  { %6950 = vst [vmem:[#allocation11_spill] sm:$0xff] %v5684_v54  ;;  %v2559_v34 = vmul.f32 %v2547_v39, %v5662_v11  ;;  %v2560_v10 = vmul.f32 %v2547_v39, %v5664_v9  ;;  %v2561_v32 = vmul.f32 %v2547_v39, %v5682_v29  ;;  %v2562_v16 = vmul.f32 %v2547_v39, %v5684_v54 }
 0x235   :  { %v2563_v18 = vmul.f32 %v2547_v39, %v5686_v35  ;;  %v2564_v41 = vmul.f32 %v2547_v39, %v5690_v3  ;;  %v2565_v0 = vmul.f32 %v2547_v39, %v5692_v25  ;;  %v2566_v1 = vadd.f32 %v2548_v31, %v2494_v60  ;;  %v6962_v31 = vld [vmem:[#allocation34_spill] sm:$0xff] }
 0x236   :  { %v2567_v47 = vadd.f32 %v2549_v59, %v2495_v17  ;;  %v2568_v6 = vadd.f32 %v2550_v62, %v2496_v28  ;;  %v2569_v63 = vadd.f32 %v2551_v36, %v2497_v56  ;;  %v2570_v19 = vadd.f32 %v2552_v12, %v2498_v53  ;;  %v5716_v53 = vld [vmem:[#allocation2 + $0x97] sm:$0xff] }
 0x237   :  { %v2571_v45 = vadd.f32 %v2553_v33, %v2499_v2  ;;  %v2572_v4 = vadd.f32 %v2554_v7, %v2500_v57  ;;  %v2573_v52 = vadd.f32 %v2555_v51, %v2501_v24  ;;  %v2574_v20 = vadd.f32 %v2556_v48, %v2502_v55  ;;  %6954 = vst [vmem:[#allocation30_spill] sm:$0xff] %v5716_v53  ;;  %v5718_v2 = vld [vmem:[#allocation2 + $0x9f] sm:$0x1]  ;;  %v6963_v62 = vld [vmem:[#allocation19_spill] sm:$0xff] }
 0x238   :  { %v2575_v13 = vadd.f32 %v2557_v8, %v2503_v27  ;;  %v2576_v9 = vadd.f32 %v2558_v49, %v2504_v37  ;;  %v2577_v29 = vadd.f32 %v2559_v34, %v2505_v5  ;;  %v2578_v11 = vadd.f32 %v2560_v10, %v2506_v23  ;;  %6955 = vst [vmem:[#allocation27_spill] sm:$0xff] %v5718_v2  ;;  %v6956_v27 = vld [vmem:[#allocation28_spill] sm:$0xff]  ;;  %v6957_v5 = vld [vmem:[#allocation21_spill] sm:$0xff] }
 0x239   :  { %v2579_v54 = vadd.f32 %v2561_v32, %v2507_v58  ;;  %v2580_v15 = vadd.f32 %v2562_v16, %v2508_v50  ;;  %v2581_v35 = vadd.f32 %v2563_v18, %v2509_v42  ;;  %v2582_v43 = vadd.f32 %v2564_v41, %v2510_v44  ;;  %v6958_v58 = vld [vmem:[#allocation22_spill] sm:$0xff]  ;;  %v6960_v42 = vld [vmem:[#allocation13_spill] sm:$0xff] }
 0x23a   :  { %v2583_v3 = vadd.f32 %v2565_v0, %v2511_v14  ;;  %v2588_v60 = vmul.f32 %v5650_v46, %v5630_v40  ;;  %v2589_v17 = vmul.f32 %v5650_v46, %v5632_v22  ;;  %v2590_v28 = vmul.f32 %v5650_v46, %v5634_v26  ;;  %v6959_v22 = vld [vmem:[#allocation33_spill] sm:$0xff] }
 0x23b   :  { %v2591_v56 = vmul.f32 %v5650_v46, %v5636_v61  ;;  %v2592_v57 = vmul.f32 %v5650_v46, %v5638_v38  ;;  %v2593_v24 = vmul.f32 %v5650_v46, %v5640_v21  ;;  %v2594_v55 = vmul.f32 %v5650_v46, %v5642_v30  ;;  %v6961_v14 = vld [vmem:[#allocation11_spill] sm:$0xff] }
 0x23c   :  { %v2595_v37 = vmul.f32 %v5650_v46, %v6956_v27  ;;  %v2596_v23 = vmul.f32 %v5650_v46, %v6957_v5  ;;  %v2597_v40 = vmul.f32 %v5650_v46, %v6958_v58  ;;  %v2598_v50 = vmul.f32 %v5650_v46, %v6959_v22 }
 0x23d   :  { %v2599_v44 = vmul.f32 %v5650_v46, %v6960_v42  ;;  %v2600_v39 = vmul.f32 %v5650_v46, %v6961_v14  ;;  %v2601_v59 = vmul.f32 %v5650_v46, %v6962_v31  ;;  %v2602_v36 = vmul.f32 %v5650_v46, %v6963_v62 }
 0x23e   :  { %v2603_v12 = vmul.f32 %v5650_v46, %v5692_v25  ;;  %v2604_v33 = vmul.f32 %v5650_v46, %v5716_v53  ;;  %v2605_v7 = vmul.f32 %v5650_v46, %v5718_v2  ;;  %v2606_v51 = vadd.f32 %v2588_v60, %v2566_v1  ;;  %v6964_v46 = vld [vmem:[#allocation35_spill] sm:$0xff] }
 0x23f   :  { %v2607_v48 = vadd.f32 %v2589_v17, %v2567_v47  ;;  %v2608_v8 = vadd.f32 %v2590_v28, %v2568_v6  ;;  %v2609_v49 = vadd.f32 %v2591_v56, %v2569_v63  ;;  %v2610_v34 = vadd.f32 %v2592_v57, %v2570_v19  ;;  %v6971_v6 = vld [vmem:[#allocation19_spill] sm:$0xff]  ;;  %v6973_v28 = vld [vmem:[#allocation30_spill] sm:$0xff] }
 0x240   :  { %v2611_v10 = vadd.f32 %v2593_v24, %v2571_v45  ;;  %v2612_v32 = vadd.f32 %v2594_v55, %v2572_v4  ;;  %v2613_v16 = vadd.f32 %v2595_v37, %v2573_v52  ;;  %v2614_v18 = vadd.f32 %v2596_v23, %v2574_v20  ;;  %v5756_v20 = vld [vmem:[#allocation2 + $0xa7] sm:$0xff]  ;;  %v6972_v60 = vld [vmem:[#allocation23_spill] sm:$0xff] }
 0x241   :  { %v2615_v41 = vadd.f32 %v2597_v40, %v2575_v13  ;;  %v2616_v0 = vadd.f32 %v2598_v50, %v2576_v9  ;;  %v2617_v62 = vadd.f32 %v2599_v44, %v2577_v29  ;;  %v2618_v31 = vadd.f32 %v2600_v39, %v2578_v11  ;;  %6965 = vst [vmem:[#allocation29_spill] sm:$0xff] %v5756_v20  ;;  %v5758_v11 = vld [vmem:[#allocation2 + $0xaf] sm:$0x1]  ;;  %v6967_v9 = vld [vmem:[#allocation33_spill] sm:$0xff]  ;;  %v6969_v29 = vld [vmem:[#allocation11_spill] sm:$0xff] }
 0x242   :  { %v2619_v25 = vadd.f32 %v2601_v59, %v2579_v54  ;;  %v2620_v14 = vadd.f32 %v2602_v36, %v2580_v15  ;;  %v2621_v42 = vadd.f32 %v2603_v12, %v2581_v35  ;;  %v2622_v53 = vadd.f32 %v2604_v33, %v2582_v43  ;;  %6966 = vst [vmem:[#allocation15_spill] sm:$0xff] %v5758_v11  ;;  %v6968_v45 = vld [vmem:[#allocation13_spill] sm:$0xff]  ;;  %v6970_v35 = vld [vmem:[#allocation34_spill] sm:$0xff] }
 0x243   :  { %v2623_v22 = vadd.f32 %v2605_v7, %v2583_v3  ;;  %v2628_v1 = vmul.f32 %v6964_v46, %v5634_v26  ;;  %v2629_v47 = vmul.f32 %v6964_v46, %v5636_v61  ;;  %v2630_v4 = vmul.f32 %v6964_v46, %v5638_v38 }
 0x244   :  { %v2631_v13 = vmul.f32 %v6964_v46, %v5640_v21  ;;  %v2632_v43 = vmul.f32 %v6964_v46, %v5642_v30  ;;  %v2633_v15 = vmul.f32 %v6964_v46, %v6956_v27  ;;  %v2634_v26 = vmul.f32 %v6964_v46, %v6957_v5 }
 0x245   :  { %v2635_v61 = vmul.f32 %v6964_v46, %v6958_v58  ;;  %v2636_v52 = vmul.f32 %v6964_v46, %v6967_v9  ;;  %v2637_v19 = vmul.f32 %v6964_v46, %v6968_v45  ;;  %v2638_v54 = vmul.f32 %v6964_v46, %v6969_v29 }
 0x246   :  { %v2639_v3 = vmul.f32 %v6964_v46, %v6970_v35  ;;  %v2640_v63 = vmul.f32 %v6964_v46, %v6971_v6  ;;  %v2641_v17 = vmul.f32 %v6964_v46, %v6972_v60  ;;  %v2642_v56 = vmul.f32 %v6964_v46, %v6973_v28 }
 0x247   :  { %v2643_v57 = vmul.f32 %v6964_v46, %v5718_v2  ;;  %v2644_v24 = vmul.f32 %v6964_v46, %v5756_v20  ;;  %v2645_v55 = vmul.f32 %v6964_v46, %v5758_v11  ;;  %v2646_v37 = vadd.f32 %v2628_v1, %v2606_v51  ;;  %v6974_v46 = vld [vmem:[#allocation32_spill] sm:$0xff]  ;;  %v6982_v1 = vld [vmem:[#allocation27_spill] sm:$0xff] }
 0x248   :  { %v2647_v23 = vadd.f32 %v2629_v47, %v2607_v48  ;;  %v2648_v40 = vadd.f32 %v2630_v4, %v2608_v8  ;;  %v2649_v50 = vadd.f32 %v2631_v13, %v2609_v49  ;;  %v2650_v44 = vadd.f32 %v2632_v43, %v2610_v34  ;;  %v5796_v34 = vld [vmem:[#allocation2 + $0xb7] sm:$0xff]  ;;  %v6983_v4 = vld [vmem:[#allocation29_spill] sm:$0xff] }
 0x249   :  { %v2651_v39 = vadd.f32 %v2633_v15, %v2611_v10  ;;  %v2652_v59 = vadd.f32 %v2634_v26, %v2612_v32  ;;  %v2653_v36 = vadd.f32 %v2635_v61, %v2613_v16  ;;  %v2654_v12 = vadd.f32 %v2636_v52, %v2614_v18  ;;  %6975 = vst [vmem:[#allocation16_spill] sm:$0xff] %v5796_v34  ;;  %v6979_v10 = vld [vmem:[#allocation19_spill] sm:$0xff] }
 0x24a   :  { %v2655_v33 = vadd.f32 %v2637_v19, %v2615_v41  ;;  %v2656_v7 = vadd.f32 %v2638_v54, %v2616_v0  ;;  %v2657_v28 = vadd.f32 %v2639_v3, %v2617_v62  ;;  %v2658_v60 = vadd.f32 %v2640_v63, %v2618_v31  ;;  %v5798_v31 = vld [vmem:[#allocation2 + $0xbf] sm:$0x1]  ;;  %v6980_v16 = vld [vmem:[#allocation23_spill] sm:$0xff]  ;;  %v6981_v41 = vld [vmem:[#allocation30_spill] sm:$0xff] }
 0x24b   :  { %v2659_v2 = vadd.f32 %v2641_v17, %v2619_v25  ;;  %v2660_v6 = vadd.f32 %v2642_v56, %v2620_v14  ;;  %v2661_v35 = vadd.f32 %v2643_v57, %v2621_v42  ;;  %v2662_v20 = vadd.f32 %v2644_v24, %v2622_v53  ;;  %6976 = vst [vmem:[#allocation17_spill] sm:$0xff] %v5798_v31  ;;  %v6978_v14 = vld [vmem:[#allocation34_spill] sm:$0xff] }
 0x24c   :  { %v2663_v29 = vadd.f32 %v2645_v55, %v2623_v22  ;;  %v2668_v51 = vmul.f32 %v6974_v46, %v5638_v38  ;;  %v2669_v48 = vmul.f32 %v6974_v46, %v5640_v21  ;;  %v2670_v8 = vmul.f32 %v6974_v46, %v5642_v30  ;;  %v6977_v22 = vld [vmem:[#allocation11_spill] sm:$0xff] }
 0x24d   :  { %v2671_v49 = vmul.f32 %v6974_v46, %v6956_v27  ;;  %v2672_v25 = vmul.f32 %v6974_v46, %v6957_v5  ;;  %v2673_v53 = vmul.f32 %v6974_v46, %v6958_v58  ;;  %v2674_v38 = vmul.f32 %v6974_v46, %v6967_v9 }
 0x24e   :  { %v2675_v21 = vmul.f32 %v6974_v46, %v6968_v45  ;;  %v2676_v42 = vmul.f32 %v6974_v46, %v6977_v22  ;;  %v2677_v62 = vmul.f32 %v6974_v46, %v6978_v14  ;;  %v2678_v32 = vmul.f32 %v6974_v46, %v6979_v10 }
 0x24f   :  { %v2679_v18 = vmul.f32 %v6974_v46, %v6980_v16  ;;  %v2680_v0 = vmul.f32 %v6974_v46, %v6981_v41  ;;  %v2681_v47 = vmul.f32 %v6974_v46, %v6982_v1  ;;  %v2682_v13 = vmul.f32 %v6974_v46, %v6983_v4 }
 0x250   :  { %v2683_v43 = vmul.f32 %v6974_v46, %v5758_v11  ;;  %v2684_v15 = vmul.f32 %v6974_v46, %v5796_v34  ;;  %v2685_v26 = vmul.f32 %v6974_v46, %v5798_v31  ;;  %v2686_v61 = vadd.f32 %v2668_v51, %v2646_v37  ;;  %v6984_v46 = vld [vmem:[#allocation36_spill] sm:$0xff]  ;;  %v6992_v51 = vld [vmem:[#allocation15_spill] sm:$0xff] }
 0x251   :  { %v2687_v52 = vadd.f32 %v2669_v48, %v2647_v23  ;;  %v2688_v19 = vadd.f32 %v2670_v8, %v2648_v40  ;;  %v2689_v54 = vadd.f32 %v2671_v49, %v2649_v50  ;;  %v2690_v3 = vadd.f32 %v2672_v25, %v2650_v44  ;;  %v5836_v44 = vld [vmem:[#allocation2 + $0xc7] sm:$0xff]  ;;  %v6993_v8 = vld [vmem:[#allocation16_spill] sm:$0xff] }
 0x252   :  { %v2691_v63 = vadd.f32 %v2673_v53, %v2651_v39  ;;  %v2692_v17 = vadd.f32 %v2674_v38, %v2652_v59  ;;  %v2693_v56 = vadd.f32 %v2675_v21, %v2653_v36  ;;  %v2694_v57 = vadd.f32 %v2676_v42, %v2654_v12  ;;  %6985 = vst [vmem:[#allocation24_spill] sm:$0xff] %v5836_v44  ;;  %v6989_v39 = vld [vmem:[#allocation30_spill] sm:$0xff]  ;;  %v6990_v36 = vld [vmem:[#allocation27_spill] sm:$0xff] }
 0x253   :  { %v2695_v24 = vadd.f32 %v2677_v62, %v2655_v33  ;;  %v2696_v55 = vadd.f32 %v2678_v32, %v2656_v7  ;;  %v2697_v4 = vadd.f32 %v2679_v18, %v2657_v28  ;;  %v2698_v1 = vadd.f32 %v2680_v0, %v2658_v60  ;;  %v5838_v60 = vld [vmem:[#allocation2 + $0xcf] sm:$0x1]  ;;  %v6991_v33 = vld [vmem:[#allocation29_spill] sm:$0xff] }
 0x254   :  { %v2699_v11 = vadd.f32 %v2681_v47, %v2659_v2  ;;  %v2700_v41 = vadd.f32 %v2682_v13, %v2660_v6  ;;  %v2701_v16 = vadd.f32 %v2683_v43, %v2661_v35  ;;  %v2702_v34 = vadd.f32 %v2684_v15, %v2662_v20  ;;  %6986 = vst [vmem:[#allocation12_spill] sm:$0xff] %v5838_v60  ;;  %v6988_v6 = vld [vmem:[#allocation23_spill] sm:$0xff] }
 0x255   :  { %v2703_v10 = vadd.f32 %v2685_v26, %v2663_v29  ;;  %v2708_v37 = vmul.f32 %v6984_v46, %v5642_v30  ;;  %v2709_v23 = vmul.f32 %v6984_v46, %v6956_v27  ;;  %v2710_v40 = vmul.f32 %v6984_v46, %v6957_v5  ;;  %v6987_v29 = vld [vmem:[#allocation19_spill] sm:$0xff] }
 0x256   :  { %v2711_v50 = vmul.f32 %v6984_v46, %v6958_v58  ;;  %v2712_v2 = vmul.f32 %v6984_v46, %v6967_v9  ;;  %v2713_v20 = vmul.f32 %v6984_v46, %v6968_v45  ;;  %v2714_v30 = vmul.f32 %v6984_v46, %v6977_v22 }
 0x257   :  { %v2715_v27 = vmul.f32 %v6984_v46, %v6978_v14  ;;  %v2716_v35 = vmul.f32 %v6984_v46, %v6987_v29  ;;  %v2717_v28 = vmul.f32 %v6984_v46, %v6988_v6  ;;  %v2718_v59 = vmul.f32 %v6984_v46, %v6989_v39 }
 0x258   :  { %v2719_v12 = vmul.f32 %v6984_v46, %v6990_v36  ;;  %v2720_v7 = vmul.f32 %v6984_v46, %v6991_v33  ;;  %v2721_v48 = vmul.f32 %v6984_v46, %v6992_v51  ;;  %v2722_v49 = vmul.f32 %v6984_v46, %v6993_v8 }
 0x259   :  { %v2723_v25 = vmul.f32 %v6984_v46, %v5798_v31  ;;  %v2724_v53 = vmul.f32 %v6984_v46, %v5836_v44  ;;  %v2725_v38 = vmul.f32 %v6984_v46, %v5838_v60  ;;  %v2726_v21 = vadd.f32 %v2708_v37, %v2686_v61  ;;  %v6994_v46 = vld [vmem:[#allocation14_spill] sm:$0xff]  ;;  %v7002_v37 = vld [vmem:[#allocation17_spill] sm:$0xff] }
 0x25a   :  { %v2727_v42 = vadd.f32 %v2709_v23, %v2687_v52  ;;  %v2728_v62 = vadd.f32 %v2710_v40, %v2688_v19  ;;  %v2729_v32 = vadd.f32 %v2711_v50, %v2689_v54  ;;  %v2730_v18 = vadd.f32 %v2712_v2, %v2690_v3  ;;  %v5876_v3 = vld [vmem:[#allocation2 + $0xd7] sm:$0xff] }
 0x25b   :  { %v2731_v0 = vadd.f32 %v2713_v20, %v2691_v63  ;;  %v2732_v47 = vadd.f32 %v2714_v30, %v2692_v17  ;;  %v2733_v13 = vadd.f32 %v2715_v27, %v2693_v56  ;;  %v2734_v43 = vadd.f32 %v2716_v35, %v2694_v57  ;;  %6995 = vst [vmem:[#allocation31_spill] sm:$0xff] %v5876_v3  ;;  %v6999_v63 = vld [vmem:[#allocation29_spill] sm:$0xff]  ;;  %v7000_v56 = vld [vmem:[#allocation15_spill] sm:$0xff]  ;;  %v7003_v40 = vld [vmem:[#allocation24_spill] sm:$0xff] }
 0x25c   :  { %v2735_v15 = vadd.f32 %v2717_v28, %v2695_v24  ;;  %v2736_v26 = vadd.f32 %v2718_v59, %v2696_v55  ;;  %v2737_v8 = vadd.f32 %v2719_v12, %v2697_v4  ;;  %v2738_v51 = vadd.f32 %v2720_v7, %v2698_v1  ;;  %v5878_v1 = vld [vmem:[#allocation2 + $0xdf] sm:$0x1] }
 0x25d   :  { %v2739_v31 = vadd.f32 %v2721_v48, %v2699_v11  ;;  %v2740_v33 = vadd.f32 %v2722_v49, %v2700_v41  ;;  %v2741_v36 = vadd.f32 %v2723_v25, %v2701_v16  ;;  %v2742_v44 = vadd.f32 %v2724_v53, %v2702_v34  ;;  %6996 = vst [vmem:[#allocation26_spill] sm:$0xff] %v5878_v1  ;;  %v6998_v41 = vld [vmem:[#allocation27_spill] sm:$0xff]  ;;  %v7001_v24 = vld [vmem:[#allocation16_spill] sm:$0xff] }
 0x25e   :  { %v2743_v39 = vadd.f32 %v2725_v38, %v2703_v10  ;;  %v2748_v61 = vmul.f32 %v6994_v46, %v6957_v5  ;;  %v2749_v52 = vmul.f32 %v6994_v46, %v6958_v58  ;;  %v2750_v19 = vmul.f32 %v6994_v46, %v6967_v9  ;;  %v6997_v10 = vld [vmem:[#allocation30_spill] sm:$0xff] }
 0x25f   :  { %v2751_v54 = vmul.f32 %v6994_v46, %v6968_v45  ;;  %v2752_v11 = vmul.f32 %v6994_v46, %v6977_v22  ;;  %v2753_v34 = vmul.f32 %v6994_v46, %v6978_v14  ;;  %v2754_v5 = vmul.f32 %v6994_v46, %v6987_v29 }
 0x260   :  { %v2755_v58 = vmul.f32 %v6994_v46, %v6988_v6  ;;  %v2756_v16 = vmul.f32 %v6994_v46, %v6997_v10  ;;  %v2757_v4 = vmul.f32 %v6994_v46, %v6998_v41  ;;  %v2758_v17 = vmul.f32 %v6994_v46, %v6999_v63 }
 0x261   :  { %v2759_v57 = vmul.f32 %v6994_v46, %v7000_v56  ;;  %v2760_v55 = vmul.f32 %v6994_v46, %v7001_v24  ;;  %v2761_v23 = vmul.f32 %v6994_v46, %v7002_v37  ;;  %v2762_v50 = vmul.f32 %v6994_v46, %v7003_v40 }
 0x262   :  { %v2763_v2 = vmul.f32 %v6994_v46, %v5838_v60  ;;  %v2764_v20 = vmul.f32 %v6994_v46, %v5876_v3  ;;  %v2765_v30 = vmul.f32 %v6994_v46, %v5878_v1  ;;  %v2766_v27 = vadd.f32 %v2748_v61, %v2726_v21  ;;  %v7004_v46 = vld [vmem:[#allocation18_spill] sm:$0xff]  ;;  %v7010_v61 = vld [vmem:[#allocation12_spill] sm:$0xff] }
 0x263   :  { %v2767_v35 = vadd.f32 %v2749_v52, %v2727_v42  ;;  %v2768_v28 = vadd.f32 %v2750_v19, %v2728_v62  ;;  %v2769_v59 = vadd.f32 %v2751_v54, %v2729_v32  ;;  %v2770_v12 = vadd.f32 %v2752_v11, %v2730_v18  ;;  %v2540_v18 = vld [vmem:[#allocation2 + $0xe7] sm:$0xff]  ;;  %v7011_v19 = vld [vmem:[#allocation31_spill] sm:$0xff] }
 0x264   :  { %v2771_v7 = vadd.f32 %v2753_v34, %v2731_v0  ;;  %v2772_v48 = vadd.f32 %v2754_v5, %v2732_v47  ;;  %v2773_v49 = vadd.f32 %v2755_v58, %v2733_v13  ;;  %v2774_v25 = vadd.f32 %v2756_v16, %v2734_v43  ;;  %v7007_v0 = vld [vmem:[#allocation16_spill] sm:$0xff]  ;;  %v7008_v13 = vld [vmem:[#allocation17_spill] sm:$0xff] }
 0x265   :  { %v2775_v53 = vadd.f32 %v2757_v4, %v2735_v15  ;;  %v2776_v38 = vadd.f32 %v2758_v17, %v2736_v26  ;;  %v2777_v40 = vadd.f32 %v2759_v57, %v2737_v8  ;;  %v2778_v37 = vadd.f32 %v2760_v55, %v2738_v51  ;;  %v2541_v8 = vld [vmem:[#allocation2 + $0xef] sm:$0x1]  ;;  %v7009_v15 = vld [vmem:[#allocation24_spill] sm:$0xff] }
 0x266   :  { %v2779_v60 = vadd.f32 %v2761_v23, %v2739_v31  ;;  %v2780_v24 = vadd.f32 %v2762_v50, %v2740_v33  ;;  %v2781_v56 = vadd.f32 %v2763_v2, %v2741_v36  ;;  %v2782_v3 = vadd.f32 %v2764_v20, %v2742_v44  ;;  %v7006_v33 = vld [vmem:[#allocation15_spill] sm:$0xff] }
 0x267   :  { %v2783_v63 = vadd.f32 %v2765_v30, %v2743_v39  ;;  %v2788_v21 = vmul.f32 %v7004_v46, %v6967_v9  ;;  %v2789_v42 = vmul.f32 %v7004_v46, %v6968_v45  ;;  %v2790_v62 = vmul.f32 %v7004_v46, %v6977_v22  ;;  %v7005_v39 = vld [vmem:[#allocation29_spill] sm:$0xff] }
 0x268   :  { %v2791_v32 = vmul.f32 %v7004_v46, %v6978_v14  ;;  %v2792_v31 = vmul.f32 %v7004_v46, %v6987_v29  ;;  %v2793_v44 = vmul.f32 %v7004_v46, %v6988_v6  ;;  %v2794_v9 = vmul.f32 %v7004_v46, %v6997_v10 }
 0x269   :  { %v2795_v45 = vmul.f32 %v7004_v46, %v6998_v41  ;;  %v2796_v36 = vmul.f32 %v7004_v46, %v7005_v39  ;;  %v2797_v51 = vmul.f32 %v7004_v46, %v7006_v33  ;;  %v2798_v47 = vmul.f32 %v7004_v46, %v7007_v0 }
 0x26a   :  { %v2799_v43 = vmul.f32 %v7004_v46, %v7008_v13  ;;  %v2800_v26 = vmul.f32 %v7004_v46, %v7009_v15  ;;  %v2801_v52 = vmul.f32 %v7004_v46, %v7010_v61  ;;  %v2802_v54 = vmul.f32 %v7004_v46, %v7011_v19 }
 0x26b   :  { %v2803_v11 = vmul.f32 %v7004_v46, %v5878_v1  ;;  %v2804_v34 = vmul.f32 %v7004_v46, %v2540_v18  ;;  %v2805_v5 = vmul.f32 %v7004_v46, %v2541_v8  ;;  %v2806_v58 = vadd.f32 %v2788_v21, %v2766_v27  ;;  %v7012_v46 = vld [vmem:[#allocation20_spill] sm:$0xff] }
 0x26c   :  { %v2807_v16 = vadd.f32 %v2789_v42, %v2767_v35  ;;  %v2808_v4 = vadd.f32 %v2790_v62, %v2768_v28  ;;  %v2809_v17 = vadd.f32 %v2791_v32, %v2769_v59  ;;  %v2810_v57 = vadd.f32 %v2792_v31, %v2770_v12  ;;  %v2542_v12 = vld [vmem:[#allocation2 + $0xf7] sm:$0xff] }
 0x26d   :  { %v2811_v55 = vadd.f32 %v2793_v44, %v2771_v7  ;;  %v2812_v23 = vadd.f32 %v2794_v9, %v2772_v48  ;;  %v2813_v50 = vadd.f32 %v2795_v45, %v2773_v49  ;;  %v2814_v2 = vadd.f32 %v2796_v36, %v2774_v25  ;;  %v7017_v48 = vld [vmem:[#allocation12_spill] sm:$0xff]  ;;  %v7018_v49 = vld [vmem:[#allocation31_spill] sm:$0xff]  ;;  %v7019_v25 = vld [vmem:[#allocation26_spill] sm:$0xff] }
 0x26e   :  { %v2815_v20 = vadd.f32 %v2797_v51, %v2775_v53  ;;  %v2816_v30 = vadd.f32 %v2798_v47, %v2776_v38  ;;  %v2817_v61 = vadd.f32 %v2799_v43, %v2777_v40  ;;  %v2818_v19 = vadd.f32 %v2800_v26, %v2778_v37  ;;  %v2543_v40 = vld [vmem:[#allocation2 + $0xff] sm:$0x1] }
 0x26f   :  { %v2819_v15 = vadd.f32 %v2801_v52, %v2779_v60  ;;  %v2820_v13 = vadd.f32 %v2802_v54, %v2780_v24  ;;  %v2821_v1 = vadd.f32 %v2803_v11, %v2781_v56  ;;  %v2822_v0 = vadd.f32 %v2804_v34, %v2782_v3  ;;  %v7014_v56 = vld [vmem:[#allocation16_spill] sm:$0xff]  ;;  %v7015_v24 = vld [vmem:[#allocation17_spill] sm:$0xff] }
 0x270   :  { %v2823_v33 = vadd.f32 %v2805_v5, %v2783_v63  ;;  %v2828_v27 = vmul.f32 %v7012_v46, %v6977_v22  ;;  %v2829_v35 = vmul.f32 %v7012_v46, %v6978_v14  ;;  %v2830_v28 = vmul.f32 %v7012_v46, %v6987_v29  ;;  %v7013_v63 = vld [vmem:[#allocation15_spill] sm:$0xff]  ;;  %v7016_v37 = vld [vmem:[#allocation24_spill] sm:$0xff] }
 0x271   :  { %v2831_v59 = vmul.f32 %v7012_v46, %v6988_v6  ;;  %v2832_v60 = vmul.f32 %v7012_v46, %v6997_v10  ;;  %v2833_v3 = vmul.f32 %v7012_v46, %v6998_v41  ;;  %v2834_v22 = vmul.f32 %v7012_v46, %v7005_v39 }
 0x272   :  { %v2835_v14 = vmul.f32 %v7012_v46, %v7013_v63  ;;  %v2836_v29 = vmul.f32 %v7012_v46, %v7014_v56  ;;  %v2837_v6 = vmul.f32 %v7012_v46, %v7015_v24  ;;  %v2838_v7 = vmul.f32 %v7012_v46, %v7016_v37 }
 0x273   :  { %v2839_v10 = vmul.f32 %v7012_v46, %v7017_v48  ;;  %v2840_v41 = vmul.f32 %v7012_v46, %v7018_v49  ;;  %v2841_v53 = vmul.f32 %v7012_v46, %v7019_v25  ;;  %v2842_v38 = vmul.f32 %v7012_v46, %v2540_v18 }
 0x274   :  { %v2843_v21 = vmul.f32 %v7012_v46, %v2541_v8  ;;  %v2844_v42 = vmul.f32 %v7012_v46, %v2542_v12  ;;  %v2845_v62 = vmul.f32 %v7012_v46, %v2543_v40  ;;  %v2846_v32 = vadd.f32 %v2828_v27, %v2806_v58 }
 0x275   :  { %v2847_v31 = vadd.f32 %v2829_v35, %v2807_v16  ;;  %v2848_v44 = vadd.f32 %v2830_v28, %v2808_v4  ;;  %v2849_v9 = vadd.f32 %v2831_v59, %v2809_v17  ;;  %v2850_v45 = vadd.f32 %v2832_v60, %v2810_v57 }
 0x276   :  { %v2851_v39 = vadd.f32 %v2833_v3, %v2811_v55  ;;  %v2852_v36 = vadd.f32 %v2834_v22, %v2812_v23  ;;  %v2853_v51 = vadd.f32 %v2835_v14, %v2813_v50  ;;  %v2854_v47 = vadd.f32 %v2836_v29, %v2814_v2  ;;  %2864 = vst [vmem:[#allocation7] sm:$0xff] %v2846_v32 }
 0x277   :  { %v2855_v43 = vadd.f32 %v2837_v6, %v2815_v20  ;;  %2865 = vst [vmem:[#allocation7 + $0x8] sm:$0x1] %v2847_v31  ;;  %v2856_v18 = vadd.f32 %v2838_v7, %v2816_v30  ;;  %v2857_v8 = vadd.f32 %v2839_v10, %v2817_v61  ;;  %v2858_v26 = vadd.f32 %v2840_v41, %v2818_v19 }
 0x278   :  { %v2859_v52 = vadd.f32 %v2841_v53, %v2819_v15  ;;  %2866 = vst [vmem:[#allocation7 + $0x10] sm:$0xff] %v2848_v44  ;;  %2867 = vst [vmem:[#allocation7 + $0x18] sm:$0x1] %v2849_v9  ;;  %v2860_v54 = vadd.f32 %v2842_v38, %v2820_v13  ;;  %v2861_v11 = vadd.f32 %v2843_v21, %v2821_v1 }
 0x279   :  { %2868 = vst [vmem:[#allocation7 + $0x20] sm:$0xff] %v2850_v45  ;;  %2869 = vst [vmem:[#allocation7 + $0x28] sm:$0x1] %v2851_v39  ;;  %v2862_v34 = vadd.f32 %v2844_v42, %v2822_v0  ;;  %v2863_v5 = vadd.f32 %v2845_v62, %v2823_v33 }
 0x27a   :  { %2870 = vst [vmem:[#allocation7 + $0x30] sm:$0xff] %v2852_v36  ;;  %2871 = vst [vmem:[#allocation7 + $0x38] sm:$0x1] %v2853_v51 }
 0x27b   :  { %2872 = vst [vmem:[#allocation7 + $0x40] sm:$0xff] %v2854_v47  ;;  %2873 = vst [vmem:[#allocation7 + $0x48] sm:$0x1] %v2855_v43 }
 0x27c   :  { %2874 = vst [vmem:[#allocation7 + $0x50] sm:$0xff] %v2856_v18  ;;  %2875 = vst [vmem:[#allocation7 + $0x58] sm:$0x1] %v2857_v8 }
 0x27d   :  { %2876 = vst [vmem:[#allocation7 + $0x60] sm:$0xff] %v2858_v26  ;;  %2877 = vst [vmem:[#allocation7 + $0x68] sm:$0x1] %v2859_v52 }
 0x27e   :  { %2878 = vst [vmem:[#allocation7 + $0x70] sm:$0xff] %v2860_v54  ;;  %2879 = vst [vmem:[#allocation7 + $0x78] sm:$0x1] %v2861_v11 }
 0x27f   :  { %2880 = vst [vmem:[#allocation7 + $0x80] sm:$0xff] %v2862_v34  ;;  %2881 = vst [vmem:[#allocation7 + $0x88] sm:$0x1] %v2863_v5 }
 0x280   :  { %2980 = shalt.err (!%p2977_p0)
}
 0x281   :  { %2893 = dma.vmem_to_hbm [thread:$0]  %s2888_s1, 2304, %s5982_s2, [#allocation4], %s2996_s12, %s2996_s12, %s2997_s13  }
 0x282   :  { %2993 = dma.done.wait [#allocation4], 2304  }
 0x283   :  { %2994 = vsyncadd [#allocation4], 4294964992 }
 0x284   :  { %2897 = vsyncpa [#allocation3], 1 }
 0x285   :  { %2898 = vsyncpa [#allocation6], 1 }
 0x286   :  { %2899 = vsyncpa [#allocation4], 1 }

</bundles_post_ra>
